<compile_context>
chip_gen: v7x
topology: tpu7x:2x2x1
jax: 0.10.0
libtpu: 0.0.40
codegen_flags: <defaults>
</compile_context>

<pallas_src>
import functools

import jax
import jax.numpy as jnp
from jax.experimental import pallas as pl
from jax.experimental.pallas import tpu as pltpu


# ---------------------------------------------------------------------------
# tile-size helpers
# ---------------------------------------------------------------------------

def _pick_div(n, target):
    """Largest divisor of n that is <= target."""
    for d in range(min(n, target), 0, -1):
        if n % d == 0:
            return d
    return 1


def _pick_rows(n, row_bytes, budget=4 << 20):
    """Largest divisor of n (multiple of 8, or n itself) whose tile fits `budget`."""
    target = int(max(8, budget // max(int(row_bytes), 1)))
    if n <= target:
        return n
    for d in range(min(n, target), 0, -1):
        if n % d == 0 and d % 8 == 0:
            return d
    return n


# ---------------------------------------------------------------------------
# Kernel 1: MaxPool(scale) + channel concat + BN1 batch statistics
# ---------------------------------------------------------------------------

def _pool_concat_stats_kernel(y_ref, zw_ref, xcat_ref, s1_ref, s2_ref, *, n_win):
    @pl.when(pl.program_id(0) == 0)
    def _():
        s1_ref[...] = jnp.zeros_like(s1_ref)
        s2_ref[...] = jnp.zeros_like(s2_ref)

    yv = y_ref[...]                       # (TM, Cp)
    zp = zw_ref[0]                        # (TM, 32)
    for k in range(1, n_win):
        zp = jnp.maximum(zp, zw_ref[k])
    x = jnp.concatenate([yv, zp], axis=1)  # (TM, Cp + 32)
    xcat_ref[...] = x
    s1_ref[...] = s1_ref[...] + jnp.sum(x, axis=0, keepdims=True)
    s2_ref[...] = s2_ref[...] + jnp.sum(x * x, axis=0, keepdims=True)


# ---------------------------------------------------------------------------
# Kernel 2: fused BN(affine-folded) + ReLU + 3x3 conv
#   optionally emits BN statistics of its own output (for the next BN layer)
#   optionally fuses the 1x1 conv_res projection (W-replicated output)
# ---------------------------------------------------------------------------

def _conv3x3_kernel(*refs, tb, w, h, cout, emit_stats, emit_res):
    n_rows = tb + 2
    idx = 0
    row_refs = refs[idx:idx + n_rows]; idx += n_rows
    kbn_ref = refs[idx]; idx += 1
    bbn_ref = refs[idx]; idx += 1
    wt_ref = refs[idx]; idx += 1
    bias_ref = refs[idx]; idx += 1
    if emit_res:
        wres_ref = refs[idx]; idx += 1
        bres_ref = refs[idx]; idx += 1
    y_ref = refs[idx]; idx += 1
    if emit_stats:
        s1_ref = refs[idx]; idx += 1
        s2_ref = refs[idx]; idx += 1
    if emit_res:
        xres_ref = refs[idx]; idx += 1

    i = pl.program_id(1)

    if emit_stats:
        @pl.when(jnp.logical_and(pl.program_id(0) == 0, i == 0))
        def _():
            s1_ref[...] = jnp.zeros_like(s1_ref)
            s2_ref[...] = jnp.zeros_like(s2_ref)

    k_bn = kbn_ref[...]                   # (1, Cin)   gamma * inv_std
    b_bn = bbn_ref[...]                   # (1, Cin)   beta - mean * gamma * inv_std
    bias = bias_ref[...]                  # (1, Cout)
    if emit_res:
        wres = wres_ref[...]              # (Cout, Cres) bf16
        bres = bres_ref[...]              # (1, Cres)

    # Validity mask over the padded width: cols 1..w are real, 0 and w+1 are pad.
    col = jax.lax.broadcasted_iota(jnp.int32, (w + 2, 1), 0)
    col_ok = jnp.logical_and(col >= 1, col <= w)

    # BN + ReLU for every padded input row of this tile.  The reference module
    # zero-pads *after* the activation, so pad rows/cols are forced to exactly 0.
    acts = []
    for j in range(n_rows):
        xr = row_refs[j][0, 0]                         # (w+2, Cin) f32
        a = jnp.maximum(xr * k_bn + b_bn, 0.0)
        gr = i * tb + j                                # padded-row index
        row_ok = jnp.logical_and(gr >= 1, gr <= h)
        a = jnp.where(jnp.logical_and(col_ok, row_ok), a, 0.0)
        acts.append(a)

    if emit_stats:
        ssum = jnp.zeros((1, cout), jnp.float32)
        ssq = jnp.zeros((1, cout), jnp.float32)

    for r in range(tb):
        acc = jnp.zeros((w, cout), jnp.float32)
        for ky in range(3):
            a = acts[r + ky]
            for kx in range(3):
                lhs = a[kx:kx + w, :].astype(jnp.bfloat16)         # (w, Cin)
                acc = acc + jnp.dot(lhs, wt_ref[ky * 3 + kx],
                                    preferred_element_type=jnp.float32)
        yrow = acc + bias                                          # (w, Cout) f32
        y_ref[0, r] = yrow
        if emit_stats:
            ssum = ssum + jnp.sum(yrow, axis=0, keepdims=True)
            ssq = ssq + jnp.sum(yrow * yrow, axis=0, keepdims=True)
        if emit_res:
            xrow = jnp.dot(yrow.astype(jnp.bfloat16), wres,
                           preferred_element_type=jnp.float32) + bres
            xres_ref[0, r] = xrow

    if emit_stats:
        s1_ref[...] = s1_ref[...] + ssum
        s2_ref[...] = s2_ref[...] + ssq


def _row_index_map(tb, j):
    def index_map(ni, ii):
        return (ni, ii * tb + j, 0, 0)
    return index_map


def conv3x3_bn_relu(x_img, k_bn, b_bn, w_taps, bias, *, emit_stats=False,
                    emit_res=False, wres=None, bres=None):
    n, h, w, cin = x_img.shape
    cout = bias.shape[-1]
    tb = _pick_div(h, 4)
    x_pad = jnp.pad(x_img, ((0, 0), (1, 1), (1, 1), (0, 0)))   # raw zero pad (fixed in-kernel)

    n_rows = tb + 2
    in_specs = [pl.BlockSpec((1, 1, w + 2, cin), _row_index_map(tb, j))
                for j in range(n_rows)]
    in_specs += [
        pl.BlockSpec((1, cin), lambda ni, ii: (0, 0)),
        pl.BlockSpec((1, cin), lambda ni, ii: (0, 0)),
        pl.BlockSpec((9, cin, cout), lambda ni, ii: (0, 0, 0)),
        pl.BlockSpec((1, cout), lambda ni, ii: (0, 0)),
    ]
    inputs = [x_pad] * n_rows + [k_bn, b_bn, w_taps, bias]

    out_specs = [pl.BlockSpec((1, tb, w, cout), lambda ni, ii: (ni, ii, 0, 0))]
    out_shape = [jax.ShapeDtypeStruct((n, h, w, cout), jnp.float32)]
    if emit_stats:
        out_specs += [pl.BlockSpec((1, cout), lambda ni, ii: (0, 0))] * 2
        out_shape += [jax.ShapeDtypeStruct((1, cout), jnp.float32)] * 2
    if emit_res:
        cres = wres.shape[-1]
        in_specs += [pl.BlockSpec((cout, cres), lambda ni, ii: (0, 0)),
                     pl.BlockSpec((1, cres), lambda ni, ii: (0, 0))]
        inputs += [wres, bres]
        out_specs += [pl.BlockSpec((1, tb, w, cres), lambda ni, ii: (ni, ii, 0, 0))]
        out_shape += [jax.ShapeDtypeStruct((n, h, w, cres), jnp.float32)]

    sem = ("arbitrary", "arbitrary") if emit_stats else ("parallel", "parallel")
    kernel = functools.partial(_conv3x3_kernel, tb=tb, w=w, h=h, cout=cout,
                               emit_stats=emit_stats, emit_res=emit_res)
    outs = pl.pallas_call(
        kernel,
        grid=(n, h // tb),
        in_specs=in_specs,
        out_specs=out_specs,
        out_shape=out_shape,
        compiler_params=pltpu.CompilerParams(dimension_semantics=sem),
    )(*inputs)
    return outs


# ---------------------------------------------------------------------------
# Kernel 3: fused nearest-upsample (H replication) + residual add
# ---------------------------------------------------------------------------

def _upsample_add_kernel(z_ref, x_ref, o_ref):
    # z: (TC, s, Ws*32), x: (TC, 1, Ws*32) -> sublane broadcast along s.
    o_ref[...] = z_ref[...] + x_ref[...]


# ---------------------------------------------------------------------------
# parameter setup & full forward
# ---------------------------------------------------------------------------

def _fold_bn(s1, s2, count, gamma, beta, eps=1e-5):
    mean = s1 / count
    var = s2 / count - mean * mean          # biased (training-mode) variance
    inv = jax.lax.rsqrt(var + eps)
    k = gamma * inv
    b = beta - mean * k
    return k, b


def init_params(key, prev_channels, out_channels, scale):
    c1_in = prev_channels + 32
    ks = jax.random.split(key, 10)
    p = {}
    w1 = 0.1 * jax.random.normal(ks[0], (out_channels, c1_in, 3, 3), jnp.float32)
    p["w1_taps"] = (jnp.transpose(w1, (2, 3, 1, 0))
                    .reshape(9, c1_in, out_channels).astype(jnp.bfloat16))
    p["b1"] = 0.1 * jax.random.normal(ks[1], (1, out_channels), jnp.float32)
    p["bn1_gamma"] = 1.0 + 0.1 * jax.random.normal(ks[2], (1, c1_in), jnp.float32)
    p["bn1_beta"] = 0.1 * jax.random.normal(ks[3], (1, c1_in), jnp.float32)

    w2 = 0.1 * jax.random.normal(ks[4], (out_channels, out_channels, 3, 3), jnp.float32)
    p["w2_taps"] = (jnp.transpose(w2, (2, 3, 1, 0))
                    .reshape(9, out_channels, out_channels).astype(jnp.bfloat16))
    p["b2"] = 0.1 * jax.random.normal(ks[5], (1, out_channels), jnp.float32)
    p["bn2_gamma"] = 1.0 + 0.1 * jax.random.normal(ks[6], (1, out_channels), jnp.float32)
    p["bn2_beta"] = 0.1 * jax.random.normal(ks[7], (1, out_channels), jnp.float32)

    wr = 0.1 * jax.random.normal(ks[8], (32, out_channels, 1, 1), jnp.float32)
    wres = jnp.transpose(wr[:, :, 0, 0], (1, 0))                     # (out_channels, 32)
    # Fold the W-axis nearest-neighbour replication into the 1x1 projection weights.
    p["wres_rep"] = jnp.tile(wres, (1, scale)).astype(jnp.bfloat16)  # (out, scale*32)
    br = 0.1 * jax.random.normal(ks[9], (1, 32), jnp.float32)
    p["bres_rep"] = jnp.tile(br, (1, scale))                         # (1, scale*32)
    return p


def frru_forward(y_nchw, z_nchw, params, scale):
    y = jnp.transpose(y_nchw, (0, 2, 3, 1)).astype(jnp.float32)      # NHWC
    z = jnp.transpose(z_nchw, (0, 2, 3, 1)).astype(jnp.float32)
    n, h, w, cp = y.shape
    _, hs, ws, cz = z.shape                                          # cz == 32
    s = scale
    m = n * h * w
    c1 = cp + cz

    # ---- K1: MaxPool(scale) + channel concat + BN1 batch statistics ----
    z_win = (z.reshape(n, h, s, w, s, cz)
              .transpose(2, 4, 0, 1, 3, 5)
              .reshape(s * s, m, cz))
    y_flat = y.reshape(m, cp)
    tm = _pick_rows(m, 4 * (cp + s * s * cz + 2 * c1))
    xcat, s1, s2 = pl.pallas_call(
        functools.partial(_pool_concat_stats_kernel, n_win=s * s),
        grid=(m // tm,),
        in_specs=[pl.BlockSpec((tm, cp), lambda i: (i, 0)),
                  pl.BlockSpec((s * s, tm, cz), lambda i: (0, i, 0))],
        out_specs=[pl.BlockSpec((tm, c1), lambda i: (i, 0)),
                   pl.BlockSpec((1, c1), lambda i: (0, 0)),
                   pl.BlockSpec((1, c1), lambda i: (0, 0))],
        out_shape=[jax.ShapeDtypeStruct((m, c1), jnp.float32),
                   jax.ShapeDtypeStruct((1, c1), jnp.float32),
                   jax.ShapeDtypeStruct((1, c1), jnp.float32)],
        compiler_params=pltpu.CompilerParams(dimension_semantics=("arbitrary",)),
    )(y_flat, z_win)

    k1, b1 = _fold_bn(s1, s2, m, params["bn1_gamma"], params["bn1_beta"])

    # ---- conv1: fused BN + ReLU + 3x3 conv; also emits BN2 statistics ----
    y1, s1y, s2y = conv3x3_bn_relu(xcat.reshape(n, h, w, c1), k1, b1,
                                   params["w1_taps"], params["b1"],
                                   emit_stats=True)
    k2, b2 = _fold_bn(s1y, s2y, m, params["bn2_gamma"], params["bn2_beta"])

    # ---- conv2: fused BN + ReLU + 3x3 conv + fused 1x1 conv_res ----
    y2, xres_wide = conv3x3_bn_relu(y1, k2, b2,
                                    params["w2_taps"], params["b2"],
                                    emit_res=True,
                                    wres=params["wres_rep"],
                                    bres=params["bres_rep"])

    # ---- K3: fused nearest-upsample + residual add ----
    lane = ws * cz                                  # fine row flattened onto lanes
    z3 = z.reshape(n * h, s, lane)                  # free, row-major compatible
    xr3 = xres_wide.reshape(n * h, 1, lane)         # (W, s*32) flattening == (Ws, 32)
    tc = _pick_rows(n * h, 4 * lane * (2 * s + 1))
    z_prime = pl.pallas_call(
        _upsample_add_kernel,
        grid=((n * h) // tc,),
        in_specs=[pl.BlockSpec((tc, s, lane), lambda i: (i, 0, 0)),
                  pl.BlockSpec((tc, 1, lane), lambda i: (i, 0, 0))],
        out_specs=pl.BlockSpec((tc, s, lane), lambda i: (i, 0, 0)),
        out_shape=jax.ShapeDtypeStruct((n * h, s, lane), jnp.float32),
        compiler_params=pltpu.CompilerParams(dimension_semantics=("parallel",)),
    )(z3, xr3).reshape(n, hs, ws, cz)

    return (jnp.transpose(y2, (0, 3, 1, 2)),
            jnp.transpose(z_prime, (0, 3, 1, 2)))


# ---------------------------------------------------------------------------
# main
# ---------------------------------------------------------------------------

if __name__ == "__main__":
    N, prev_channels, out_channels, scale = 2, 4, 8, 2
    H = W = 8                                       # y spatial; z spatial = H*scale

    key = jax.random.PRNGKey(0)
    k_y, k_z, k_p = jax.random.split(key, 3)
    y_in = jax.random.normal(k_y, (N, prev_channels, H, W), jnp.float32)
    z_in = jax.random.normal(k_z, (N, 32, H * scale, W * scale), jnp.float32)
    params = init_params(k_p, prev_channels, out_channels, scale)

    fwd = jax.jit(functools.partial(frru_forward, params=params, scale=scale))
    y_prime, z_prime = fwd(y_in, z_in)
    jax.block_until_ready((y_prime, z_prime))

    assert y_prime.shape == (N, out_channels, H, W), y_prime.shape
    assert z_prime.shape == (N, 32, H * scale, W * scale), z_prime.shape
    assert y_prime.dtype == jnp.float32 and z_prime.dtype == jnp.float32
    assert bool(jnp.all(jnp.isfinite(y_prime)))
    assert bool(jnp.all(jnp.isfinite(z_prime)))

    print("KERNEL_OK")
</pallas_src>

<mosaic_0001>
module attributes {stable_mosaic.version = 11 : i64} {
  func.func @_pool_concat_stats_kernel(%arg0: i32, %arg1: memref<128x4xf32, #tpu.memory_space<vmem>>, %arg2: memref<4x128x32xf32, #tpu.memory_space<vmem>>, %arg3: memref<128x36xf32, #tpu.memory_space<vmem>>, %arg4: memref<1x36xf32, #tpu.memory_space<vmem>>, %arg5: memref<1x36xf32, #tpu.memory_space<vmem>>) attributes {dimension_semantics = [#tpu.dimension_semantics<arbitrary>], iteration_bounds = array<i64: 1>, scalar_prefetch = 0 : i64, scratch_operands = 0 : i64, tpu.core_type = #tpu.core_type<tc>, window_params = [{transform_indices = @transform_0, window_bounds = array<i64: 128, 4>}, {transform_indices = @transform_1, window_bounds = array<i64: 4, 128, 32>}, {transform_indices = @transform_2, window_bounds = array<i64: 128, 36>}, {pipeline_mode = #tpu.pipeline_mode<synchronous>, transform_indices = @transform_3, window_bounds = array<i64: 1, 36>}, {pipeline_mode = #tpu.pipeline_mode<synchronous>, transform_indices = @transform_4, window_bounds = array<i64: 1, 36>}]} {
    %c0_i32 = arith.constant 0 : i32
    %0 = arith.cmpi eq, %arg0, %c0_i32 : i32
    %1 = arith.extui %0 : i1 to i32
    %c0_i32_0 = arith.constant 0 : i32
    %2 = arith.cmpi ne, %1, %c0_i32_0 : i32
    scf.if %2 {
      %cst_22 = arith.constant 0.000000e+00 : f32
      %28 = vector.broadcast %cst_22 : f32 to vector<1x36xf32>
      %c0_23 = arith.constant 0 : index
      %c0_24 = arith.constant 0 : index
      %29 = vector.load %arg4[%c0_23, %c0_24] : memref<1x36xf32, #tpu.memory_space<vmem>>, vector<1x36xf32>
      tpu.vector_store %arg4[%c0_23, %c0_24], %28 {strides = array<i32>} : memref<1x36xf32, #tpu.memory_space<vmem>>, vector<1x36xf32>,
      %cst_25 = arith.constant 0.000000e+00 : f32
      %30 = vector.broadcast %cst_25 : f32 to vector<1x36xf32>
      %c0_26 = arith.constant 0 : index
      %c0_27 = arith.constant 0 : index
      %31 = vector.load %arg5[%c0_26, %c0_27] : memref<1x36xf32, #tpu.memory_space<vmem>>, vector<1x36xf32>
      tpu.vector_store %arg5[%c0_26, %c0_27], %30 {strides = array<i32>} : memref<1x36xf32, #tpu.memory_space<vmem>>, vector<1x36xf32>,
    } else {
    }
    %c0 = arith.constant 0 : index
    %c0_1 = arith.constant 0 : index
    %3 = vector.load %arg1[%c0, %c0_1] : memref<128x4xf32, #tpu.memory_space<vmem>>, vector<128x4xf32>
    %c0_2 = arith.constant 0 : index
    %c0_3 = arith.constant 0 : index
    %c0_4 = arith.constant 0 : index
    %4 = vector.load %arg2[%c0_2, %c0_3, %c0_4] : memref<4x128x32xf32, #tpu.memory_space<vmem>>, vector<1x128x32xf32>
    %5 = vector.shape_cast %4 : vector<1x128x32xf32> to vector<128x32xf32>
    %c1 = arith.constant 1 : index
    %c0_5 = arith.constant 0 : index
    %c0_6 = arith.constant 0 : index
    %6 = vector.load %arg2[%c1, %c0_5, %c0_6] : memref<4x128x32xf32, #tpu.memory_space<vmem>>, vector<1x128x32xf32>
    %7 = vector.shape_cast %6 : vector<1x128x32xf32> to vector<128x32xf32>
    %8 = arith.maximumf %5, %7 : vector<128x32xf32>
    %c2 = arith.constant 2 : index
    %c0_7 = arith.constant 0 : index
    %c0_8 = arith.constant 0 : index
    %9 = vector.load %arg2[%c2, %c0_7, %c0_8] : memref<4x128x32xf32, #tpu.memory_space<vmem>>, vector<1x128x32xf32>
    %10 = vector.shape_cast %9 : vector<1x128x32xf32> to vector<128x32xf32>
    %11 = arith.maximumf %8, %10 : vector<128x32xf32>
    %c3 = arith.constant 3 : index
    %c0_9 = arith.constant 0 : index
    %c0_10 = arith.constant 0 : index
    %12 = vector.load %arg2[%c3, %c0_9, %c0_10] : memref<4x128x32xf32, #tpu.memory_space<vmem>>, vector<1x128x32xf32>
    %13 = vector.shape_cast %12 : vector<1x128x32xf32> to vector<128x32xf32>
    %14 = arith.maximumf %11, %13 : vector<128x32xf32>
    %15 = tpu.concatenate %3, %14 in 1 : vector<128x4xf32>, vector<128x32xf32> -> vector<128x36xf32>
    %c0_11 = arith.constant 0 : index
    %c0_12 = arith.constant 0 : index
    %16 = vector.load %arg3[%c0_11, %c0_12] : memref<128x36xf32, #tpu.memory_space<vmem>>, vector<128x36xf32>
    tpu.vector_store %arg3[%c0_11, %c0_12], %15 {strides = array<i32>} : memref<128x36xf32, #tpu.memory_space<vmem>>, vector<128x36xf32>,
    %c0_13 = arith.constant 0 : index
    %c0_14 = arith.constant 0 : index
    %17 = vector.load %arg4[%c0_13, %c0_14] : memref<1x36xf32, #tpu.memory_space<vmem>>, vector<1x36xf32>
    %cst = arith.constant dense<0.000000e+00> : vector<36xf32>
    %18 = vector.multi_reduction <add>, %15, %cst [0] : vector<128x36xf32> to vector<36xf32>
    %19 = vector.shape_cast %18 : vector<36xf32> to vector<1x36xf32>
    %20 = arith.addf %17, %19 : vector<1x36xf32>
    %c0_15 = arith.constant 0 : index
    %c0_16 = arith.constant 0 : index
    %21 = vector.load %arg4[%c0_15, %c0_16] : memref<1x36xf32, #tpu.memory_space<vmem>>, vector<1x36xf32>
    tpu.vector_store %arg4[%c0_15, %c0_16], %20 {strides = array<i32>} : memref<1x36xf32, #tpu.memory_space<vmem>>, vector<1x36xf32>,
    %c0_17 = arith.constant 0 : index
    %c0_18 = arith.constant 0 : index
    %22 = vector.load %arg5[%c0_17, %c0_18] : memref<1x36xf32, #tpu.memory_space<vmem>>, vector<1x36xf32>
    %23 = arith.mulf %15, %15 : vector<128x36xf32>
    %cst_19 = arith.constant dense<0.000000e+00> : vector<36xf32>
    %24 = vector.multi_reduction <add>, %23, %cst_19 [0] : vector<128x36xf32> to vector<36xf32>
    %25 = vector.shape_cast %24 : vector<36xf32> to vector<1x36xf32>
    %26 = arith.addf %22, %25 : vector<1x36xf32>
    %c0_20 = arith.constant 0 : index
    %c0_21 = arith.constant 0 : index
    %27 = vector.load %arg5[%c0_20, %c0_21] : memref<1x36xf32, #tpu.memory_space<vmem>>, vector<1x36xf32>
    tpu.vector_store %arg5[%c0_20, %c0_21], %26 {strides = array<i32>} : memref<1x36xf32, #tpu.memory_space<vmem>>, vector<1x36xf32>,
    return
  }
  func.func @transform_0(%arg0: i32) -> (i32, i32) {
    %c0_i32 = arith.constant 0 : i32
    %c0_i32_0 = arith.constant 0 : i32
    return %arg0, %c0_i32 : i32, i32
  }
  func.func @transform_1(%arg0: i32) -> (i32, i32, i32) {
    %c0_i32 = arith.constant 0 : i32
    %c0_i32_0 = arith.constant 0 : i32
    %c0_i32_1 = arith.constant 0 : i32
    return %c0_i32, %arg0, %c0_i32_0 : i32, i32, i32
  }
  func.func @transform_2(%arg0: i32) -> (i32, i32) {
    %c0_i32 = arith.constant 0 : i32
    %c0_i32_0 = arith.constant 0 : i32
    return %arg0, %c0_i32 : i32, i32
  }
  func.func @transform_3(%arg0: i32) -> (i32, i32) {
    %c0_i32 = arith.constant 0 : i32
    %c0_i32_0 = arith.constant 0 : i32
    %c0_i32_1 = arith.constant 0 : i32
    return %c0_i32, %c0_i32_0 : i32, i32
  }
  func.func @transform_4(%arg0: i32) -> (i32, i32) {
    %c0_i32 = arith.constant 0 : i32
    %c0_i32_0 = arith.constant 0 : i32
    %c0_i32_1 = arith.constant 0 : i32
    return %c0_i32, %c0_i32_0 : i32, i32
  }
}

module attributes {stable_mosaic.version = 11 : i64} {
  func.func @_conv3x3_kernel(%arg0: i32, %arg1: i32, %arg2: memref<1x1x10x36xf32, #tpu.memory_space<vmem>>, %arg3: memref<1x1x10x36xf32, #tpu.memory_space<vmem>>, %arg4: memref<1x1x10x36xf32, #tpu.memory_space<vmem>>, %arg5: memref<1x1x10x36xf32, #tpu.memory_space<vmem>>, %arg6: memref<1x1x10x36xf32, #tpu.memory_space<vmem>>, %arg7: memref<1x1x10x36xf32, #tpu.memory_space<vmem>>, %arg8: memref<1x36xf32, #tpu.memory_space<vmem>>, %arg9: memref<1x36xf32, #tpu.memory_space<vmem>>, %arg10: memref<9x36x8xbf16, #tpu.memory_space<vmem>>, %arg11: memref<1x8xf32, #tpu.memory_space<vmem>>, %arg12: memref<1x4x8x8xf32, #tpu.memory_space<vmem>>, %arg13: memref<1x8xf32, #tpu.memory_space<vmem>>, %arg14: memref<1x8xf32, #tpu.memory_space<vmem>>) attributes {dimension_semantics = [#tpu.dimension_semantics<arbitrary>, #tpu.dimension_semantics<arbitrary>], iteration_bounds = array<i64: 2, 2>, scalar_prefetch = 0 : i64, scratch_operands = 0 : i64, tpu.core_type = #tpu.core_type<tc>, window_params = [{transform_indices = @transform_0, window_bounds = array<i64: 1, 1, 10, 36>}, {transform_indices = @transform_1, window_bounds = array<i64: 1, 1, 10, 36>}, {transform_indices = @transform_2, window_bounds = array<i64: 1, 1, 10, 36>}, {transform_indices = @transform_3, window_bounds = array<i64: 1, 1, 10, 36>}, {transform_indices = @transform_4, window_bounds = array<i64: 1, 1, 10, 36>}, {transform_indices = @transform_5, window_bounds = array<i64: 1, 1, 10, 36>}, {pipeline_mode = #tpu.pipeline_mode<synchronous>, transform_indices = @transform_6, window_bounds = array<i64: 1, 36>}, {pipeline_mode = #tpu.pipeline_mode<synchronous>, transform_indices = @transform_7, window_bounds = array<i64: 1, 36>}, {pipeline_mode = #tpu.pipeline_mode<synchronous>, transform_indices = @transform_8, window_bounds = array<i64: 9, 36, 8>}, {pipeline_mode = #tpu.pipeline_mode<synchronous>, transform_indices = @transform_9, window_bounds = array<i64: 1, 8>}, {transform_indices = @transform_10, window_bounds = array<i64: 1, 4, 8, 8>}, {pipeline_mode = #tpu.pipeline_mode<synchronous>, transform_indices = @transform_11, window_bounds = array<i64: 1, 8>}, {pipeline_mode = #tpu.pipeline_mode<synchronous>, transform_indices = @transform_12, window_bounds = array<i64: 1, 8>}]} {
    %c0_i32 = arith.constant 0 : i32
    %0 = arith.cmpi eq, %arg0, %c0_i32 : i32
    %c0_i32_0 = arith.constant 0 : i32
    %1 = arith.cmpi eq, %arg1, %c0_i32_0 : i32
    %2 = arith.andi %0, %1 : i1
    %3 = arith.extui %2 : i1 to i32
    %c0_i32_1 = arith.constant 0 : i32
    %4 = arith.cmpi ne, %3, %c0_i32_1 : i32
    scf.if %4 {
      %cst_236 = arith.constant 0.000000e+00 : f32
      %404 = vector.broadcast %cst_236 : f32 to vector<1x8xf32>
      %c0_237 = arith.constant 0 : index
      %c0_238 = arith.constant 0 : index
      %405 = vector.load %arg13[%c0_237, %c0_238] : memref<1x8xf32, #tpu.memory_space<vmem>>, vector<1x8xf32>
      tpu.vector_store %arg13[%c0_237, %c0_238], %404 {strides = array<i32>} : memref<1x8xf32, #tpu.memory_space<vmem>>, vector<1x8xf32>,
      %cst_239 = arith.constant 0.000000e+00 : f32
      %406 = vector.broadcast %cst_239 : f32 to vector<1x8xf32>
      %c0_240 = arith.constant 0 : index
      %c0_241 = arith.constant 0 : index
      %407 = vector.load %arg14[%c0_240, %c0_241] : memref<1x8xf32, #tpu.memory_space<vmem>>, vector<1x8xf32>
      tpu.vector_store %arg14[%c0_240, %c0_241], %406 {strides = array<i32>} : memref<1x8xf32, #tpu.memory_space<vmem>>, vector<1x8xf32>,
    } else {
    }
    %c0 = arith.constant 0 : index
    %c0_2 = arith.constant 0 : index
    %5 = vector.load %arg8[%c0, %c0_2] : memref<1x36xf32, #tpu.memory_space<vmem>>, vector<1x36xf32>
    %c0_3 = arith.constant 0 : index
    %c0_4 = arith.constant 0 : index
    %6 = vector.load %arg9[%c0_3, %c0_4] : memref<1x36xf32, #tpu.memory_space<vmem>>, vector<1x36xf32>
    %c0_5 = arith.constant 0 : index
    %c0_6 = arith.constant 0 : index
    %7 = vector.load %arg11[%c0_5, %c0_6] : memref<1x8xf32, #tpu.memory_space<vmem>>, vector<1x8xf32>
    %8 = tpu.iota {dimensions = array<i32: 0>} : vector<10x1xi32>
    %c1_i32 = arith.constant 1 : i32
    %9 = vector.broadcast %c1_i32 : i32 to vector<10x1xi32>
    %10 = arith.cmpi sge, %8, %9 : vector<10x1xi32>
    %c8_i32 = arith.constant 8 : i32
    %11 = vector.broadcast %c8_i32 : i32 to vector<10x1xi32>
    %12 = arith.cmpi sle, %8, %11 : vector<10x1xi32>
    %13 = arith.andi %10, %12 : vector<10x1xi1>
    %c0_7 = arith.constant 0 : index
    %c0_8 = arith.constant 0 : index
    %c0_9 = arith.constant 0 : index
    %c0_10 = arith.constant 0 : index
    %14 = vector.load %arg2[%c0_7, %c0_8, %c0_9, %c0_10] : memref<1x1x10x36xf32, #tpu.memory_space<vmem>>, vector<1x1x10x36xf32>
    %15 = vector.shape_cast %14 : vector<1x1x10x36xf32> to vector<10x36xf32>
    %16 = vector.broadcast %5 : vector<1x36xf32> to vector<10x36xf32>
    %17 = arith.mulf %15, %16 : vector<10x36xf32>
    %18 = vector.broadcast %6 : vector<1x36xf32> to vector<10x36xf32>
    %19 = arith.addf %17, %18 : vector<10x36xf32>
    %cst = arith.constant 0.000000e+00 : f32
    %20 = vector.broadcast %cst : f32 to vector<10x36xf32>
    %21 = arith.maximumf %19, %20 : vector<10x36xf32>
    %c4_i32 = arith.constant 4 : i32
    %22 = arith.muli %arg1, %c4_i32 : i32
    %c0_i32_11 = arith.constant 0 : i32
    %23 = arith.addi %22, %c0_i32_11 : i32
    %c1_i32_12 = arith.constant 1 : i32
    %24 = arith.cmpi sge, %23, %c1_i32_12 : i32
    %c8_i32_13 = arith.constant 8 : i32
    %25 = arith.cmpi sle, %23, %c8_i32_13 : i32
    %26 = arith.andi %24, %25 : i1
    %27 = vector.broadcast %26 : i1 to vector<10x1xi1>
    %28 = arith.andi %13, %27 : vector<10x1xi1>
    %cst_14 = arith.constant 0.000000e+00 : f32
    %29 = vector.shape_cast %28 : vector<10x1xi1> to vector<10x1xi1>
    %30 = vector.broadcast %29 : vector<10x1xi1> to vector<10x36xi1>
    %31 = vector.broadcast %cst_14 : f32 to vector<10x36xf32>
    %32 = arith.select %30, %21, %31 : vector<10x36xi1>, vector<10x36xf32>
    %c0_15 = arith.constant 0 : index
    %c0_16 = arith.constant 0 : index
    %c0_17 = arith.constant 0 : index
    %c0_18 = arith.constant 0 : index
    %33 = vector.load %arg3[%c0_15, %c0_16, %c0_17, %c0_18] : memref<1x1x10x36xf32, #tpu.memory_space<vmem>>, vector<1x1x10x36xf32>
    %34 = vector.shape_cast %33 : vector<1x1x10x36xf32> to vector<10x36xf32>
    %35 = vector.broadcast %5 : vector<1x36xf32> to vector<10x36xf32>
    %36 = arith.mulf %34, %35 : vector<10x36xf32>
    %37 = vector.broadcast %6 : vector<1x36xf32> to vector<10x36xf32>
    %38 = arith.addf %36, %37 : vector<10x36xf32>
    %cst_19 = arith.constant 0.000000e+00 : f32
    %39 = vector.broadcast %cst_19 : f32 to vector<10x36xf32>
    %40 = arith.maximumf %38, %39 : vector<10x36xf32>
    %c4_i32_20 = arith.constant 4 : i32
    %41 = arith.muli %arg1, %c4_i32_20 : i32
    %c1_i32_21 = arith.constant 1 : i32
    %42 = arith.addi %41, %c1_i32_21 : i32
    %c1_i32_22 = arith.constant 1 : i32
    %43 = arith.cmpi sge, %42, %c1_i32_22 : i32
    %c8_i32_23 = arith.constant 8 : i32
    %44 = arith.cmpi sle, %42, %c8_i32_23 : i32
    %45 = arith.andi %43, %44 : i1
    %46 = vector.broadcast %45 : i1 to vector<10x1xi1>
    %47 = arith.andi %13, %46 : vector<10x1xi1>
    %cst_24 = arith.constant 0.000000e+00 : f32
    %48 = vector.shape_cast %47 : vector<10x1xi1> to vector<10x1xi1>
    %49 = vector.broadcast %48 : vector<10x1xi1> to vector<10x36xi1>
    %50 = vector.broadcast %cst_24 : f32 to vector<10x36xf32>
    %51 = arith.select %49, %40, %50 : vector<10x36xi1>, vector<10x36xf32>
    %c0_25 = arith.constant 0 : index
    %c0_26 = arith.constant 0 : index
    %c0_27 = arith.constant 0 : index
    %c0_28 = arith.constant 0 : index
    %52 = vector.load %arg4[%c0_25, %c0_26, %c0_27, %c0_28] : memref<1x1x10x36xf32, #tpu.memory_space<vmem>>, vector<1x1x10x36xf32>
    %53 = vector.shape_cast %52 : vector<1x1x10x36xf32> to vector<10x36xf32>
    %54 = vector.broadcast %5 : vector<1x36xf32> to vector<10x36xf32>
    %55 = arith.mulf %53, %54 : vector<10x36xf32>
    %56 = vector.broadcast %6 : vector<1x36xf32> to vector<10x36xf32>
    %57 = arith.addf %55, %56 : vector<10x36xf32>
    %cst_29 = arith.constant 0.000000e+00 : f32
    %58 = vector.broadcast %cst_29 : f32 to vector<10x36xf32>
    %59 = arith.maximumf %57, %58 : vector<10x36xf32>
    %c4_i32_30 = arith.constant 4 : i32
    %60 = arith.muli %arg1, %c4_i32_30 : i32
    %c2_i32 = arith.constant 2 : i32
    %61 = arith.addi %60, %c2_i32 : i32
    %c1_i32_31 = arith.constant 1 : i32
    %62 = arith.cmpi sge, %61, %c1_i32_31 : i32
    %c8_i32_32 = arith.constant 8 : i32
    %63 = arith.cmpi sle, %61, %c8_i32_32 : i32
    %64 = arith.andi %62, %63 : i1
    %65 = vector.broadcast %64 : i1 to vector<10x1xi1>
    %66 = arith.andi %13, %65 : vector<10x1xi1>
    %cst_33 = arith.constant 0.000000e+00 : f32
    %67 = vector.shape_cast %66 : vector<10x1xi1> to vector<10x1xi1>
    %68 = vector.broadcast %67 : vector<10x1xi1> to vector<10x36xi1>
    %69 = vector.broadcast %cst_33 : f32 to vector<10x36xf32>
    %70 = arith.select %68, %59, %69 : vector<10x36xi1>, vector<10x36xf32>
    %c0_34 = arith.constant 0 : index
    %c0_35 = arith.constant 0 : index
    %c0_36 = arith.constant 0 : index
    %c0_37 = arith.constant 0 : index
    %71 = vector.load %arg5[%c0_34, %c0_35, %c0_36, %c0_37] : memref<1x1x10x36xf32, #tpu.memory_space<vmem>>, vector<1x1x10x36xf32>
    %72 = vector.shape_cast %71 : vector<1x1x10x36xf32> to vector<10x36xf32>
    %73 = vector.broadcast %5 : vector<1x36xf32> to vector<10x36xf32>
    %74 = arith.mulf %72, %73 : vector<10x36xf32>
    %75 = vector.broadcast %6 : vector<1x36xf32> to vector<10x36xf32>
    %76 = arith.addf %74, %75 : vector<10x36xf32>
    %cst_38 = arith.constant 0.000000e+00 : f32
    %77 = vector.broadcast %cst_38 : f32 to vector<10x36xf32>
    %78 = arith.maximumf %76, %77 : vector<10x36xf32>
    %c4_i32_39 = arith.constant 4 : i32
    %79 = arith.muli %arg1, %c4_i32_39 : i32
    %c3_i32 = arith.constant 3 : i32
    %80 = arith.addi %79, %c3_i32 : i32
    %c1_i32_40 = arith.constant 1 : i32
    %81 = arith.cmpi sge, %80, %c1_i32_40 : i32
    %c8_i32_41 = arith.constant 8 : i32
    %82 = arith.cmpi sle, %80, %c8_i32_41 : i32
    %83 = arith.andi %81, %82 : i1
    %84 = vector.broadcast %83 : i1 to vector<10x1xi1>
    %85 = arith.andi %13, %84 : vector<10x1xi1>
    %cst_42 = arith.constant 0.000000e+00 : f32
    %86 = vector.shape_cast %85 : vector<10x1xi1> to vector<10x1xi1>
    %87 = vector.broadcast %86 : vector<10x1xi1> to vector<10x36xi1>
    %88 = vector.broadcast %cst_42 : f32 to vector<10x36xf32>
    %89 = arith.select %87, %78, %88 : vector<10x36xi1>, vector<10x36xf32>
    %c0_43 = arith.constant 0 : index
    %c0_44 = arith.constant 0 : index
    %c0_45 = arith.constant 0 : index
    %c0_46 = arith.constant 0 : index
    %90 = vector.load %arg6[%c0_43, %c0_44, %c0_45, %c0_46] : memref<1x1x10x36xf32, #tpu.memory_space<vmem>>, vector<1x1x10x36xf32>
    %91 = vector.shape_cast %90 : vector<1x1x10x36xf32> to vector<10x36xf32>
    %92 = vector.broadcast %5 : vector<1x36xf32> to vector<10x36xf32>
    %93 = arith.mulf %91, %92 : vector<10x36xf32>
    %94 = vector.broadcast %6 : vector<1x36xf32> to vector<10x36xf32>
    %95 = arith.addf %93, %94 : vector<10x36xf32>
    %cst_47 = arith.constant 0.000000e+00 : f32
    %96 = vector.broadcast %cst_47 : f32 to vector<10x36xf32>
    %97 = arith.maximumf %95, %96 : vector<10x36xf32>
    %c4_i32_48 = arith.constant 4 : i32
    %98 = arith.muli %arg1, %c4_i32_48 : i32
    %c4_i32_49 = arith.constant 4 : i32
    %99 = arith.addi %98, %c4_i32_49 : i32
    %c1_i32_50 = arith.constant 1 : i32
    %100 = arith.cmpi sge, %99, %c1_i32_50 : i32
    %c8_i32_51 = arith.constant 8 : i32
    %101 = arith.cmpi sle, %99, %c8_i32_51 : i32
    %102 = arith.andi %100, %101 : i1
    %103 = vector.broadcast %102 : i1 to vector<10x1xi1>
    %104 = arith.andi %13, %103 : vector<10x1xi1>
    %cst_52 = arith.constant 0.000000e+00 : f32
    %105 = vector.shape_cast %104 : vector<10x1xi1> to vector<10x1xi1>
    %106 = vector.broadcast %105 : vector<10x1xi1> to vector<10x36xi1>
    %107 = vector.broadcast %cst_52 : f32 to vector<10x36xf32>
    %108 = arith.select %106, %97, %107 : vector<10x36xi1>, vector<10x36xf32>
    %c0_53 = arith.constant 0 : index
    %c0_54 = arith.constant 0 : index
    %c0_55 = arith.constant 0 : index
    %c0_56 = arith.constant 0 : index
    %109 = vector.load %arg7[%c0_53, %c0_54, %c0_55, %c0_56] : memref<1x1x10x36xf32, #tpu.memory_space<vmem>>, vector<1x1x10x36xf32>
    %110 = vector.shape_cast %109 : vector<1x1x10x36xf32> to vector<10x36xf32>
    %111 = vector.broadcast %5 : vector<1x36xf32> to vector<10x36xf32>
    %112 = arith.mulf %110, %111 : vector<10x36xf32>
    %113 = vector.broadcast %6 : vector<1x36xf32> to vector<10x36xf32>
    %114 = arith.addf %112, %113 : vector<10x36xf32>
    %cst_57 = arith.constant 0.000000e+00 : f32
    %115 = vector.broadcast %cst_57 : f32 to vector<10x36xf32>
    %116 = arith.maximumf %114, %115 : vector<10x36xf32>
    %c4_i32_58 = arith.constant 4 : i32
    %117 = arith.muli %arg1, %c4_i32_58 : i32
    %c5_i32 = arith.constant 5 : i32
    %118 = arith.addi %117, %c5_i32 : i32
    %c1_i32_59 = arith.constant 1 : i32
    %119 = arith.cmpi sge, %118, %c1_i32_59 : i32
    %c8_i32_60 = arith.constant 8 : i32
    %120 = arith.cmpi sle, %118, %c8_i32_60 : i32
    %121 = arith.andi %119, %120 : i1
    %122 = vector.broadcast %121 : i1 to vector<10x1xi1>
    %123 = arith.andi %13, %122 : vector<10x1xi1>
    %cst_61 = arith.constant 0.000000e+00 : f32
    %124 = vector.shape_cast %123 : vector<10x1xi1> to vector<10x1xi1>
    %125 = vector.broadcast %124 : vector<10x1xi1> to vector<10x36xi1>
    %126 = vector.broadcast %cst_61 : f32 to vector<10x36xf32>
    %127 = arith.select %125, %116, %126 : vector<10x36xi1>, vector<10x36xf32>
    %cst_62 = arith.constant 0.000000e+00 : f32
    %128 = vector.broadcast %cst_62 : f32 to vector<1x8xf32>
    %cst_63 = arith.constant 0.000000e+00 : f32
    %129 = vector.broadcast %cst_63 : f32 to vector<1x8xf32>
    %cst_64 = arith.constant 0.000000e+00 : f32
    %130 = vector.broadcast %cst_64 : f32 to vector<8x8xf32>
    %131 = vector.extract_strided_slice %32 {offsets = [0, 0], sizes = [8, 36], strides = [1, 1]} : vector<10x36xf32> to vector<8x36xf32>
    %132 = arith.truncf %131 : vector<8x36xf32> to vector<8x36xbf16>
    %c0_65 = arith.constant 0 : index
    %c0_66 = arith.constant 0 : index
    %c0_67 = arith.constant 0 : index
    %133 = vector.load %arg10[%c0_65, %c0_66, %c0_67] : memref<9x36x8xbf16, #tpu.memory_space<vmem>>, vector<1x36x8xbf16>
    %134 = vector.shape_cast %133 : vector<1x36x8xbf16> to vector<36x8xbf16>
    %cst_68 = arith.constant dense<0.000000e+00> : vector<8x8xf32>
    %135 = tpu.matmul %132, %134, %cst_68 {dimension_numbers = #tpu.dot_dimension_numbers<[1], [0], [0], [1], [0, 0, 1, 1], [], []>} : vector<8x36xbf16>, vector<36x8xbf16>, vector<8x8xf32> -> vector<8x8xf32>
    %136 = arith.addf %130, %135 : vector<8x8xf32>
    %137 = vector.extract_strided_slice %32 {offsets = [1, 0], sizes = [8, 36], strides = [1, 1]} : vector<10x36xf32> to vector<8x36xf32>
    %138 = arith.truncf %137 : vector<8x36xf32> to vector<8x36xbf16>
    %c1 = arith.constant 1 : index
    %c0_69 = arith.constant 0 : index
    %c0_70 = arith.constant 0 : index
    %139 = vector.load %arg10[%c1, %c0_69, %c0_70] : memref<9x36x8xbf16, #tpu.memory_space<vmem>>, vector<1x36x8xbf16>
    %140 = vector.shape_cast %139 : vector<1x36x8xbf16> to vector<36x8xbf16>
    %cst_71 = arith.constant dense<0.000000e+00> : vector<8x8xf32>
    %141 = tpu.matmul %138, %140, %cst_71 {dimension_numbers = #tpu.dot_dimension_numbers<[1], [0], [0], [1], [0, 0, 1, 1], [], []>} : vector<8x36xbf16>, vector<36x8xbf16>, vector<8x8xf32> -> vector<8x8xf32>
    %142 = arith.addf %136, %141 : vector<8x8xf32>
    %143 = vector.extract_strided_slice %32 {offsets = [2, 0], sizes = [8, 36], strides = [1, 1]} : vector<10x36xf32> to vector<8x36xf32>
    %144 = arith.truncf %143 : vector<8x36xf32> to vector<8x36xbf16>
    %c2 = arith.constant 2 : index
    %c0_72 = arith.constant 0 : index
    %c0_73 = arith.constant 0 : index
    %145 = vector.load %arg10[%c2, %c0_72, %c0_73] : memref<9x36x8xbf16, #tpu.memory_space<vmem>>, vector<1x36x8xbf16>
    %146 = vector.shape_cast %145 : vector<1x36x8xbf16> to vector<36x8xbf16>
    %cst_74 = arith.constant dense<0.000000e+00> : vector<8x8xf32>
    %147 = tpu.matmul %144, %146, %cst_74 {dimension_numbers = #tpu.dot_dimension_numbers<[1], [0], [0], [1], [0, 0, 1, 1], [], []>} : vector<8x36xbf16>, vector<36x8xbf16>, vector<8x8xf32> -> vector<8x8xf32>
    %148 = arith.addf %142, %147 : vector<8x8xf32>
    %149 = vector.extract_strided_slice %51 {offsets = [0, 0], sizes = [8, 36], strides = [1, 1]} : vector<10x36xf32> to vector<8x36xf32>
    %150 = arith.truncf %149 : vector<8x36xf32> to vector<8x36xbf16>
    %c3 = arith.constant 3 : index
    %c0_75 = arith.constant 0 : index
    %c0_76 = arith.constant 0 : index
    %151 = vector.load %arg10[%c3, %c0_75, %c0_76] : memref<9x36x8xbf16, #tpu.memory_space<vmem>>, vector<1x36x8xbf16>
    %152 = vector.shape_cast %151 : vector<1x36x8xbf16> to vector<36x8xbf16>
    %cst_77 = arith.constant dense<0.000000e+00> : vector<8x8xf32>
    %153 = tpu.matmul %150, %152, %cst_77 {dimension_numbers = #tpu.dot_dimension_numbers<[1], [0], [0], [1], [0, 0, 1, 1], [], []>} : vector<8x36xbf16>, vector<36x8xbf16>, vector<8x8xf32> -> vector<8x8xf32>
    %154 = arith.addf %148, %153 : vector<8x8xf32>
    %155 = vector.extract_strided_slice %51 {offsets = [1, 0], sizes = [8, 36], strides = [1, 1]} : vector<10x36xf32> to vector<8x36xf32>
    %156 = arith.truncf %155 : vector<8x36xf32> to vector<8x36xbf16>
    %c4 = arith.constant 4 : index
    %c0_78 = arith.constant 0 : index
    %c0_79 = arith.constant 0 : index
    %157 = vector.load %arg10[%c4, %c0_78, %c0_79] : memref<9x36x8xbf16, #tpu.memory_space<vmem>>, vector<1x36x8xbf16>
    %158 = vector.shape_cast %157 : vector<1x36x8xbf16> to vector<36x8xbf16>
    %cst_80 = arith.constant dense<0.000000e+00> : vector<8x8xf32>
    %159 = tpu.matmul %156, %158, %cst_80 {dimension_numbers = #tpu.dot_dimension_numbers<[1], [0], [0], [1], [0, 0, 1, 1], [], []>} : vector<8x36xbf16>, vector<36x8xbf16>, vector<8x8xf32> -> vector<8x8xf32>
    %160 = arith.addf %154, %159 : vector<8x8xf32>
    %161 = vector.extract_strided_slice %51 {offsets = [2, 0], sizes = [8, 36], strides = [1, 1]} : vector<10x36xf32> to vector<8x36xf32>
    %162 = arith.truncf %161 : vector<8x36xf32> to vector<8x36xbf16>
    %c5 = arith.constant 5 : index
    %c0_81 = arith.constant 0 : index
    %c0_82 = arith.constant 0 : index
    %163 = vector.load %arg10[%c5, %c0_81, %c0_82] : memref<9x36x8xbf16, #tpu.memory_space<vmem>>, vector<1x36x8xbf16>
    %164 = vector.shape_cast %163 : vector<1x36x8xbf16> to vector<36x8xbf16>
    %cst_83 = arith.constant dense<0.000000e+00> : vector<8x8xf32>
    %165 = tpu.matmul %162, %164, %cst_83 {dimension_numbers = #tpu.dot_dimension_numbers<[1], [0], [0], [1], [0, 0, 1, 1], [], []>} : vector<8x36xbf16>, vector<36x8xbf16>, vector<8x8xf32> -> vector<8x8xf32>
    %166 = arith.addf %160, %165 : vector<8x8xf32>
    %167 = vector.extract_strided_slice %70 {offsets = [0, 0], sizes = [8, 36], strides = [1, 1]} : vector<10x36xf32> to vector<8x36xf32>
    %168 = arith.truncf %167 : vector<8x36xf32> to vector<8x36xbf16>
    %c6 = arith.constant 6 : index
    %c0_84 = arith.constant 0 : index
    %c0_85 = arith.constant 0 : index
    %169 = vector.load %arg10[%c6, %c0_84, %c0_85] : memref<9x36x8xbf16, #tpu.memory_space<vmem>>, vector<1x36x8xbf16>
    %170 = vector.shape_cast %169 : vector<1x36x8xbf16> to vector<36x8xbf16>
    %cst_86 = arith.constant dense<0.000000e+00> : vector<8x8xf32>
    %171 = tpu.matmul %168, %170, %cst_86 {dimension_numbers = #tpu.dot_dimension_numbers<[1], [0], [0], [1], [0, 0, 1, 1], [], []>} : vector<8x36xbf16>, vector<36x8xbf16>, vector<8x8xf32> -> vector<8x8xf32>
    %172 = arith.addf %166, %171 : vector<8x8xf32>
    %173 = vector.extract_strided_slice %70 {offsets = [1, 0], sizes = [8, 36], strides = [1, 1]} : vector<10x36xf32> to vector<8x36xf32>
    %174 = arith.truncf %173 : vector<8x36xf32> to vector<8x36xbf16>
    %c7 = arith.constant 7 : index
    %c0_87 = arith.constant 0 : index
    %c0_88 = arith.constant 0 : index
    %175 = vector.load %arg10[%c7, %c0_87, %c0_88] : memref<9x36x8xbf16, #tpu.memory_space<vmem>>, vector<1x36x8xbf16>
    %176 = vector.shape_cast %175 : vector<1x36x8xbf16> to vector<36x8xbf16>
    %cst_89 = arith.constant dense<0.000000e+00> : vector<8x8xf32>
    %177 = tpu.matmul %174, %176, %cst_89 {dimension_numbers = #tpu.dot_dimension_numbers<[1], [0], [0], [1], [0, 0, 1, 1], [], []>} : vector<8x36xbf16>, vector<36x8xbf16>, vector<8x8xf32> -> vector<8x8xf32>
    %178 = arith.addf %172, %177 : vector<8x8xf32>
    %179 = vector.extract_strided_slice %70 {offsets = [2, 0], sizes = [8, 36], strides = [1, 1]} : vector<10x36xf32> to vector<8x36xf32>
    %180 = arith.truncf %179 : vector<8x36xf32> to vector<8x36xbf16>
    %c8 = arith.constant 8 : index
    %c0_90 = arith.constant 0 : index
    %c0_91 = arith.constant 0 : index
    %181 = vector.load %arg10[%c8, %c0_90, %c0_91] : memref<9x36x8xbf16, #tpu.memory_space<vmem>>, vector<1x36x8xbf16>
    %182 = vector.shape_cast %181 : vector<1x36x8xbf16> to vector<36x8xbf16>
    %cst_92 = arith.constant dense<0.000000e+00> : vector<8x8xf32>
    %183 = tpu.matmul %180, %182, %cst_92 {dimension_numbers = #tpu.dot_dimension_numbers<[1], [0], [0], [1], [0, 0, 1, 1], [], []>} : vector<8x36xbf16>, vector<36x8xbf16>, vector<8x8xf32> -> vector<8x8xf32>
    %184 = arith.addf %178, %183 : vector<8x8xf32>
    %185 = vector.broadcast %7 : vector<1x8xf32> to vector<8x8xf32>
    %186 = arith.addf %184, %185 : vector<8x8xf32>
    %c0_93 = arith.constant 0 : index
    %c0_94 = arith.constant 0 : index
    %c0_95 = arith.constant 0 : index
    %c0_96 = arith.constant 0 : index
    %187 = vector.load %arg12[%c0_93, %c0_94, %c0_95, %c0_96] : memref<1x4x8x8xf32, #tpu.memory_space<vmem>>, vector<1x1x8x8xf32>
    %188 = vector.shape_cast %187 : vector<1x1x8x8xf32> to vector<8x8xf32>
    %189 = vector.shape_cast %186 : vector<8x8xf32> to vector<1x1x8x8xf32>
    tpu.vector_store %arg12[%c0_93, %c0_94, %c0_95, %c0_96], %189 {strides = array<i32>} : memref<1x4x8x8xf32, #tpu.memory_space<vmem>>, vector<1x1x8x8xf32>,
    %cst_97 = arith.constant dense<0.000000e+00> : vector<8xf32>
    %190 = vector.multi_reduction <add>, %186, %cst_97 [0] : vector<8x8xf32> to vector<8xf32>
    %191 = vector.shape_cast %190 : vector<8xf32> to vector<1x8xf32>
    %192 = arith.addf %128, %191 : vector<1x8xf32>
    %193 = arith.mulf %186, %186 : vector<8x8xf32>
    %cst_98 = arith.constant dense<0.000000e+00> : vector<8xf32>
    %194 = vector.multi_reduction <add>, %193, %cst_98 [0] : vector<8x8xf32> to vector<8xf32>
    %195 = vector.shape_cast %194 : vector<8xf32> to vector<1x8xf32>
    %196 = arith.addf %129, %195 : vector<1x8xf32>
    %cst_99 = arith.constant 0.000000e+00 : f32
    %197 = vector.broadcast %cst_99 : f32 to vector<8x8xf32>
    %198 = vector.extract_strided_slice %51 {offsets = [0, 0], sizes = [8, 36], strides = [1, 1]} : vector<10x36xf32> to vector<8x36xf32>
    %199 = arith.truncf %198 : vector<8x36xf32> to vector<8x36xbf16>
    %c0_100 = arith.constant 0 : index
    %c0_101 = arith.constant 0 : index
    %c0_102 = arith.constant 0 : index
    %200 = vector.load %arg10[%c0_100, %c0_101, %c0_102] : memref<9x36x8xbf16, #tpu.memory_space<vmem>>, vector<1x36x8xbf16>
    %201 = vector.shape_cast %200 : vector<1x36x8xbf16> to vector<36x8xbf16>
    %cst_103 = arith.constant dense<0.000000e+00> : vector<8x8xf32>
    %202 = tpu.matmul %199, %201, %cst_103 {dimension_numbers = #tpu.dot_dimension_numbers<[1], [0], [0], [1], [0, 0, 1, 1], [], []>} : vector<8x36xbf16>, vector<36x8xbf16>, vector<8x8xf32> -> vector<8x8xf32>
    %203 = arith.addf %197, %202 : vector<8x8xf32>
    %204 = vector.extract_strided_slice %51 {offsets = [1, 0], sizes = [8, 36], strides = [1, 1]} : vector<10x36xf32> to vector<8x36xf32>
    %205 = arith.truncf %204 : vector<8x36xf32> to vector<8x36xbf16>
    %c1_104 = arith.constant 1 : index
    %c0_105 = arith.constant 0 : index
    %c0_106 = arith.constant 0 : index
    %206 = vector.load %arg10[%c1_104, %c0_105, %c0_106] : memref<9x36x8xbf16, #tpu.memory_space<vmem>>, vector<1x36x8xbf16>
    %207 = vector.shape_cast %206 : vector<1x36x8xbf16> to vector<36x8xbf16>
    %cst_107 = arith.constant dense<0.000000e+00> : vector<8x8xf32>
    %208 = tpu.matmul %205, %207, %cst_107 {dimension_numbers = #tpu.dot_dimension_numbers<[1], [0], [0], [1], [0, 0, 1, 1], [], []>} : vector<8x36xbf16>, vector<36x8xbf16>, vector<8x8xf32> -> vector<8x8xf32>
    %209 = arith.addf %203, %208 : vector<8x8xf32>
    %210 = vector.extract_strided_slice %51 {offsets = [2, 0], sizes = [8, 36], strides = [1, 1]} : vector<10x36xf32> to vector<8x36xf32>
    %211 = arith.truncf %210 : vector<8x36xf32> to vector<8x36xbf16>
    %c2_108 = arith.constant 2 : index
    %c0_109 = arith.constant 0 : index
    %c0_110 = arith.constant 0 : index
    %212 = vector.load %arg10[%c2_108, %c0_109, %c0_110] : memref<9x36x8xbf16, #tpu.memory_space<vmem>>, vector<1x36x8xbf16>
    %213 = vector.shape_cast %212 : vector<1x36x8xbf16> to vector<36x8xbf16>
    %cst_111 = arith.constant dense<0.000000e+00> : vector<8x8xf32>
    %214 = tpu.matmul %211, %213, %cst_111 {dimension_numbers = #tpu.dot_dimension_numbers<[1], [0], [0], [1], [0, 0, 1, 1], [], []>} : vector<8x36xbf16>, vector<36x8xbf16>, vector<8x8xf32> -> vector<8x8xf32>
    %215 = arith.addf %209, %214 : vector<8x8xf32>
    %216 = vector.extract_strided_slice %70 {offsets = [0, 0], sizes = [8, 36], strides = [1, 1]} : vector<10x36xf32> to vector<8x36xf32>
    %217 = arith.truncf %216 : vector<8x36xf32> to vector<8x36xbf16>
    %c3_112 = arith.constant 3 : index
    %c0_113 = arith.constant 0 : index
    %c0_114 = arith.constant 0 : index
    %218 = vector.load %arg10[%c3_112, %c0_113, %c0_114] : memref<9x36x8xbf16, #tpu.memory_space<vmem>>, vector<1x36x8xbf16>
    %219 = vector.shape_cast %218 : vector<1x36x8xbf16> to vector<36x8xbf16>
    %cst_115 = arith.constant dense<0.000000e+00> : vector<8x8xf32>
    %220 = tpu.matmul %217, %219, %cst_115 {dimension_numbers = #tpu.dot_dimension_numbers<[1], [0], [0], [1], [0, 0, 1, 1], [], []>} : vector<8x36xbf16>, vector<36x8xbf16>, vector<8x8xf32> -> vector<8x8xf32>
    %221 = arith.addf %215, %220 : vector<8x8xf32>
    %222 = vector.extract_strided_slice %70 {offsets = [1, 0], sizes = [8, 36], strides = [1, 1]} : vector<10x36xf32> to vector<8x36xf32>
    %223 = arith.truncf %222 : vector<8x36xf32> to vector<8x36xbf16>
    %c4_116 = arith.constant 4 : index
    %c0_117 = arith.constant 0 : index
    %c0_118 = arith.constant 0 : index
    %224 = vector.load %arg10[%c4_116, %c0_117, %c0_118] : memref<9x36x8xbf16, #tpu.memory_space<vmem>>, vector<1x36x8xbf16>
    %225 = vector.shape_cast %224 : vector<1x36x8xbf16> to vector<36x8xbf16>
    %cst_119 = arith.constant dense<0.000000e+00> : vector<8x8xf32>
    %226 = tpu.matmul %223, %225, %cst_119 {dimension_numbers = #tpu.dot_dimension_numbers<[1], [0], [0], [1], [0, 0, 1, 1], [], []>} : vector<8x36xbf16>, vector<36x8xbf16>, vector<8x8xf32> -> vector<8x8xf32>
    %227 = arith.addf %221, %226 : vector<8x8xf32>
    %228 = vector.extract_strided_slice %70 {offsets = [2, 0], sizes = [8, 36], strides = [1, 1]} : vector<10x36xf32> to vector<8x36xf32>
    %229 = arith.truncf %228 : vector<8x36xf32> to vector<8x36xbf16>
    %c5_120 = arith.constant 5 : index
    %c0_121 = arith.constant 0 : index
    %c0_122 = arith.constant 0 : index
    %230 = vector.load %arg10[%c5_120, %c0_121, %c0_122] : memref<9x36x8xbf16, #tpu.memory_space<vmem>>, vector<1x36x8xbf16>
    %231 = vector.shape_cast %230 : vector<1x36x8xbf16> to vector<36x8xbf16>
    %cst_123 = arith.constant dense<0.000000e+00> : vector<8x8xf32>
    %232 = tpu.matmul %229, %231, %cst_123 {dimension_numbers = #tpu.dot_dimension_numbers<[1], [0], [0], [1], [0, 0, 1, 1], [], []>} : vector<8x36xbf16>, vector<36x8xbf16>, vector<8x8xf32> -> vector<8x8xf32>
    %233 = arith.addf %227, %232 : vector<8x8xf32>
    %234 = vector.extract_strided_slice %89 {offsets = [0, 0], sizes = [8, 36], strides = [1, 1]} : vector<10x36xf32> to vector<8x36xf32>
    %235 = arith.truncf %234 : vector<8x36xf32> to vector<8x36xbf16>
    %c6_124 = arith.constant 6 : index
    %c0_125 = arith.constant 0 : index
    %c0_126 = arith.constant 0 : index
    %236 = vector.load %arg10[%c6_124, %c0_125, %c0_126] : memref<9x36x8xbf16, #tpu.memory_space<vmem>>, vector<1x36x8xbf16>
    %237 = vector.shape_cast %236 : vector<1x36x8xbf16> to vector<36x8xbf16>
    %cst_127 = arith.constant dense<0.000000e+00> : vector<8x8xf32>
    %238 = tpu.matmul %235, %237, %cst_127 {dimension_numbers = #tpu.dot_dimension_numbers<[1], [0], [0], [1], [0, 0, 1, 1], [], []>} : vector<8x36xbf16>, vector<36x8xbf16>, vector<8x8xf32> -> vector<8x8xf32>
    %239 = arith.addf %233, %238 : vector<8x8xf32>
    %240 = vector.extract_strided_slice %89 {offsets = [1, 0], sizes = [8, 36], strides = [1, 1]} : vector<10x36xf32> to vector<8x36xf32>
    %241 = arith.truncf %240 : vector<8x36xf32> to vector<8x36xbf16>
    %c7_128 = arith.constant 7 : index
    %c0_129 = arith.constant 0 : index
    %c0_130 = arith.constant 0 : index
    %242 = vector.load %arg10[%c7_128, %c0_129, %c0_130] : memref<9x36x8xbf16, #tpu.memory_space<vmem>>, vector<1x36x8xbf16>
    %243 = vector.shape_cast %242 : vector<1x36x8xbf16> to vector<36x8xbf16>
    %cst_131 = arith.constant dense<0.000000e+00> : vector<8x8xf32>
    %244 = tpu.matmul %241, %243, %cst_131 {dimension_numbers = #tpu.dot_dimension_numbers<[1], [0], [0], [1], [0, 0, 1, 1], [], []>} : vector<8x36xbf16>, vector<36x8xbf16>, vector<8x8xf32> -> vector<8x8xf32>
    %245 = arith.addf %239, %244 : vector<8x8xf32>
    %246 = vector.extract_strided_slice %89 {offsets = [2, 0], sizes = [8, 36], strides = [1, 1]} : vector<10x36xf32> to vector<8x36xf32>
    %247 = arith.truncf %246 : vector<8x36xf32> to vector<8x36xbf16>
    %c8_132 = arith.constant 8 : index
    %c0_133 = arith.constant 0 : index
    %c0_134 = arith.constant 0 : index
    %248 = vector.load %arg10[%c8_132, %c0_133, %c0_134] : memref<9x36x8xbf16, #tpu.memory_space<vmem>>, vector<1x36x8xbf16>
    %249 = vector.shape_cast %248 : vector<1x36x8xbf16> to vector<36x8xbf16>
    %cst_135 = arith.constant dense<0.000000e+00> : vector<8x8xf32>
    %250 = tpu.matmul %247, %249, %cst_135 {dimension_numbers = #tpu.dot_dimension_numbers<[1], [0], [0], [1], [0, 0, 1, 1], [], []>} : vector<8x36xbf16>, vector<36x8xbf16>, vector<8x8xf32> -> vector<8x8xf32>
    %251 = arith.addf %245, %250 : vector<8x8xf32>
    %252 = vector.broadcast %7 : vector<1x8xf32> to vector<8x8xf32>
    %253 = arith.addf %251, %252 : vector<8x8xf32>
    %c0_136 = arith.constant 0 : index
    %c1_137 = arith.constant 1 : index
    %c0_138 = arith.constant 0 : index
    %c0_139 = arith.constant 0 : index
    %254 = vector.load %arg12[%c0_136, %c1_137, %c0_138, %c0_139] : memref<1x4x8x8xf32, #tpu.memory_space<vmem>>, vector<1x1x8x8xf32>
    %255 = vector.shape_cast %254 : vector<1x1x8x8xf32> to vector<8x8xf32>
    %256 = vector.shape_cast %253 : vector<8x8xf32> to vector<1x1x8x8xf32>
    tpu.vector_store %arg12[%c0_136, %c1_137, %c0_138, %c0_139], %256 {strides = array<i32>} : memref<1x4x8x8xf32, #tpu.memory_space<vmem>>, vector<1x1x8x8xf32>,
    %cst_140 = arith.constant dense<0.000000e+00> : vector<8xf32>
    %257 = vector.multi_reduction <add>, %253, %cst_140 [0] : vector<8x8xf32> to vector<8xf32>
    %258 = vector.shape_cast %257 : vector<8xf32> to vector<1x8xf32>
    %259 = arith.addf %192, %258 : vector<1x8xf32>
    %260 = arith.mulf %253, %253 : vector<8x8xf32>
    %cst_141 = arith.constant dense<0.000000e+00> : vector<8xf32>
    %261 = vector.multi_reduction <add>, %260, %cst_141 [0] : vector<8x8xf32> to vector<8xf32>
    %262 = vector.shape_cast %261 : vector<8xf32> to vector<1x8xf32>
    %263 = arith.addf %196, %262 : vector<1x8xf32>
    %cst_142 = arith.constant 0.000000e+00 : f32
    %264 = vector.broadcast %cst_142 : f32 to vector<8x8xf32>
    %265 = vector.extract_strided_slice %70 {offsets = [0, 0], sizes = [8, 36], strides = [1, 1]} : vector<10x36xf32> to vector<8x36xf32>
    %266 = arith.truncf %265 : vector<8x36xf32> to vector<8x36xbf16>
    %c0_143 = arith.constant 0 : index
    %c0_144 = arith.constant 0 : index
    %c0_145 = arith.constant 0 : index
    %267 = vector.load %arg10[%c0_143, %c0_144, %c0_145] : memref<9x36x8xbf16, #tpu.memory_space<vmem>>, vector<1x36x8xbf16>
    %268 = vector.shape_cast %267 : vector<1x36x8xbf16> to vector<36x8xbf16>
    %cst_146 = arith.constant dense<0.000000e+00> : vector<8x8xf32>
    %269 = tpu.matmul %266, %268, %cst_146 {dimension_numbers = #tpu.dot_dimension_numbers<[1], [0], [0], [1], [0, 0, 1, 1], [], []>} : vector<8x36xbf16>, vector<36x8xbf16>, vector<8x8xf32> -> vector<8x8xf32>
    %270 = arith.addf %264, %269 : vector<8x8xf32>
    %271 = vector.extract_strided_slice %70 {offsets = [1, 0], sizes = [8, 36], strides = [1, 1]} : vector<10x36xf32> to vector<8x36xf32>
    %272 = arith.truncf %271 : vector<8x36xf32> to vector<8x36xbf16>
    %c1_147 = arith.constant 1 : index
    %c0_148 = arith.constant 0 : index
    %c0_149 = arith.constant 0 : index
    %273 = vector.load %arg10[%c1_147, %c0_148, %c0_149] : memref<9x36x8xbf16, #tpu.memory_space<vmem>>, vector<1x36x8xbf16>
    %274 = vector.shape_cast %273 : vector<1x36x8xbf16> to vector<36x8xbf16>
    %cst_150 = arith.constant dense<0.000000e+00> : vector<8x8xf32>
    %275 = tpu.matmul %272, %274, %cst_150 {dimension_numbers = #tpu.dot_dimension_numbers<[1], [0], [0], [1], [0, 0, 1, 1], [], []>} : vector<8x36xbf16>, vector<36x8xbf16>, vector<8x8xf32> -> vector<8x8xf32>
    %276 = arith.addf %270, %275 : vector<8x8xf32>
    %277 = vector.extract_strided_slice %70 {offsets = [2, 0], sizes = [8, 36], strides = [1, 1]} : vector<10x36xf32> to vector<8x36xf32>
    %278 = arith.truncf %277 : vector<8x36xf32> to vector<8x36xbf16>
    %c2_151 = arith.constant 2 : index
    %c0_152 = arith.constant 0 : index
    %c0_153 = arith.constant 0 : index
    %279 = vector.load %arg10[%c2_151, %c0_152, %c0_153] : memref<9x36x8xbf16, #tpu.memory_space<vmem>>, vector<1x36x8xbf16>
    %280 = vector.shape_cast %279 : vector<1x36x8xbf16> to vector<36x8xbf16>
    %cst_154 = arith.constant dense<0.000000e+00> : vector<8x8xf32>
    %281 = tpu.matmul %278, %280, %cst_154 {dimension_numbers = #tpu.dot_dimension_numbers<[1], [0], [0], [1], [0, 0, 1, 1], [], []>} : vector<8x36xbf16>, vector<36x8xbf16>, vector<8x8xf32> -> vector<8x8xf32>
    %282 = arith.addf %276, %281 : vector<8x8xf32>
    %283 = vector.extract_strided_slice %89 {offsets = [0, 0], sizes = [8, 36], strides = [1, 1]} : vector<10x36xf32> to vector<8x36xf32>
    %284 = arith.truncf %283 : vector<8x36xf32> to vector<8x36xbf16>
    %c3_155 = arith.constant 3 : index
    %c0_156 = arith.constant 0 : index
    %c0_157 = arith.constant 0 : index
    %285 = vector.load %arg10[%c3_155, %c0_156, %c0_157] : memref<9x36x8xbf16, #tpu.memory_space<vmem>>, vector<1x36x8xbf16>
    %286 = vector.shape_cast %285 : vector<1x36x8xbf16> to vector<36x8xbf16>
    %cst_158 = arith.constant dense<0.000000e+00> : vector<8x8xf32>
    %287 = tpu.matmul %284, %286, %cst_158 {dimension_numbers = #tpu.dot_dimension_numbers<[1], [0], [0], [1], [0, 0, 1, 1], [], []>} : vector<8x36xbf16>, vector<36x8xbf16>, vector<8x8xf32> -> vector<8x8xf32>
    %288 = arith.addf %282, %287 : vector<8x8xf32>
    %289 = vector.extract_strided_slice %89 {offsets = [1, 0], sizes = [8, 36], strides = [1, 1]} : vector<10x36xf32> to vector<8x36xf32>
    %290 = arith.truncf %289 : vector<8x36xf32> to vector<8x36xbf16>
    %c4_159 = arith.constant 4 : index
    %c0_160 = arith.constant 0 : index
    %c0_161 = arith.constant 0 : index
    %291 = vector.load %arg10[%c4_159, %c0_160, %c0_161] : memref<9x36x8xbf16, #tpu.memory_space<vmem>>, vector<1x36x8xbf16>
    %292 = vector.shape_cast %291 : vector<1x36x8xbf16> to vector<36x8xbf16>
    %cst_162 = arith.constant dense<0.000000e+00> : vector<8x8xf32>
    %293 = tpu.matmul %290, %292, %cst_162 {dimension_numbers = #tpu.dot_dimension_numbers<[1], [0], [0], [1], [0, 0, 1, 1], [], []>} : vector<8x36xbf16>, vector<36x8xbf16>, vector<8x8xf32> -> vector<8x8xf32>
    %294 = arith.addf %288, %293 : vector<8x8xf32>
    %295 = vector.extract_strided_slice %89 {offsets = [2, 0], sizes = [8, 36], strides = [1, 1]} : vector<10x36xf32> to vector<8x36xf32>
    %296 = arith.truncf %295 : vector<8x36xf32> to vector<8x36xbf16>
    %c5_163 = arith.constant 5 : index
    %c0_164 = arith.constant 0 : index
    %c0_165 = arith.constant 0 : index
    %297 = vector.load %arg10[%c5_163, %c0_164, %c0_165] : memref<9x36x8xbf16, #tpu.memory_space<vmem>>, vector<1x36x8xbf16>
    %298 = vector.shape_cast %297 : vector<1x36x8xbf16> to vector<36x8xbf16>
    %cst_166 = arith.constant dense<0.000000e+00> : vector<8x8xf32>
    %299 = tpu.matmul %296, %298, %cst_166 {dimension_numbers = #tpu.dot_dimension_numbers<[1], [0], [0], [1], [0, 0, 1, 1], [], []>} : vector<8x36xbf16>, vector<36x8xbf16>, vector<8x8xf32> -> vector<8x8xf32>
    %300 = arith.addf %294, %299 : vector<8x8xf32>
    %301 = vector.extract_strided_slice %108 {offsets = [0, 0], sizes = [8, 36], strides = [1, 1]} : vector<10x36xf32> to vector<8x36xf32>
    %302 = arith.truncf %301 : vector<8x36xf32> to vector<8x36xbf16>
    %c6_167 = arith.constant 6 : index
    %c0_168 = arith.constant 0 : index
    %c0_169 = arith.constant 0 : index
    %303 = vector.load %arg10[%c6_167, %c0_168, %c0_169] : memref<9x36x8xbf16, #tpu.memory_space<vmem>>, vector<1x36x8xbf16>
    %304 = vector.shape_cast %303 : vector<1x36x8xbf16> to vector<36x8xbf16>
    %cst_170 = arith.constant dense<0.000000e+00> : vector<8x8xf32>
    %305 = tpu.matmul %302, %304, %cst_170 {dimension_numbers = #tpu.dot_dimension_numbers<[1], [0], [0], [1], [0, 0, 1, 1], [], []>} : vector<8x36xbf16>, vector<36x8xbf16>, vector<8x8xf32> -> vector<8x8xf32>
    %306 = arith.addf %300, %305 : vector<8x8xf32>
    %307 = vector.extract_strided_slice %108 {offsets = [1, 0], sizes = [8, 36], strides = [1, 1]} : vector<10x36xf32> to vector<8x36xf32>
    %308 = arith.truncf %307 : vector<8x36xf32> to vector<8x36xbf16>
    %c7_171 = arith.constant 7 : index
    %c0_172 = arith.constant 0 : index
    %c0_173 = arith.constant 0 : index
    %309 = vector.load %arg10[%c7_171, %c0_172, %c0_173] : memref<9x36x8xbf16, #tpu.memory_space<vmem>>, vector<1x36x8xbf16>
    %310 = vector.shape_cast %309 : vector<1x36x8xbf16> to vector<36x8xbf16>
    %cst_174 = arith.constant dense<0.000000e+00> : vector<8x8xf32>
    %311 = tpu.matmul %308, %310, %cst_174 {dimension_numbers = #tpu.dot_dimension_numbers<[1], [0], [0], [1], [0, 0, 1, 1], [], []>} : vector<8x36xbf16>, vector<36x8xbf16>, vector<8x8xf32> -> vector<8x8xf32>
    %312 = arith.addf %306, %311 : vector<8x8xf32>
    %313 = vector.extract_strided_slice %108 {offsets = [2, 0], sizes = [8, 36], strides = [1, 1]} : vector<10x36xf32> to vector<8x36xf32>
    %314 = arith.truncf %313 : vector<8x36xf32> to vector<8x36xbf16>
    %c8_175 = arith.constant 8 : index
    %c0_176 = arith.constant 0 : index
    %c0_177 = arith.constant 0 : index
    %315 = vector.load %arg10[%c8_175, %c0_176, %c0_177] : memref<9x36x8xbf16, #tpu.memory_space<vmem>>, vector<1x36x8xbf16>
    %316 = vector.shape_cast %315 : vector<1x36x8xbf16> to vector<36x8xbf16>
    %cst_178 = arith.constant dense<0.000000e+00> : vector<8x8xf32>
    %317 = tpu.matmul %314, %316, %cst_178 {dimension_numbers = #tpu.dot_dimension_numbers<[1], [0], [0], [1], [0, 0, 1, 1], [], []>} : vector<8x36xbf16>, vector<36x8xbf16>, vector<8x8xf32> -> vector<8x8xf32>
    %318 = arith.addf %312, %317 : vector<8x8xf32>
    %319 = vector.broadcast %7 : vector<1x8xf32> to vector<8x8xf32>
    %320 = arith.addf %318, %319 : vector<8x8xf32>
    %c0_179 = arith.constant 0 : index
    %c2_180 = arith.constant 2 : index
    %c0_181 = arith.constant 0 : index
    %c0_182 = arith.constant 0 : index
    %321 = vector.load %arg12[%c0_179, %c2_180, %c0_181, %c0_182] : memref<1x4x8x8xf32, #tpu.memory_space<vmem>>, vector<1x1x8x8xf32>
    %322 = vector.shape_cast %321 : vector<1x1x8x8xf32> to vector<8x8xf32>
    %323 = vector.shape_cast %320 : vector<8x8xf32> to vector<1x1x8x8xf32>
    tpu.vector_store %arg12[%c0_179, %c2_180, %c0_181, %c0_182], %323 {strides = array<i32>} : memref<1x4x8x8xf32, #tpu.memory_space<vmem>>, vector<1x1x8x8xf32>,
    %cst_183 = arith.constant dense<0.000000e+00> : vector<8xf32>
    %324 = vector.multi_reduction <add>, %320, %cst_183 [0] : vector<8x8xf32> to vector<8xf32>
    %325 = vector.shape_cast %324 : vector<8xf32> to vector<1x8xf32>
    %326 = arith.addf %259, %325 : vector<1x8xf32>
    %327 = arith.mulf %320, %320 : vector<8x8xf32>
    %cst_184 = arith.constant dense<0.000000e+00> : vector<8xf32>
    %328 = vector.multi_reduction <add>, %327, %cst_184 [0] : vector<8x8xf32> to vector<8xf32>
    %329 = vector.shape_cast %328 : vector<8xf32> to vector<1x8xf32>
    %330 = arith.addf %263, %329 : vector<1x8xf32>
    %cst_185 = arith.constant 0.000000e+00 : f32
    %331 = vector.broadcast %cst_185 : f32 to vector<8x8xf32>
    %332 = vector.extract_strided_slice %89 {offsets = [0, 0], sizes = [8, 36], strides = [1, 1]} : vector<10x36xf32> to vector<8x36xf32>
    %333 = arith.truncf %332 : vector<8x36xf32> to vector<8x36xbf16>
    %c0_186 = arith.constant 0 : index
    %c0_187 = arith.constant 0 : index
    %c0_188 = arith.constant 0 : index
    %334 = vector.load %arg10[%c0_186, %c0_187, %c0_188] : memref<9x36x8xbf16, #tpu.memory_space<vmem>>, vector<1x36x8xbf16>
    %335 = vector.shape_cast %334 : vector<1x36x8xbf16> to vector<36x8xbf16>
    %cst_189 = arith.constant dense<0.000000e+00> : vector<8x8xf32>
    %336 = tpu.matmul %333, %335, %cst_189 {dimension_numbers = #tpu.dot_dimension_numbers<[1], [0], [0], [1], [0, 0, 1, 1], [], []>} : vector<8x36xbf16>, vector<36x8xbf16>, vector<8x8xf32> -> vector<8x8xf32>
    %337 = arith.addf %331, %336 : vector<8x8xf32>
    %338 = vector.extract_strided_slice %89 {offsets = [1, 0], sizes = [8, 36], strides = [1, 1]} : vector<10x36xf32> to vector<8x36xf32>
    %339 = arith.truncf %338 : vector<8x36xf32> to vector<8x36xbf16>
    %c1_190 = arith.constant 1 : index
    %c0_191 = arith.constant 0 : index
    %c0_192 = arith.constant 0 : index
    %340 = vector.load %arg10[%c1_190, %c0_191, %c0_192] : memref<9x36x8xbf16, #tpu.memory_space<vmem>>, vector<1x36x8xbf16>
    %341 = vector.shape_cast %340 : vector<1x36x8xbf16> to vector<36x8xbf16>
    %cst_193 = arith.constant dense<0.000000e+00> : vector<8x8xf32>
    %342 = tpu.matmul %339, %341, %cst_193 {dimension_numbers = #tpu.dot_dimension_numbers<[1], [0], [0], [1], [0, 0, 1, 1], [], []>} : vector<8x36xbf16>, vector<36x8xbf16>, vector<8x8xf32> -> vector<8x8xf32>
    %343 = arith.addf %337, %342 : vector<8x8xf32>
    %344 = vector.extract_strided_slice %89 {offsets = [2, 0], sizes = [8, 36], strides = [1, 1]} : vector<10x36xf32> to vector<8x36xf32>
    %345 = arith.truncf %344 : vector<8x36xf32> to vector<8x36xbf16>
    %c2_194 = arith.constant 2 : index
    %c0_195 = arith.constant 0 : index
    %c0_196 = arith.constant 0 : index
    %346 = vector.load %arg10[%c2_194, %c0_195, %c0_196] : memref<9x36x8xbf16, #tpu.memory_space<vmem>>, vector<1x36x8xbf16>
    %347 = vector.shape_cast %346 : vector<1x36x8xbf16> to vector<36x8xbf16>
    %cst_197 = arith.constant dense<0.000000e+00> : vector<8x8xf32>
    %348 = tpu.matmul %345, %347, %cst_197 {dimension_numbers = #tpu.dot_dimension_numbers<[1], [0], [0], [1], [0, 0, 1, 1], [], []>} : vector<8x36xbf16>, vector<36x8xbf16>, vector<8x8xf32> -> vector<8x8xf32>
    %349 = arith.addf %343, %348 : vector<8x8xf32>
    %350 = vector.extract_strided_slice %108 {offsets = [0, 0], sizes = [8, 36], strides = [1, 1]} : vector<10x36xf32> to vector<8x36xf32>
    %351 = arith.truncf %350 : vector<8x36xf32> to vector<8x36xbf16>
    %c3_198 = arith.constant 3 : index
    %c0_199 = arith.constant 0 : index
    %c0_200 = arith.constant 0 : index
    %352 = vector.load %arg10[%c3_198, %c0_199, %c0_200] : memref<9x36x8xbf16, #tpu.memory_space<vmem>>, vector<1x36x8xbf16>
    %353 = vector.shape_cast %352 : vector<1x36x8xbf16> to vector<36x8xbf16>
    %cst_201 = arith.constant dense<0.000000e+00> : vector<8x8xf32>
    %354 = tpu.matmul %351, %353, %cst_201 {dimension_numbers = #tpu.dot_dimension_numbers<[1], [0], [0], [1], [0, 0, 1, 1], [], []>} : vector<8x36xbf16>, vector<36x8xbf16>, vector<8x8xf32> -> vector<8x8xf32>
    %355 = arith.addf %349, %354 : vector<8x8xf32>
    %356 = vector.extract_strided_slice %108 {offsets = [1, 0], sizes = [8, 36], strides = [1, 1]} : vector<10x36xf32> to vector<8x36xf32>
    %357 = arith.truncf %356 : vector<8x36xf32> to vector<8x36xbf16>
    %c4_202 = arith.constant 4 : index
    %c0_203 = arith.constant 0 : index
    %c0_204 = arith.constant 0 : index
    %358 = vector.load %arg10[%c4_202, %c0_203, %c0_204] : memref<9x36x8xbf16, #tpu.memory_space<vmem>>, vector<1x36x8xbf16>
    %359 = vector.shape_cast %358 : vector<1x36x8xbf16> to vector<36x8xbf16>
    %cst_205 = arith.constant dense<0.000000e+00> : vector<8x8xf32>
    %360 = tpu.matmul %357, %359, %cst_205 {dimension_numbers = #tpu.dot_dimension_numbers<[1], [0], [0], [1], [0, 0, 1, 1], [], []>} : vector<8x36xbf16>, vector<36x8xbf16>, vector<8x8xf32> -> vector<8x8xf32>
    %361 = arith.addf %355, %360 : vector<8x8xf32>
    %362 = vector.extract_strided_slice %108 {offsets = [2, 0], sizes = [8, 36], strides = [1, 1]} : vector<10x36xf32> to vector<8x36xf32>
    %363 = arith.truncf %362 : vector<8x36xf32> to vector<8x36xbf16>
    %c5_206 = arith.constant 5 : index
    %c0_207 = arith.constant 0 : index
    %c0_208 = arith.constant 0 : index
    %364 = vector.load %arg10[%c5_206, %c0_207, %c0_208] : memref<9x36x8xbf16, #tpu.memory_space<vmem>>, vector<1x36x8xbf16>
    %365 = vector.shape_cast %364 : vector<1x36x8xbf16> to vector<36x8xbf16>
    %cst_209 = arith.constant dense<0.000000e+00> : vector<8x8xf32>
    %366 = tpu.matmul %363, %365, %cst_209 {dimension_numbers = #tpu.dot_dimension_numbers<[1], [0], [0], [1], [0, 0, 1, 1], [], []>} : vector<8x36xbf16>, vector<36x8xbf16>, vector<8x8xf32> -> vector<8x8xf32>
    %367 = arith.addf %361, %366 : vector<8x8xf32>
    %368 = vector.extract_strided_slice %127 {offsets = [0, 0], sizes = [8, 36], strides = [1, 1]} : vector<10x36xf32> to vector<8x36xf32>
    %369 = arith.truncf %368 : vector<8x36xf32> to vector<8x36xbf16>
    %c6_210 = arith.constant 6 : index
    %c0_211 = arith.constant 0 : index
    %c0_212 = arith.constant 0 : index
    %370 = vector.load %arg10[%c6_210, %c0_211, %c0_212] : memref<9x36x8xbf16, #tpu.memory_space<vmem>>, vector<1x36x8xbf16>
    %371 = vector.shape_cast %370 : vector<1x36x8xbf16> to vector<36x8xbf16>
    %cst_213 = arith.constant dense<0.000000e+00> : vector<8x8xf32>
    %372 = tpu.matmul %369, %371, %cst_213 {dimension_numbers = #tpu.dot_dimension_numbers<[1], [0], [0], [1], [0, 0, 1, 1], [], []>} : vector<8x36xbf16>, vector<36x8xbf16>, vector<8x8xf32> -> vector<8x8xf32>
    %373 = arith.addf %367, %372 : vector<8x8xf32>
    %374 = vector.extract_strided_slice %127 {offsets = [1, 0], sizes = [8, 36], strides = [1, 1]} : vector<10x36xf32> to vector<8x36xf32>
    %375 = arith.truncf %374 : vector<8x36xf32> to vector<8x36xbf16>
    %c7_214 = arith.constant 7 : index
    %c0_215 = arith.constant 0 : index
    %c0_216 = arith.constant 0 : index
    %376 = vector.load %arg10[%c7_214, %c0_215, %c0_216] : memref<9x36x8xbf16, #tpu.memory_space<vmem>>, vector<1x36x8xbf16>
    %377 = vector.shape_cast %376 : vector<1x36x8xbf16> to vector<36x8xbf16>
    %cst_217 = arith.constant dense<0.000000e+00> : vector<8x8xf32>
    %378 = tpu.matmul %375, %377, %cst_217 {dimension_numbers = #tpu.dot_dimension_numbers<[1], [0], [0], [1], [0, 0, 1, 1], [], []>} : vector<8x36xbf16>, vector<36x8xbf16>, vector<8x8xf32> -> vector<8x8xf32>
    %379 = arith.addf %373, %378 : vector<8x8xf32>
    %380 = vector.extract_strided_slice %127 {offsets = [2, 0], sizes = [8, 36], strides = [1, 1]} : vector<10x36xf32> to vector<8x36xf32>
    %381 = arith.truncf %380 : vector<8x36xf32> to vector<8x36xbf16>
    %c8_218 = arith.constant 8 : index
    %c0_219 = arith.constant 0 : index
    %c0_220 = arith.constant 0 : index
    %382 = vector.load %arg10[%c8_218, %c0_219, %c0_220] : memref<9x36x8xbf16, #tpu.memory_space<vmem>>, vector<1x36x8xbf16>
    %383 = vector.shape_cast %382 : vector<1x36x8xbf16> to vector<36x8xbf16>
    %cst_221 = arith.constant dense<0.000000e+00> : vector<8x8xf32>
    %384 = tpu.matmul %381, %383, %cst_221 {dimension_numbers = #tpu.dot_dimension_numbers<[1], [0], [0], [1], [0, 0, 1, 1], [], []>} : vector<8x36xbf16>, vector<36x8xbf16>, vector<8x8xf32> -> vector<8x8xf32>
    %385 = arith.addf %379, %384 : vector<8x8xf32>
    %386 = vector.broadcast %7 : vector<1x8xf32> to vector<8x8xf32>
    %387 = arith.addf %385, %386 : vector<8x8xf32>
    %c0_222 = arith.constant 0 : index
    %c3_223 = arith.constant 3 : index
    %c0_224 = arith.constant 0 : index
    %c0_225 = arith.constant 0 : index
    %388 = vector.load %arg12[%c0_222, %c3_223, %c0_224, %c0_225] : memref<1x4x8x8xf32, #tpu.memory_space<vmem>>, vector<1x1x8x8xf32>
    %389 = vector.shape_cast %388 : vector<1x1x8x8xf32> to vector<8x8xf32>
    %390 = vector.shape_cast %387 : vector<8x8xf32> to vector<1x1x8x8xf32>
    tpu.vector_store %arg12[%c0_222, %c3_223, %c0_224, %c0_225], %390 {strides = array<i32>} : memref<1x4x8x8xf32, #tpu.memory_space<vmem>>, vector<1x1x8x8xf32>,
    %cst_226 = arith.constant dense<0.000000e+00> : vector<8xf32>
    %391 = vector.multi_reduction <add>, %387, %cst_226 [0] : vector<8x8xf32> to vector<8xf32>
    %392 = vector.shape_cast %391 : vector<8xf32> to vector<1x8xf32>
    %393 = arith.addf %326, %392 : vector<1x8xf32>
    %394 = arith.mulf %387, %387 : vector<8x8xf32>
    %cst_227 = arith.constant dense<0.000000e+00> : vector<8xf32>
    %395 = vector.multi_reduction <add>, %394, %cst_227 [0] : vector<8x8xf32> to vector<8xf32>
    %396 = vector.shape_cast %395 : vector<8xf32> to vector<1x8xf32>
    %397 = arith.addf %330, %396 : vector<1x8xf32>
    %c0_228 = arith.constant 0 : index
    %c0_229 = arith.constant 0 : index
    %398 = vector.load %arg13[%c0_228, %c0_229] : memref<1x8xf32, #tpu.memory_space<vmem>>, vector<1x8xf32>
    %399 = arith.addf %398, %393 : vector<1x8xf32>
    %c0_230 = arith.constant 0 : index
    %c0_231 = arith.constant 0 : index
    %400 = vector.load %arg13[%c0_230, %c0_231] : memref<1x8xf32, #tpu.memory_space<vmem>>, vector<1x8xf32>
    tpu.vector_store %arg13[%c0_230, %c0_231], %399 {strides = array<i32>} : memref<1x8xf32, #tpu.memory_space<vmem>>, vector<1x8xf32>,
    %c0_232 = arith.constant 0 : index
    %c0_233 = arith.constant 0 : index
    %401 = vector.load %arg14[%c0_232, %c0_233] : memref<1x8xf32, #tpu.memory_space<vmem>>, vector<1x8xf32>
    %402 = arith.addf %401, %397 : vector<1x8xf32>
    %c0_234 = arith.constant 0 : index
    %c0_235 = arith.constant 0 : index
    %403 = vector.load %arg14[%c0_234, %c0_235] : memref<1x8xf32, #tpu.memory_space<vmem>>, vector<1x8xf32>
    tpu.vector_store %arg14[%c0_234, %c0_235], %402 {strides = array<i32>} : memref<1x8xf32, #tpu.memory_space<vmem>>, vector<1x8xf32>,
    return
  }
  func.func @transform_0(%arg0: i32, %arg1: i32) -> (i32, i32, i32, i32) {
    %c4_i32 = arith.constant 4 : i32
    %0 = arith.muli %arg1, %c4_i32 : i32
    %c0_i32 = arith.constant 0 : i32
    %1 = arith.addi %0, %c0_i32 : i32
    %c0_i32_0 = arith.constant 0 : i32
    %c0_i32_1 = arith.constant 0 : i32
    %c0_i32_2 = arith.constant 0 : i32
    return %arg0, %1, %c0_i32_0, %c0_i32_1 : i32, i32, i32, i32
  }
  func.func @transform_1(%arg0: i32, %arg1: i32) -> (i32, i32, i32, i32) {
    %c4_i32 = arith.constant 4 : i32
    %0 = arith.muli %arg1, %c4_i32 : i32
    %c1_i32 = arith.constant 1 : i32
    %1 = arith.addi %0, %c1_i32 : i32
    %c0_i32 = arith.constant 0 : i32
    %c0_i32_0 = arith.constant 0 : i32
    %c0_i32_1 = arith.constant 0 : i32
    return %arg0, %1, %c0_i32, %c0_i32_0 : i32, i32, i32, i32
  }
  func.func @transform_2(%arg0: i32, %arg1: i32) -> (i32, i32, i32, i32) {
    %c4_i32 = arith.constant 4 : i32
    %0 = arith.muli %arg1, %c4_i32 : i32
    %c2_i32 = arith.constant 2 : i32
    %1 = arith.addi %0, %c2_i32 : i32
    %c0_i32 = arith.constant 0 : i32
    %c0_i32_0 = arith.constant 0 : i32
    %c0_i32_1 = arith.constant 0 : i32
    return %arg0, %1, %c0_i32, %c0_i32_0 : i32, i32, i32, i32
  }
  func.func @transform_3(%arg0: i32, %arg1: i32) -> (i32, i32, i32, i32) {
    %c4_i32 = arith.constant 4 : i32
    %0 = arith.muli %arg1, %c4_i32 : i32
    %c3_i32 = arith.constant 3 : i32
    %1 = arith.addi %0, %c3_i32 : i32
    %c0_i32 = arith.constant 0 : i32
    %c0_i32_0 = arith.constant 0 : i32
    %c0_i32_1 = arith.constant 0 : i32
    return %arg0, %1, %c0_i32, %c0_i32_0 : i32, i32, i32, i32
  }
  func.func @transform_4(%arg0: i32, %arg1: i32) -> (i32, i32, i32, i32) {
    %c4_i32 = arith.constant 4 : i32
    %0 = arith.muli %arg1, %c4_i32 : i32
    %c4_i32_0 = arith.constant 4 : i32
    %1 = arith.addi %0, %c4_i32_0 : i32
    %c0_i32 = arith.constant 0 : i32
    %c0_i32_1 = arith.constant 0 : i32
    %c0_i32_2 = arith.constant 0 : i32
    return %arg0, %1, %c0_i32, %c0_i32_1 : i32, i32, i32, i32
  }
  func.func @transform_5(%arg0: i32, %arg1: i32) -> (i32, i32, i32, i32) {
    %c4_i32 = arith.constant 4 : i32
    %0 = arith.muli %arg1, %c4_i32 : i32
    %c5_i32 = arith.constant 5 : i32
    %1 = arith.addi %0, %c5_i32 : i32
    %c0_i32 = arith.constant 0 : i32
    %c0_i32_0 = arith.constant 0 : i32
    %c0_i32_1 = arith.constant 0 : i32
    return %arg0, %1, %c0_i32, %c0_i32_0 : i32, i32, i32, i32
  }
  func.func @transform_6(%arg0: i32, %arg1: i32) -> (i32, i32) {
    %c0_i32 = arith.constant 0 : i32
    %c0_i32_0 = arith.constant 0 : i32
    %c0_i32_1 = arith.constant 0 : i32
    return %c0_i32, %c0_i32_0 : i32, i32
  }
  func.func @transform_7(%arg0: i32, %arg1: i32) -> (i32, i32) {
    %c0_i32 = arith.constant 0 : i32
    %c0_i32_0 = arith.constant 0 : i32
    %c0_i32_1 = arith.constant 0 : i32
    return %c0_i32, %c0_i32_0 : i32, i32
  }
  func.func @transform_8(%arg0: i32, %arg1: i32) -> (i32, i32, i32) {
    %c0_i32 = arith.constant 0 : i32
    %c0_i32_0 = arith.constant 0 : i32
    %c0_i32_1 = arith.constant 0 : i32
    %c0_i32_2 = arith.constant 0 : i32
    return %c0_i32, %c0_i32_0, %c0_i32_1 : i32, i32, i32
  }
  func.func @transform_9(%arg0: i32, %arg1: i32) -> (i32, i32) {
    %c0_i32 = arith.constant 0 : i32
    %c0_i32_0 = arith.constant 0 : i32
    %c0_i32_1 = arith.constant 0 : i32
    return %c0_i32, %c0_i32_0 : i32, i32
  }
  func.func @transform_10(%arg0: i32, %arg1: i32) -> (i32, i32, i32, i32) {
    %c0_i32 = arith.constant 0 : i32
    %c0_i32_0 = arith.constant 0 : i32
    %c0_i32_1 = arith.constant 0 : i32
    return %arg0, %arg1, %c0_i32, %c0_i32_0 : i32, i32, i32, i32
  }
  func.func @transform_11(%arg0: i32, %arg1: i32) -> (i32, i32) {
    %c0_i32 = arith.constant 0 : i32
    %c0_i32_0 = arith.constant 0 : i32
    %c0_i32_1 = arith.constant 0 : i32
    return %c0_i32, %c0_i32_0 : i32, i32
  }
  func.func @transform_12(%arg0: i32, %arg1: i32) -> (i32, i32) {
    %c0_i32 = arith.constant 0 : i32
    %c0_i32_0 = arith.constant 0 : i32
    %c0_i32_1 = arith.constant 0 : i32
    return %c0_i32, %c0_i32_0 : i32, i32
  }
}

module attributes {stable_mosaic.version = 11 : i64} {
  func.func @_conv3x3_kernel(%arg0: i32, %arg1: i32, %arg2: memref<1x1x10x8xf32, #tpu.memory_space<vmem>>, %arg3: memref<1x1x10x8xf32, #tpu.memory_space<vmem>>, %arg4: memref<1x1x10x8xf32, #tpu.memory_space<vmem>>, %arg5: memref<1x1x10x8xf32, #tpu.memory_space<vmem>>, %arg6: memref<1x1x10x8xf32, #tpu.memory_space<vmem>>, %arg7: memref<1x1x10x8xf32, #tpu.memory_space<vmem>>, %arg8: memref<1x8xf32, #tpu.memory_space<vmem>>, %arg9: memref<1x8xf32, #tpu.memory_space<vmem>>, %arg10: memref<9x8x8xbf16, #tpu.memory_space<vmem>>, %arg11: memref<1x8xf32, #tpu.memory_space<vmem>>, %arg12: memref<8x64xbf16, #tpu.memory_space<vmem>>, %arg13: memref<1x64xf32, #tpu.memory_space<vmem>>, %arg14: memref<1x4x8x8xf32, #tpu.memory_space<vmem>>, %arg15: memref<1x4x8x64xf32, #tpu.memory_space<vmem>>) attributes {dimension_semantics = [#tpu.dimension_semantics<parallel>, #tpu.dimension_semantics<parallel>], iteration_bounds = array<i64: 2, 2>, scalar_prefetch = 0 : i64, scratch_operands = 0 : i64, tpu.core_type = #tpu.core_type<tc>, window_params = [{transform_indices = @transform_0, window_bounds = array<i64: 1, 1, 10, 8>}, {transform_indices = @transform_1, window_bounds = array<i64: 1, 1, 10, 8>}, {transform_indices = @transform_2, window_bounds = array<i64: 1, 1, 10, 8>}, {transform_indices = @transform_3, window_bounds = array<i64: 1, 1, 10, 8>}, {transform_indices = @transform_4, window_bounds = array<i64: 1, 1, 10, 8>}, {transform_indices = @transform_5, window_bounds = array<i64: 1, 1, 10, 8>}, {pipeline_mode = #tpu.pipeline_mode<synchronous>, transform_indices = @transform_6, window_bounds = array<i64: 1, 8>}, {pipeline_mode = #tpu.pipeline_mode<synchronous>, transform_indices = @transform_7, window_bounds = array<i64: 1, 8>}, {pipeline_mode = #tpu.pipeline_mode<synchronous>, transform_indices = @transform_8, window_bounds = array<i64: 9, 8, 8>}, {pipeline_mode = #tpu.pipeline_mode<synchronous>, transform_indices = @transform_9, window_bounds = array<i64: 1, 8>}, {pipeline_mode = #tpu.pipeline_mode<synchronous>, transform_indices = @transform_10, window_bounds = array<i64: 8, 64>}, {pipeline_mode = #tpu.pipeline_mode<synchronous>, transform_indices = @transform_11, window_bounds = array<i64: 1, 64>}, {transform_indices = @transform_12, window_bounds = array<i64: 1, 4, 8, 8>}, {transform_indices = @transform_13, window_bounds = array<i64: 1, 4, 8, 64>}]} {
    %c0 = arith.constant 0 : index
    %c0_0 = arith.constant 0 : index
    %0 = vector.load %arg8[%c0, %c0_0] : memref<1x8xf32, #tpu.memory_space<vmem>>, vector<1x8xf32>
    %c0_1 = arith.constant 0 : index
    %c0_2 = arith.constant 0 : index
    %1 = vector.load %arg9[%c0_1, %c0_2] : memref<1x8xf32, #tpu.memory_space<vmem>>, vector<1x8xf32>
    %c0_3 = arith.constant 0 : index
    %c0_4 = arith.constant 0 : index
    %2 = vector.load %arg11[%c0_3, %c0_4] : memref<1x8xf32, #tpu.memory_space<vmem>>, vector<1x8xf32>
    %c0_5 = arith.constant 0 : index
    %c0_6 = arith.constant 0 : index
    %3 = vector.load %arg12[%c0_5, %c0_6] : memref<8x64xbf16, #tpu.memory_space<vmem>>, vector<8x64xbf16>
    %c0_7 = arith.constant 0 : index
    %c0_8 = arith.constant 0 : index
    %4 = vector.load %arg13[%c0_7, %c0_8] : memref<1x64xf32, #tpu.memory_space<vmem>>, vector<1x64xf32>
    %5 = tpu.iota {dimensions = array<i32: 0>} : vector<10x1xi32>
    %c1_i32 = arith.constant 1 : i32
    %6 = vector.broadcast %c1_i32 : i32 to vector<10x1xi32>
    %7 = arith.cmpi sge, %5, %6 : vector<10x1xi32>
    %c8_i32 = arith.constant 8 : i32
    %8 = vector.broadcast %c8_i32 : i32 to vector<10x1xi32>
    %9 = arith.cmpi sle, %5, %8 : vector<10x1xi32>
    %10 = arith.andi %7, %9 : vector<10x1xi1>
    %c0_9 = arith.constant 0 : index
    %c0_10 = arith.constant 0 : index
    %c0_11 = arith.constant 0 : index
    %c0_12 = arith.constant 0 : index
    %11 = vector.load %arg2[%c0_9, %c0_10, %c0_11, %c0_12] : memref<1x1x10x8xf32, #tpu.memory_space<vmem>>, vector<1x1x10x8xf32>
    %12 = vector.shape_cast %11 : vector<1x1x10x8xf32> to vector<10x8xf32>
    %13 = vector.broadcast %0 : vector<1x8xf32> to vector<10x8xf32>
    %14 = arith.mulf %12, %13 : vector<10x8xf32>
    %15 = vector.broadcast %1 : vector<1x8xf32> to vector<10x8xf32>
    %16 = arith.addf %14, %15 : vector<10x8xf32>
    %cst = arith.constant 0.000000e+00 : f32
    %17 = vector.broadcast %cst : f32 to vector<10x8xf32>
    %18 = arith.maximumf %16, %17 : vector<10x8xf32>
    %c4_i32 = arith.constant 4 : i32
    %19 = arith.muli %arg1, %c4_i32 : i32
    %c0_i32 = arith.constant 0 : i32
    %20 = arith.addi %19, %c0_i32 : i32
    %c1_i32_13 = arith.constant 1 : i32
    %21 = arith.cmpi sge, %20, %c1_i32_13 : i32
    %c8_i32_14 = arith.constant 8 : i32
    %22 = arith.cmpi sle, %20, %c8_i32_14 : i32
    %23 = arith.andi %21, %22 : i1
    %24 = vector.broadcast %23 : i1 to vector<10x1xi1>
    %25 = arith.andi %10, %24 : vector<10x1xi1>
    %cst_15 = arith.constant 0.000000e+00 : f32
    %26 = vector.shape_cast %25 : vector<10x1xi1> to vector<10x1xi1>
    %27 = vector.broadcast %26 : vector<10x1xi1> to vector<10x8xi1>
    %28 = vector.broadcast %cst_15 : f32 to vector<10x8xf32>
    %29 = arith.select %27, %18, %28 : vector<10x8xi1>, vector<10x8xf32>
    %c0_16 = arith.constant 0 : index
    %c0_17 = arith.constant 0 : index
    %c0_18 = arith.constant 0 : index
    %c0_19 = arith.constant 0 : index
    %30 = vector.load %arg3[%c0_16, %c0_17, %c0_18, %c0_19] : memref<1x1x10x8xf32, #tpu.memory_space<vmem>>, vector<1x1x10x8xf32>
    %31 = vector.shape_cast %30 : vector<1x1x10x8xf32> to vector<10x8xf32>
    %32 = vector.broadcast %0 : vector<1x8xf32> to vector<10x8xf32>
    %33 = arith.mulf %31, %32 : vector<10x8xf32>
    %34 = vector.broadcast %1 : vector<1x8xf32> to vector<10x8xf32>
    %35 = arith.addf %33, %34 : vector<10x8xf32>
    %cst_20 = arith.constant 0.000000e+00 : f32
    %36 = vector.broadcast %cst_20 : f32 to vector<10x8xf32>
    %37 = arith.maximumf %35, %36 : vector<10x8xf32>
    %c4_i32_21 = arith.constant 4 : i32
    %38 = arith.muli %arg1, %c4_i32_21 : i32
    %c1_i32_22 = arith.constant 1 : i32
    %39 = arith.addi %38, %c1_i32_22 : i32
    %c1_i32_23 = arith.constant 1 : i32
    %40 = arith.cmpi sge, %39, %c1_i32_23 : i32
    %c8_i32_24 = arith.constant 8 : i32
    %41 = arith.cmpi sle, %39, %c8_i32_24 : i32
    %42 = arith.andi %40, %41 : i1
    %43 = vector.broadcast %42 : i1 to vector<10x1xi1>
    %44 = arith.andi %10, %43 : vector<10x1xi1>
    %cst_25 = arith.constant 0.000000e+00 : f32
    %45 = vector.shape_cast %44 : vector<10x1xi1> to vector<10x1xi1>
    %46 = vector.broadcast %45 : vector<10x1xi1> to vector<10x8xi1>
    %47 = vector.broadcast %cst_25 : f32 to vector<10x8xf32>
    %48 = arith.select %46, %37, %47 : vector<10x8xi1>, vector<10x8xf32>
    %c0_26 = arith.constant 0 : index
    %c0_27 = arith.constant 0 : index
    %c0_28 = arith.constant 0 : index
    %c0_29 = arith.constant 0 : index
    %49 = vector.load %arg4[%c0_26, %c0_27, %c0_28, %c0_29] : memref<1x1x10x8xf32, #tpu.memory_space<vmem>>, vector<1x1x10x8xf32>
    %50 = vector.shape_cast %49 : vector<1x1x10x8xf32> to vector<10x8xf32>
    %51 = vector.broadcast %0 : vector<1x8xf32> to vector<10x8xf32>
    %52 = arith.mulf %50, %51 : vector<10x8xf32>
    %53 = vector.broadcast %1 : vector<1x8xf32> to vector<10x8xf32>
    %54 = arith.addf %52, %53 : vector<10x8xf32>
    %cst_30 = arith.constant 0.000000e+00 : f32
    %55 = vector.broadcast %cst_30 : f32 to vector<10x8xf32>
    %56 = arith.maximumf %54, %55 : vector<10x8xf32>
    %c4_i32_31 = arith.constant 4 : i32
    %57 = arith.muli %arg1, %c4_i32_31 : i32
    %c2_i32 = arith.constant 2 : i32
    %58 = arith.addi %57, %c2_i32 : i32
    %c1_i32_32 = arith.constant 1 : i32
    %59 = arith.cmpi sge, %58, %c1_i32_32 : i32
    %c8_i32_33 = arith.constant 8 : i32
    %60 = arith.cmpi sle, %58, %c8_i32_33 : i32
    %61 = arith.andi %59, %60 : i1
    %62 = vector.broadcast %61 : i1 to vector<10x1xi1>
    %63 = arith.andi %10, %62 : vector<10x1xi1>
    %cst_34 = arith.constant 0.000000e+00 : f32
    %64 = vector.shape_cast %63 : vector<10x1xi1> to vector<10x1xi1>
    %65 = vector.broadcast %64 : vector<10x1xi1> to vector<10x8xi1>
    %66 = vector.broadcast %cst_34 : f32 to vector<10x8xf32>
    %67 = arith.select %65, %56, %66 : vector<10x8xi1>, vector<10x8xf32>
    %c0_35 = arith.constant 0 : index
    %c0_36 = arith.constant 0 : index
    %c0_37 = arith.constant 0 : index
    %c0_38 = arith.constant 0 : index
    %68 = vector.load %arg5[%c0_35, %c0_36, %c0_37, %c0_38] : memref<1x1x10x8xf32, #tpu.memory_space<vmem>>, vector<1x1x10x8xf32>
    %69 = vector.shape_cast %68 : vector<1x1x10x8xf32> to vector<10x8xf32>
    %70 = vector.broadcast %0 : vector<1x8xf32> to vector<10x8xf32>
    %71 = arith.mulf %69, %70 : vector<10x8xf32>
    %72 = vector.broadcast %1 : vector<1x8xf32> to vector<10x8xf32>
    %73 = arith.addf %71, %72 : vector<10x8xf32>
    %cst_39 = arith.constant 0.000000e+00 : f32
    %74 = vector.broadcast %cst_39 : f32 to vector<10x8xf32>
    %75 = arith.maximumf %73, %74 : vector<10x8xf32>
    %c4_i32_40 = arith.constant 4 : i32
    %76 = arith.muli %arg1, %c4_i32_40 : i32
    %c3_i32 = arith.constant 3 : i32
    %77 = arith.addi %76, %c3_i32 : i32
    %c1_i32_41 = arith.constant 1 : i32
    %78 = arith.cmpi sge, %77, %c1_i32_41 : i32
    %c8_i32_42 = arith.constant 8 : i32
    %79 = arith.cmpi sle, %77, %c8_i32_42 : i32
    %80 = arith.andi %78, %79 : i1
    %81 = vector.broadcast %80 : i1 to vector<10x1xi1>
    %82 = arith.andi %10, %81 : vector<10x1xi1>
    %cst_43 = arith.constant 0.000000e+00 : f32
    %83 = vector.shape_cast %82 : vector<10x1xi1> to vector<10x1xi1>
    %84 = vector.broadcast %83 : vector<10x1xi1> to vector<10x8xi1>
    %85 = vector.broadcast %cst_43 : f32 to vector<10x8xf32>
    %86 = arith.select %84, %75, %85 : vector<10x8xi1>, vector<10x8xf32>
    %c0_44 = arith.constant 0 : index
    %c0_45 = arith.constant 0 : index
    %c0_46 = arith.constant 0 : index
    %c0_47 = arith.constant 0 : index
    %87 = vector.load %arg6[%c0_44, %c0_45, %c0_46, %c0_47] : memref<1x1x10x8xf32, #tpu.memory_space<vmem>>, vector<1x1x10x8xf32>
    %88 = vector.shape_cast %87 : vector<1x1x10x8xf32> to vector<10x8xf32>
    %89 = vector.broadcast %0 : vector<1x8xf32> to vector<10x8xf32>
    %90 = arith.mulf %88, %89 : vector<10x8xf32>
    %91 = vector.broadcast %1 : vector<1x8xf32> to vector<10x8xf32>
    %92 = arith.addf %90, %91 : vector<10x8xf32>
    %cst_48 = arith.constant 0.000000e+00 : f32
    %93 = vector.broadcast %cst_48 : f32 to vector<10x8xf32>
    %94 = arith.maximumf %92, %93 : vector<10x8xf32>
    %c4_i32_49 = arith.constant 4 : i32
    %95 = arith.muli %arg1, %c4_i32_49 : i32
    %c4_i32_50 = arith.constant 4 : i32
    %96 = arith.addi %95, %c4_i32_50 : i32
    %c1_i32_51 = arith.constant 1 : i32
    %97 = arith.cmpi sge, %96, %c1_i32_51 : i32
    %c8_i32_52 = arith.constant 8 : i32
    %98 = arith.cmpi sle, %96, %c8_i32_52 : i32
    %99 = arith.andi %97, %98 : i1
    %100 = vector.broadcast %99 : i1 to vector<10x1xi1>
    %101 = arith.andi %10, %100 : vector<10x1xi1>
    %cst_53 = arith.constant 0.000000e+00 : f32
    %102 = vector.shape_cast %101 : vector<10x1xi1> to vector<10x1xi1>
    %103 = vector.broadcast %102 : vector<10x1xi1> to vector<10x8xi1>
    %104 = vector.broadcast %cst_53 : f32 to vector<10x8xf32>
    %105 = arith.select %103, %94, %104 : vector<10x8xi1>, vector<10x8xf32>
    %c0_54 = arith.constant 0 : index
    %c0_55 = arith.constant 0 : index
    %c0_56 = arith.constant 0 : index
    %c0_57 = arith.constant 0 : index
    %106 = vector.load %arg7[%c0_54, %c0_55, %c0_56, %c0_57] : memref<1x1x10x8xf32, #tpu.memory_space<vmem>>, vector<1x1x10x8xf32>
    %107 = vector.shape_cast %106 : vector<1x1x10x8xf32> to vector<10x8xf32>
    %108 = vector.broadcast %0 : vector<1x8xf32> to vector<10x8xf32>
    %109 = arith.mulf %107, %108 : vector<10x8xf32>
    %110 = vector.broadcast %1 : vector<1x8xf32> to vector<10x8xf32>
    %111 = arith.addf %109, %110 : vector<10x8xf32>
    %cst_58 = arith.constant 0.000000e+00 : f32
    %112 = vector.broadcast %cst_58 : f32 to vector<10x8xf32>
    %113 = arith.maximumf %111, %112 : vector<10x8xf32>
    %c4_i32_59 = arith.constant 4 : i32
    %114 = arith.muli %arg1, %c4_i32_59 : i32
    %c5_i32 = arith.constant 5 : i32
    %115 = arith.addi %114, %c5_i32 : i32
    %c1_i32_60 = arith.constant 1 : i32
    %116 = arith.cmpi sge, %115, %c1_i32_60 : i32
    %c8_i32_61 = arith.constant 8 : i32
    %117 = arith.cmpi sle, %115, %c8_i32_61 : i32
    %118 = arith.andi %116, %117 : i1
    %119 = vector.broadcast %118 : i1 to vector<10x1xi1>
    %120 = arith.andi %10, %119 : vector<10x1xi1>
    %cst_62 = arith.constant 0.000000e+00 : f32
    %121 = vector.shape_cast %120 : vector<10x1xi1> to vector<10x1xi1>
    %122 = vector.broadcast %121 : vector<10x1xi1> to vector<10x8xi1>
    %123 = vector.broadcast %cst_62 : f32 to vector<10x8xf32>
    %124 = arith.select %122, %113, %123 : vector<10x8xi1>, vector<10x8xf32>
    %cst_63 = arith.constant 0.000000e+00 : f32
    %125 = vector.broadcast %cst_63 : f32 to vector<8x8xf32>
    %126 = vector.extract_strided_slice %29 {offsets = [0, 0], sizes = [8, 8], strides = [1, 1]} : vector<10x8xf32> to vector<8x8xf32>
    %127 = arith.truncf %126 : vector<8x8xf32> to vector<8x8xbf16>
    %c0_64 = arith.constant 0 : index
    %c0_65 = arith.constant 0 : index
    %c0_66 = arith.constant 0 : index
    %128 = vector.load %arg10[%c0_64, %c0_65, %c0_66] : memref<9x8x8xbf16, #tpu.memory_space<vmem>>, vector<1x8x8xbf16>
    %129 = vector.shape_cast %128 : vector<1x8x8xbf16> to vector<8x8xbf16>
    %cst_67 = arith.constant dense<0.000000e+00> : vector<8x8xf32>
    %130 = tpu.matmul %127, %129, %cst_67 {dimension_numbers = #tpu.dot_dimension_numbers<[1], [0], [0], [1], [0, 0, 1, 1], [], []>} : vector<8x8xbf16>, vector<8x8xbf16>, vector<8x8xf32> -> vector<8x8xf32>
    %131 = arith.addf %125, %130 : vector<8x8xf32>
    %132 = vector.extract_strided_slice %29 {offsets = [1, 0], sizes = [8, 8], strides = [1, 1]} : vector<10x8xf32> to vector<8x8xf32>
    %133 = arith.truncf %132 : vector<8x8xf32> to vector<8x8xbf16>
    %c1 = arith.constant 1 : index
    %c0_68 = arith.constant 0 : index
    %c0_69 = arith.constant 0 : index
    %134 = vector.load %arg10[%c1, %c0_68, %c0_69] : memref<9x8x8xbf16, #tpu.memory_space<vmem>>, vector<1x8x8xbf16>
    %135 = vector.shape_cast %134 : vector<1x8x8xbf16> to vector<8x8xbf16>
    %cst_70 = arith.constant dense<0.000000e+00> : vector<8x8xf32>
    %136 = tpu.matmul %133, %135, %cst_70 {dimension_numbers = #tpu.dot_dimension_numbers<[1], [0], [0], [1], [0, 0, 1, 1], [], []>} : vector<8x8xbf16>, vector<8x8xbf16>, vector<8x8xf32> -> vector<8x8xf32>
    %137 = arith.addf %131, %136 : vector<8x8xf32>
    %138 = vector.extract_strided_slice %29 {offsets = [2, 0], sizes = [8, 8], strides = [1, 1]} : vector<10x8xf32> to vector<8x8xf32>
    %139 = arith.truncf %138 : vector<8x8xf32> to vector<8x8xbf16>
    %c2 = arith.constant 2 : index
    %c0_71 = arith.constant 0 : index
    %c0_72 = arith.constant 0 : index
    %140 = vector.load %arg10[%c2, %c0_71, %c0_72] : memref<9x8x8xbf16, #tpu.memory_space<vmem>>, vector<1x8x8xbf16>
    %141 = vector.shape_cast %140 : vector<1x8x8xbf16> to vector<8x8xbf16>
    %cst_73 = arith.constant dense<0.000000e+00> : vector<8x8xf32>
    %142 = tpu.matmul %139, %141, %cst_73 {dimension_numbers = #tpu.dot_dimension_numbers<[1], [0], [0], [1], [0, 0, 1, 1], [], []>} : vector<8x8xbf16>, vector<8x8xbf16>, vector<8x8xf32> -> vector<8x8xf32>
    %143 = arith.addf %137, %142 : vector<8x8xf32>
    %144 = vector.extract_strided_slice %48 {offsets = [0, 0], sizes = [8, 8], strides = [1, 1]} : vector<10x8xf32> to vector<8x8xf32>
    %145 = arith.truncf %144 : vector<8x8xf32> to vector<8x8xbf16>
    %c3 = arith.constant 3 : index
    %c0_74 = arith.constant 0 : index
    %c0_75 = arith.constant 0 : index
    %146 = vector.load %arg10[%c3, %c0_74, %c0_75] : memref<9x8x8xbf16, #tpu.memory_space<vmem>>, vector<1x8x8xbf16>
    %147 = vector.shape_cast %146 : vector<1x8x8xbf16> to vector<8x8xbf16>
    %cst_76 = arith.constant dense<0.000000e+00> : vector<8x8xf32>
    %148 = tpu.matmul %145, %147, %cst_76 {dimension_numbers = #tpu.dot_dimension_numbers<[1], [0], [0], [1], [0, 0, 1, 1], [], []>} : vector<8x8xbf16>, vector<8x8xbf16>, vector<8x8xf32> -> vector<8x8xf32>
    %149 = arith.addf %143, %148 : vector<8x8xf32>
    %150 = vector.extract_strided_slice %48 {offsets = [1, 0], sizes = [8, 8], strides = [1, 1]} : vector<10x8xf32> to vector<8x8xf32>
    %151 = arith.truncf %150 : vector<8x8xf32> to vector<8x8xbf16>
    %c4 = arith.constant 4 : index
    %c0_77 = arith.constant 0 : index
    %c0_78 = arith.constant 0 : index
    %152 = vector.load %arg10[%c4, %c0_77, %c0_78] : memref<9x8x8xbf16, #tpu.memory_space<vmem>>, vector<1x8x8xbf16>
    %153 = vector.shape_cast %152 : vector<1x8x8xbf16> to vector<8x8xbf16>
    %cst_79 = arith.constant dense<0.000000e+00> : vector<8x8xf32>
    %154 = tpu.matmul %151, %153, %cst_79 {dimension_numbers = #tpu.dot_dimension_numbers<[1], [0], [0], [1], [0, 0, 1, 1], [], []>} : vector<8x8xbf16>, vector<8x8xbf16>, vector<8x8xf32> -> vector<8x8xf32>
    %155 = arith.addf %149, %154 : vector<8x8xf32>
    %156 = vector.extract_strided_slice %48 {offsets = [2, 0], sizes = [8, 8], strides = [1, 1]} : vector<10x8xf32> to vector<8x8xf32>
    %157 = arith.truncf %156 : vector<8x8xf32> to vector<8x8xbf16>
    %c5 = arith.constant 5 : index
    %c0_80 = arith.constant 0 : index
    %c0_81 = arith.constant 0 : index
    %158 = vector.load %arg10[%c5, %c0_80, %c0_81] : memref<9x8x8xbf16, #tpu.memory_space<vmem>>, vector<1x8x8xbf16>
    %159 = vector.shape_cast %158 : vector<1x8x8xbf16> to vector<8x8xbf16>
    %cst_82 = arith.constant dense<0.000000e+00> : vector<8x8xf32>
    %160 = tpu.matmul %157, %159, %cst_82 {dimension_numbers = #tpu.dot_dimension_numbers<[1], [0], [0], [1], [0, 0, 1, 1], [], []>} : vector<8x8xbf16>, vector<8x8xbf16>, vector<8x8xf32> -> vector<8x8xf32>
    %161 = arith.addf %155, %160 : vector<8x8xf32>
    %162 = vector.extract_strided_slice %67 {offsets = [0, 0], sizes = [8, 8], strides = [1, 1]} : vector<10x8xf32> to vector<8x8xf32>
    %163 = arith.truncf %162 : vector<8x8xf32> to vector<8x8xbf16>
    %c6 = arith.constant 6 : index
    %c0_83 = arith.constant 0 : index
    %c0_84 = arith.constant 0 : index
    %164 = vector.load %arg10[%c6, %c0_83, %c0_84] : memref<9x8x8xbf16, #tpu.memory_space<vmem>>, vector<1x8x8xbf16>
    %165 = vector.shape_cast %164 : vector<1x8x8xbf16> to vector<8x8xbf16>
    %cst_85 = arith.constant dense<0.000000e+00> : vector<8x8xf32>
    %166 = tpu.matmul %163, %165, %cst_85 {dimension_numbers = #tpu.dot_dimension_numbers<[1], [0], [0], [1], [0, 0, 1, 1], [], []>} : vector<8x8xbf16>, vector<8x8xbf16>, vector<8x8xf32> -> vector<8x8xf32>
    %167 = arith.addf %161, %166 : vector<8x8xf32>
    %168 = vector.extract_strided_slice %67 {offsets = [1, 0], sizes = [8, 8], strides = [1, 1]} : vector<10x8xf32> to vector<8x8xf32>
    %169 = arith.truncf %168 : vector<8x8xf32> to vector<8x8xbf16>
    %c7 = arith.constant 7 : index
    %c0_86 = arith.constant 0 : index
    %c0_87 = arith.constant 0 : index
    %170 = vector.load %arg10[%c7, %c0_86, %c0_87] : memref<9x8x8xbf16, #tpu.memory_space<vmem>>, vector<1x8x8xbf16>
    %171 = vector.shape_cast %170 : vector<1x8x8xbf16> to vector<8x8xbf16>
    %cst_88 = arith.constant dense<0.000000e+00> : vector<8x8xf32>
    %172 = tpu.matmul %169, %171, %cst_88 {dimension_numbers = #tpu.dot_dimension_numbers<[1], [0], [0], [1], [0, 0, 1, 1], [], []>} : vector<8x8xbf16>, vector<8x8xbf16>, vector<8x8xf32> -> vector<8x8xf32>
    %173 = arith.addf %167, %172 : vector<8x8xf32>
    %174 = vector.extract_strided_slice %67 {offsets = [2, 0], sizes = [8, 8], strides = [1, 1]} : vector<10x8xf32> to vector<8x8xf32>
    %175 = arith.truncf %174 : vector<8x8xf32> to vector<8x8xbf16>
    %c8 = arith.constant 8 : index
    %c0_89 = arith.constant 0 : index
    %c0_90 = arith.constant 0 : index
    %176 = vector.load %arg10[%c8, %c0_89, %c0_90] : memref<9x8x8xbf16, #tpu.memory_space<vmem>>, vector<1x8x8xbf16>
    %177 = vector.shape_cast %176 : vector<1x8x8xbf16> to vector<8x8xbf16>
    %cst_91 = arith.constant dense<0.000000e+00> : vector<8x8xf32>
    %178 = tpu.matmul %175, %177, %cst_91 {dimension_numbers = #tpu.dot_dimension_numbers<[1], [0], [0], [1], [0, 0, 1, 1], [], []>} : vector<8x8xbf16>, vector<8x8xbf16>, vector<8x8xf32> -> vector<8x8xf32>
    %179 = arith.addf %173, %178 : vector<8x8xf32>
    %180 = vector.broadcast %2 : vector<1x8xf32> to vector<8x8xf32>
    %181 = arith.addf %179, %180 : vector<8x8xf32>
    %c0_92 = arith.constant 0 : index
    %c0_93 = arith.constant 0 : index
    %c0_94 = arith.constant 0 : index
    %c0_95 = arith.constant 0 : index
    %182 = vector.load %arg14[%c0_92, %c0_93, %c0_94, %c0_95] : memref<1x4x8x8xf32, #tpu.memory_space<vmem>>, vector<1x1x8x8xf32>
    %183 = vector.shape_cast %182 : vector<1x1x8x8xf32> to vector<8x8xf32>
    %184 = vector.shape_cast %181 : vector<8x8xf32> to vector<1x1x8x8xf32>
    tpu.vector_store %arg14[%c0_92, %c0_93, %c0_94, %c0_95], %184 {strides = array<i32>} : memref<1x4x8x8xf32, #tpu.memory_space<vmem>>, vector<1x1x8x8xf32>,
    %185 = arith.truncf %181 : vector<8x8xf32> to vector<8x8xbf16>
    %cst_96 = arith.constant dense<0.000000e+00> : vector<8x64xf32>
    %186 = tpu.matmul %185, %3, %cst_96 {dimension_numbers = #tpu.dot_dimension_numbers<[1], [0], [0], [1], [0, 0, 1, 1], [], []>} : vector<8x8xbf16>, vector<8x64xbf16>, vector<8x64xf32> -> vector<8x64xf32>
    %187 = vector.broadcast %4 : vector<1x64xf32> to vector<8x64xf32>
    %188 = arith.addf %186, %187 : vector<8x64xf32>
    %c0_97 = arith.constant 0 : index
    %c0_98 = arith.constant 0 : index
    %c0_99 = arith.constant 0 : index
    %c0_100 = arith.constant 0 : index
    %189 = vector.load %arg15[%c0_97, %c0_98, %c0_99, %c0_100] : memref<1x4x8x64xf32, #tpu.memory_space<vmem>>, vector<1x1x8x64xf32>
    %190 = vector.shape_cast %189 : vector<1x1x8x64xf32> to vector<8x64xf32>
    %191 = vector.shape_cast %188 : vector<8x64xf32> to vector<1x1x8x64xf32>
    tpu.vector_store %arg15[%c0_97, %c0_98, %c0_99, %c0_100], %191 {strides = array<i32>} : memref<1x4x8x64xf32, #tpu.memory_space<vmem>>, vector<1x1x8x64xf32>,
    %cst_101 = arith.constant 0.000000e+00 : f32
    %192 = vector.broadcast %cst_101 : f32 to vector<8x8xf32>
    %193 = vector.extract_strided_slice %48 {offsets = [0, 0], sizes = [8, 8], strides = [1, 1]} : vector<10x8xf32> to vector<8x8xf32>
    %194 = arith.truncf %193 : vector<8x8xf32> to vector<8x8xbf16>
    %c0_102 = arith.constant 0 : index
    %c0_103 = arith.constant 0 : index
    %c0_104 = arith.constant 0 : index
    %195 = vector.load %arg10[%c0_102, %c0_103, %c0_104] : memref<9x8x8xbf16, #tpu.memory_space<vmem>>, vector<1x8x8xbf16>
    %196 = vector.shape_cast %195 : vector<1x8x8xbf16> to vector<8x8xbf16>
    %cst_105 = arith.constant dense<0.000000e+00> : vector<8x8xf32>
    %197 = tpu.matmul %194, %196, %cst_105 {dimension_numbers = #tpu.dot_dimension_numbers<[1], [0], [0], [1], [0, 0, 1, 1], [], []>} : vector<8x8xbf16>, vector<8x8xbf16>, vector<8x8xf32> -> vector<8x8xf32>
    %198 = arith.addf %192, %197 : vector<8x8xf32>
    %199 = vector.extract_strided_slice %48 {offsets = [1, 0], sizes = [8, 8], strides = [1, 1]} : vector<10x8xf32> to vector<8x8xf32>
    %200 = arith.truncf %199 : vector<8x8xf32> to vector<8x8xbf16>
    %c1_106 = arith.constant 1 : index
    %c0_107 = arith.constant 0 : index
    %c0_108 = arith.constant 0 : index
    %201 = vector.load %arg10[%c1_106, %c0_107, %c0_108] : memref<9x8x8xbf16, #tpu.memory_space<vmem>>, vector<1x8x8xbf16>
    %202 = vector.shape_cast %201 : vector<1x8x8xbf16> to vector<8x8xbf16>
    %cst_109 = arith.constant dense<0.000000e+00> : vector<8x8xf32>
    %203 = tpu.matmul %200, %202, %cst_109 {dimension_numbers = #tpu.dot_dimension_numbers<[1], [0], [0], [1], [0, 0, 1, 1], [], []>} : vector<8x8xbf16>, vector<8x8xbf16>, vector<8x8xf32> -> vector<8x8xf32>
    %204 = arith.addf %198, %203 : vector<8x8xf32>
    %205 = vector.extract_strided_slice %48 {offsets = [2, 0], sizes = [8, 8], strides = [1, 1]} : vector<10x8xf32> to vector<8x8xf32>
    %206 = arith.truncf %205 : vector<8x8xf32> to vector<8x8xbf16>
    %c2_110 = arith.constant 2 : index
    %c0_111 = arith.constant 0 : index
    %c0_112 = arith.constant 0 : index
    %207 = vector.load %arg10[%c2_110, %c0_111, %c0_112] : memref<9x8x8xbf16, #tpu.memory_space<vmem>>, vector<1x8x8xbf16>
    %208 = vector.shape_cast %207 : vector<1x8x8xbf16> to vector<8x8xbf16>
    %cst_113 = arith.constant dense<0.000000e+00> : vector<8x8xf32>
    %209 = tpu.matmul %206, %208, %cst_113 {dimension_numbers = #tpu.dot_dimension_numbers<[1], [0], [0], [1], [0, 0, 1, 1], [], []>} : vector<8x8xbf16>, vector<8x8xbf16>, vector<8x8xf32> -> vector<8x8xf32>
    %210 = arith.addf %204, %209 : vector<8x8xf32>
    %211 = vector.extract_strided_slice %67 {offsets = [0, 0], sizes = [8, 8], strides = [1, 1]} : vector<10x8xf32> to vector<8x8xf32>
    %212 = arith.truncf %211 : vector<8x8xf32> to vector<8x8xbf16>
    %c3_114 = arith.constant 3 : index
    %c0_115 = arith.constant 0 : index
    %c0_116 = arith.constant 0 : index
    %213 = vector.load %arg10[%c3_114, %c0_115, %c0_116] : memref<9x8x8xbf16, #tpu.memory_space<vmem>>, vector<1x8x8xbf16>
    %214 = vector.shape_cast %213 : vector<1x8x8xbf16> to vector<8x8xbf16>
    %cst_117 = arith.constant dense<0.000000e+00> : vector<8x8xf32>
    %215 = tpu.matmul %212, %214, %cst_117 {dimension_numbers = #tpu.dot_dimension_numbers<[1], [0], [0], [1], [0, 0, 1, 1], [], []>} : vector<8x8xbf16>, vector<8x8xbf16>, vector<8x8xf32> -> vector<8x8xf32>
    %216 = arith.addf %210, %215 : vector<8x8xf32>
    %217 = vector.extract_strided_slice %67 {offsets = [1, 0], sizes = [8, 8], strides = [1, 1]} : vector<10x8xf32> to vector<8x8xf32>
    %218 = arith.truncf %217 : vector<8x8xf32> to vector<8x8xbf16>
    %c4_118 = arith.constant 4 : index
    %c0_119 = arith.constant 0 : index
    %c0_120 = arith.constant 0 : index
    %219 = vector.load %arg10[%c4_118, %c0_119, %c0_120] : memref<9x8x8xbf16, #tpu.memory_space<vmem>>, vector<1x8x8xbf16>
    %220 = vector.shape_cast %219 : vector<1x8x8xbf16> to vector<8x8xbf16>
    %cst_121 = arith.constant dense<0.000000e+00> : vector<8x8xf32>
    %221 = tpu.matmul %218, %220, %cst_121 {dimension_numbers = #tpu.dot_dimension_numbers<[1], [0], [0], [1], [0, 0, 1, 1], [], []>} : vector<8x8xbf16>, vector<8x8xbf16>, vector<8x8xf32> -> vector<8x8xf32>
    %222 = arith.addf %216, %221 : vector<8x8xf32>
    %223 = vector.extract_strided_slice %67 {offsets = [2, 0], sizes = [8, 8], strides = [1, 1]} : vector<10x8xf32> to vector<8x8xf32>
    %224 = arith.truncf %223 : vector<8x8xf32> to vector<8x8xbf16>
    %c5_122 = arith.constant 5 : index
    %c0_123 = arith.constant 0 : index
    %c0_124 = arith.constant 0 : index
    %225 = vector.load %arg10[%c5_122, %c0_123, %c0_124] : memref<9x8x8xbf16, #tpu.memory_space<vmem>>, vector<1x8x8xbf16>
    %226 = vector.shape_cast %225 : vector<1x8x8xbf16> to vector<8x8xbf16>
    %cst_125 = arith.constant dense<0.000000e+00> : vector<8x8xf32>
    %227 = tpu.matmul %224, %226, %cst_125 {dimension_numbers = #tpu.dot_dimension_numbers<[1], [0], [0], [1], [0, 0, 1, 1], [], []>} : vector<8x8xbf16>, vector<8x8xbf16>, vector<8x8xf32> -> vector<8x8xf32>
    %228 = arith.addf %222, %227 : vector<8x8xf32>
    %229 = vector.extract_strided_slice %86 {offsets = [0, 0], sizes = [8, 8], strides = [1, 1]} : vector<10x8xf32> to vector<8x8xf32>
    %230 = arith.truncf %229 : vector<8x8xf32> to vector<8x8xbf16>
    %c6_126 = arith.constant 6 : index
    %c0_127 = arith.constant 0 : index
    %c0_128 = arith.constant 0 : index
    %231 = vector.load %arg10[%c6_126, %c0_127, %c0_128] : memref<9x8x8xbf16, #tpu.memory_space<vmem>>, vector<1x8x8xbf16>
    %232 = vector.shape_cast %231 : vector<1x8x8xbf16> to vector<8x8xbf16>
    %cst_129 = arith.constant dense<0.000000e+00> : vector<8x8xf32>
    %233 = tpu.matmul %230, %232, %cst_129 {dimension_numbers = #tpu.dot_dimension_numbers<[1], [0], [0], [1], [0, 0, 1, 1], [], []>} : vector<8x8xbf16>, vector<8x8xbf16>, vector<8x8xf32> -> vector<8x8xf32>
    %234 = arith.addf %228, %233 : vector<8x8xf32>
    %235 = vector.extract_strided_slice %86 {offsets = [1, 0], sizes = [8, 8], strides = [1, 1]} : vector<10x8xf32> to vector<8x8xf32>
    %236 = arith.truncf %235 : vector<8x8xf32> to vector<8x8xbf16>
    %c7_130 = arith.constant 7 : index
    %c0_131 = arith.constant 0 : index
    %c0_132 = arith.constant 0 : index
    %237 = vector.load %arg10[%c7_130, %c0_131, %c0_132] : memref<9x8x8xbf16, #tpu.memory_space<vmem>>, vector<1x8x8xbf16>
    %238 = vector.shape_cast %237 : vector<1x8x8xbf16> to vector<8x8xbf16>
    %cst_133 = arith.constant dense<0.000000e+00> : vector<8x8xf32>
    %239 = tpu.matmul %236, %238, %cst_133 {dimension_numbers = #tpu.dot_dimension_numbers<[1], [0], [0], [1], [0, 0, 1, 1], [], []>} : vector<8x8xbf16>, vector<8x8xbf16>, vector<8x8xf32> -> vector<8x8xf32>
    %240 = arith.addf %234, %239 : vector<8x8xf32>
    %241 = vector.extract_strided_slice %86 {offsets = [2, 0], sizes = [8, 8], strides = [1, 1]} : vector<10x8xf32> to vector<8x8xf32>
    %242 = arith.truncf %241 : vector<8x8xf32> to vector<8x8xbf16>
    %c8_134 = arith.constant 8 : index
    %c0_135 = arith.constant 0 : index
    %c0_136 = arith.constant 0 : index
    %243 = vector.load %arg10[%c8_134, %c0_135, %c0_136] : memref<9x8x8xbf16, #tpu.memory_space<vmem>>, vector<1x8x8xbf16>
    %244 = vector.shape_cast %243 : vector<1x8x8xbf16> to vector<8x8xbf16>
    %cst_137 = arith.constant dense<0.000000e+00> : vector<8x8xf32>
    %245 = tpu.matmul %242, %244, %cst_137 {dimension_numbers = #tpu.dot_dimension_numbers<[1], [0], [0], [1], [0, 0, 1, 1], [], []>} : vector<8x8xbf16>, vector<8x8xbf16>, vector<8x8xf32> -> vector<8x8xf32>
    %246 = arith.addf %240, %245 : vector<8x8xf32>
    %247 = vector.broadcast %2 : vector<1x8xf32> to vector<8x8xf32>
    %248 = arith.addf %246, %247 : vector<8x8xf32>
    %c0_138 = arith.constant 0 : index
    %c1_139 = arith.constant 1 : index
    %c0_140 = arith.constant 0 : index
    %c0_141 = arith.constant 0 : index
    %249 = vector.load %arg14[%c0_138, %c1_139, %c0_140, %c0_141] : memref<1x4x8x8xf32, #tpu.memory_space<vmem>>, vector<1x1x8x8xf32>
    %250 = vector.shape_cast %249 : vector<1x1x8x8xf32> to vector<8x8xf32>
    %251 = vector.shape_cast %248 : vector<8x8xf32> to vector<1x1x8x8xf32>
    tpu.vector_store %arg14[%c0_138, %c1_139, %c0_140, %c0_141], %251 {strides = array<i32>} : memref<1x4x8x8xf32, #tpu.memory_space<vmem>>, vector<1x1x8x8xf32>,
    %252 = arith.truncf %248 : vector<8x8xf32> to vector<8x8xbf16>
    %cst_142 = arith.constant dense<0.000000e+00> : vector<8x64xf32>
    %253 = tpu.matmul %252, %3, %cst_142 {dimension_numbers = #tpu.dot_dimension_numbers<[1], [0], [0], [1], [0, 0, 1, 1], [], []>} : vector<8x8xbf16>, vector<8x64xbf16>, vector<8x64xf32> -> vector<8x64xf32>
    %254 = vector.broadcast %4 : vector<1x64xf32> to vector<8x64xf32>
    %255 = arith.addf %253, %254 : vector<8x64xf32>
    %c0_143 = arith.constant 0 : index
    %c1_144 = arith.constant 1 : index
    %c0_145 = arith.constant 0 : index
    %c0_146 = arith.constant 0 : index
    %256 = vector.load %arg15[%c0_143, %c1_144, %c0_145, %c0_146] : memref<1x4x8x64xf32, #tpu.memory_space<vmem>>, vector<1x1x8x64xf32>
    %257 = vector.shape_cast %256 : vector<1x1x8x64xf32> to vector<8x64xf32>
    %258 = vector.shape_cast %255 : vector<8x64xf32> to vector<1x1x8x64xf32>
    tpu.vector_store %arg15[%c0_143, %c1_144, %c0_145, %c0_146], %258 {strides = array<i32>} : memref<1x4x8x64xf32, #tpu.memory_space<vmem>>, vector<1x1x8x64xf32>,
    %cst_147 = arith.constant 0.000000e+00 : f32
    %259 = vector.broadcast %cst_147 : f32 to vector<8x8xf32>
    %260 = vector.extract_strided_slice %67 {offsets = [0, 0], sizes = [8, 8], strides = [1, 1]} : vector<10x8xf32> to vector<8x8xf32>
    %261 = arith.truncf %260 : vector<8x8xf32> to vector<8x8xbf16>
    %c0_148 = arith.constant 0 : index
    %c0_149 = arith.constant 0 : index
    %c0_150 = arith.constant 0 : index
    %262 = vector.load %arg10[%c0_148, %c0_149, %c0_150] : memref<9x8x8xbf16, #tpu.memory_space<vmem>>, vector<1x8x8xbf16>
    %263 = vector.shape_cast %262 : vector<1x8x8xbf16> to vector<8x8xbf16>
    %cst_151 = arith.constant dense<0.000000e+00> : vector<8x8xf32>
    %264 = tpu.matmul %261, %263, %cst_151 {dimension_numbers = #tpu.dot_dimension_numbers<[1], [0], [0], [1], [0, 0, 1, 1], [], []>} : vector<8x8xbf16>, vector<8x8xbf16>, vector<8x8xf32> -> vector<8x8xf32>
    %265 = arith.addf %259, %264 : vector<8x8xf32>
    %266 = vector.extract_strided_slice %67 {offsets = [1, 0], sizes = [8, 8], strides = [1, 1]} : vector<10x8xf32> to vector<8x8xf32>
    %267 = arith.truncf %266 : vector<8x8xf32> to vector<8x8xbf16>
    %c1_152 = arith.constant 1 : index
    %c0_153 = arith.constant 0 : index
    %c0_154 = arith.constant 0 : index
    %268 = vector.load %arg10[%c1_152, %c0_153, %c0_154] : memref<9x8x8xbf16, #tpu.memory_space<vmem>>, vector<1x8x8xbf16>
    %269 = vector.shape_cast %268 : vector<1x8x8xbf16> to vector<8x8xbf16>
    %cst_155 = arith.constant dense<0.000000e+00> : vector<8x8xf32>
    %270 = tpu.matmul %267, %269, %cst_155 {dimension_numbers = #tpu.dot_dimension_numbers<[1], [0], [0], [1], [0, 0, 1, 1], [], []>} : vector<8x8xbf16>, vector<8x8xbf16>, vector<8x8xf32> -> vector<8x8xf32>
    %271 = arith.addf %265, %270 : vector<8x8xf32>
    %272 = vector.extract_strided_slice %67 {offsets = [2, 0], sizes = [8, 8], strides = [1, 1]} : vector<10x8xf32> to vector<8x8xf32>
    %273 = arith.truncf %272 : vector<8x8xf32> to vector<8x8xbf16>
    %c2_156 = arith.constant 2 : index
    %c0_157 = arith.constant 0 : index
    %c0_158 = arith.constant 0 : index
    %274 = vector.load %arg10[%c2_156, %c0_157, %c0_158] : memref<9x8x8xbf16, #tpu.memory_space<vmem>>, vector<1x8x8xbf16>
    %275 = vector.shape_cast %274 : vector<1x8x8xbf16> to vector<8x8xbf16>
    %cst_159 = arith.constant dense<0.000000e+00> : vector<8x8xf32>
    %276 = tpu.matmul %273, %275, %cst_159 {dimension_numbers = #tpu.dot_dimension_numbers<[1], [0], [0], [1], [0, 0, 1, 1], [], []>} : vector<8x8xbf16>, vector<8x8xbf16>, vector<8x8xf32> -> vector<8x8xf32>
    %277 = arith.addf %271, %276 : vector<8x8xf32>
    %278 = vector.extract_strided_slice %86 {offsets = [0, 0], sizes = [8, 8], strides = [1, 1]} : vector<10x8xf32> to vector<8x8xf32>
    %279 = arith.truncf %278 : vector<8x8xf32> to vector<8x8xbf16>
    %c3_160 = arith.constant 3 : index
    %c0_161 = arith.constant 0 : index
    %c0_162 = arith.constant 0 : index
    %280 = vector.load %arg10[%c3_160, %c0_161, %c0_162] : memref<9x8x8xbf16, #tpu.memory_space<vmem>>, vector<1x8x8xbf16>
    %281 = vector.shape_cast %280 : vector<1x8x8xbf16> to vector<8x8xbf16>
    %cst_163 = arith.constant dense<0.000000e+00> : vector<8x8xf32>
    %282 = tpu.matmul %279, %281, %cst_163 {dimension_numbers = #tpu.dot_dimension_numbers<[1], [0], [0], [1], [0, 0, 1, 1], [], []>} : vector<8x8xbf16>, vector<8x8xbf16>, vector<8x8xf32> -> vector<8x8xf32>
    %283 = arith.addf %277, %282 : vector<8x8xf32>
    %284 = vector.extract_strided_slice %86 {offsets = [1, 0], sizes = [8, 8], strides = [1, 1]} : vector<10x8xf32> to vector<8x8xf32>
    %285 = arith.truncf %284 : vector<8x8xf32> to vector<8x8xbf16>
    %c4_164 = arith.constant 4 : index
    %c0_165 = arith.constant 0 : index
    %c0_166 = arith.constant 0 : index
    %286 = vector.load %arg10[%c4_164, %c0_165, %c0_166] : memref<9x8x8xbf16, #tpu.memory_space<vmem>>, vector<1x8x8xbf16>
    %287 = vector.shape_cast %286 : vector<1x8x8xbf16> to vector<8x8xbf16>
    %cst_167 = arith.constant dense<0.000000e+00> : vector<8x8xf32>
    %288 = tpu.matmul %285, %287, %cst_167 {dimension_numbers = #tpu.dot_dimension_numbers<[1], [0], [0], [1], [0, 0, 1, 1], [], []>} : vector<8x8xbf16>, vector<8x8xbf16>, vector<8x8xf32> -> vector<8x8xf32>
    %289 = arith.addf %283, %288 : vector<8x8xf32>
    %290 = vector.extract_strided_slice %86 {offsets = [2, 0], sizes = [8, 8], strides = [1, 1]} : vector<10x8xf32> to vector<8x8xf32>
    %291 = arith.truncf %290 : vector<8x8xf32> to vector<8x8xbf16>
    %c5_168 = arith.constant 5 : index
    %c0_169 = arith.constant 0 : index
    %c0_170 = arith.constant 0 : index
    %292 = vector.load %arg10[%c5_168, %c0_169, %c0_170] : memref<9x8x8xbf16, #tpu.memory_space<vmem>>, vector<1x8x8xbf16>
    %293 = vector.shape_cast %292 : vector<1x8x8xbf16> to vector<8x8xbf16>
    %cst_171 = arith.constant dense<0.000000e+00> : vector<8x8xf32>
    %294 = tpu.matmul %291, %293, %cst_171 {dimension_numbers = #tpu.dot_dimension_numbers<[1], [0], [0], [1], [0, 0, 1, 1], [], []>} : vector<8x8xbf16>, vector<8x8xbf16>, vector<8x8xf32> -> vector<8x8xf32>
    %295 = arith.addf %289, %294 : vector<8x8xf32>
    %296 = vector.extract_strided_slice %105 {offsets = [0, 0], sizes = [8, 8], strides = [1, 1]} : vector<10x8xf32> to vector<8x8xf32>
    %297 = arith.truncf %296 : vector<8x8xf32> to vector<8x8xbf16>
    %c6_172 = arith.constant 6 : index
    %c0_173 = arith.constant 0 : index
    %c0_174 = arith.constant 0 : index
    %298 = vector.load %arg10[%c6_172, %c0_173, %c0_174] : memref<9x8x8xbf16, #tpu.memory_space<vmem>>, vector<1x8x8xbf16>
    %299 = vector.shape_cast %298 : vector<1x8x8xbf16> to vector<8x8xbf16>
    %cst_175 = arith.constant dense<0.000000e+00> : vector<8x8xf32>
    %300 = tpu.matmul %297, %299, %cst_175 {dimension_numbers = #tpu.dot_dimension_numbers<[1], [0], [0], [1], [0, 0, 1, 1], [], []>} : vector<8x8xbf16>, vector<8x8xbf16>, vector<8x8xf32> -> vector<8x8xf32>
    %301 = arith.addf %295, %300 : vector<8x8xf32>
    %302 = vector.extract_strided_slice %105 {offsets = [1, 0], sizes = [8, 8], strides = [1, 1]} : vector<10x8xf32> to vector<8x8xf32>
    %303 = arith.truncf %302 : vector<8x8xf32> to vector<8x8xbf16>
    %c7_176 = arith.constant 7 : index
    %c0_177 = arith.constant 0 : index
    %c0_178 = arith.constant 0 : index
    %304 = vector.load %arg10[%c7_176, %c0_177, %c0_178] : memref<9x8x8xbf16, #tpu.memory_space<vmem>>, vector<1x8x8xbf16>
    %305 = vector.shape_cast %304 : vector<1x8x8xbf16> to vector<8x8xbf16>
    %cst_179 = arith.constant dense<0.000000e+00> : vector<8x8xf32>
    %306 = tpu.matmul %303, %305, %cst_179 {dimension_numbers = #tpu.dot_dimension_numbers<[1], [0], [0], [1], [0, 0, 1, 1], [], []>} : vector<8x8xbf16>, vector<8x8xbf16>, vector<8x8xf32> -> vector<8x8xf32>
    %307 = arith.addf %301, %306 : vector<8x8xf32>
    %308 = vector.extract_strided_slice %105 {offsets = [2, 0], sizes = [8, 8], strides = [1, 1]} : vector<10x8xf32> to vector<8x8xf32>
    %309 = arith.truncf %308 : vector<8x8xf32> to vector<8x8xbf16>
    %c8_180 = arith.constant 8 : index
    %c0_181 = arith.constant 0 : index
    %c0_182 = arith.constant 0 : index
    %310 = vector.load %arg10[%c8_180, %c0_181, %c0_182] : memref<9x8x8xbf16, #tpu.memory_space<vmem>>, vector<1x8x8xbf16>
    %311 = vector.shape_cast %310 : vector<1x8x8xbf16> to vector<8x8xbf16>
    %cst_183 = arith.constant dense<0.000000e+00> : vector<8x8xf32>
    %312 = tpu.matmul %309, %311, %cst_183 {dimension_numbers = #tpu.dot_dimension_numbers<[1], [0], [0], [1], [0, 0, 1, 1], [], []>} : vector<8x8xbf16>, vector<8x8xbf16>, vector<8x8xf32> -> vector<8x8xf32>
    %313 = arith.addf %307, %312 : vector<8x8xf32>
    %314 = vector.broadcast %2 : vector<1x8xf32> to vector<8x8xf32>
    %315 = arith.addf %313, %314 : vector<8x8xf32>
    %c0_184 = arith.constant 0 : index
    %c2_185 = arith.constant 2 : index
    %c0_186 = arith.constant 0 : index
    %c0_187 = arith.constant 0 : index
    %316 = vector.load %arg14[%c0_184, %c2_185, %c0_186, %c0_187] : memref<1x4x8x8xf32, #tpu.memory_space<vmem>>, vector<1x1x8x8xf32>
    %317 = vector.shape_cast %316 : vector<1x1x8x8xf32> to vector<8x8xf32>
    %318 = vector.shape_cast %315 : vector<8x8xf32> to vector<1x1x8x8xf32>
    tpu.vector_store %arg14[%c0_184, %c2_185, %c0_186, %c0_187], %318 {strides = array<i32>} : memref<1x4x8x8xf32, #tpu.memory_space<vmem>>, vector<1x1x8x8xf32>,
    %319 = arith.truncf %315 : vector<8x8xf32> to vector<8x8xbf16>
    %cst_188 = arith.constant dense<0.000000e+00> : vector<8x64xf32>
    %320 = tpu.matmul %319, %3, %cst_188 {dimension_numbers = #tpu.dot_dimension_numbers<[1], [0], [0], [1], [0, 0, 1, 1], [], []>} : vector<8x8xbf16>, vector<8x64xbf16>, vector<8x64xf32> -> vector<8x64xf32>
    %321 = vector.broadcast %4 : vector<1x64xf32> to vector<8x64xf32>
    %322 = arith.addf %320, %321 : vector<8x64xf32>
    %c0_189 = arith.constant 0 : index
    %c2_190 = arith.constant 2 : index
    %c0_191 = arith.constant 0 : index
    %c0_192 = arith.constant 0 : index
    %323 = vector.load %arg15[%c0_189, %c2_190, %c0_191, %c0_192] : memref<1x4x8x64xf32, #tpu.memory_space<vmem>>, vector<1x1x8x64xf32>
    %324 = vector.shape_cast %323 : vector<1x1x8x64xf32> to vector<8x64xf32>
    %325 = vector.shape_cast %322 : vector<8x64xf32> to vector<1x1x8x64xf32>
    tpu.vector_store %arg15[%c0_189, %c2_190, %c0_191, %c0_192], %325 {strides = array<i32>} : memref<1x4x8x64xf32, #tpu.memory_space<vmem>>, vector<1x1x8x64xf32>,
    %cst_193 = arith.constant 0.000000e+00 : f32
    %326 = vector.broadcast %cst_193 : f32 to vector<8x8xf32>
    %327 = vector.extract_strided_slice %86 {offsets = [0, 0], sizes = [8, 8], strides = [1, 1]} : vector<10x8xf32> to vector<8x8xf32>
    %328 = arith.truncf %327 : vector<8x8xf32> to vector<8x8xbf16>
    %c0_194 = arith.constant 0 : index
    %c0_195 = arith.constant 0 : index
    %c0_196 = arith.constant 0 : index
    %329 = vector.load %arg10[%c0_194, %c0_195, %c0_196] : memref<9x8x8xbf16, #tpu.memory_space<vmem>>, vector<1x8x8xbf16>
    %330 = vector.shape_cast %329 : vector<1x8x8xbf16> to vector<8x8xbf16>
    %cst_197 = arith.constant dense<0.000000e+00> : vector<8x8xf32>
    %331 = tpu.matmul %328, %330, %cst_197 {dimension_numbers = #tpu.dot_dimension_numbers<[1], [0], [0], [1], [0, 0, 1, 1], [], []>} : vector<8x8xbf16>, vector<8x8xbf16>, vector<8x8xf32> -> vector<8x8xf32>
    %332 = arith.addf %326, %331 : vector<8x8xf32>
    %333 = vector.extract_strided_slice %86 {offsets = [1, 0], sizes = [8, 8], strides = [1, 1]} : vector<10x8xf32> to vector<8x8xf32>
    %334 = arith.truncf %333 : vector<8x8xf32> to vector<8x8xbf16>
    %c1_198 = arith.constant 1 : index
    %c0_199 = arith.constant 0 : index
    %c0_200 = arith.constant 0 : index
    %335 = vector.load %arg10[%c1_198, %c0_199, %c0_200] : memref<9x8x8xbf16, #tpu.memory_space<vmem>>, vector<1x8x8xbf16>
    %336 = vector.shape_cast %335 : vector<1x8x8xbf16> to vector<8x8xbf16>
    %cst_201 = arith.constant dense<0.000000e+00> : vector<8x8xf32>
    %337 = tpu.matmul %334, %336, %cst_201 {dimension_numbers = #tpu.dot_dimension_numbers<[1], [0], [0], [1], [0, 0, 1, 1], [], []>} : vector<8x8xbf16>, vector<8x8xbf16>, vector<8x8xf32> -> vector<8x8xf32>
    %338 = arith.addf %332, %337 : vector<8x8xf32>
    %339 = vector.extract_strided_slice %86 {offsets = [2, 0], sizes = [8, 8], strides = [1, 1]} : vector<10x8xf32> to vector<8x8xf32>
    %340 = arith.truncf %339 : vector<8x8xf32> to vector<8x8xbf16>
    %c2_202 = arith.constant 2 : index
    %c0_203 = arith.constant 0 : index
    %c0_204 = arith.constant 0 : index
    %341 = vector.load %arg10[%c2_202, %c0_203, %c0_204] : memref<9x8x8xbf16, #tpu.memory_space<vmem>>, vector<1x8x8xbf16>
    %342 = vector.shape_cast %341 : vector<1x8x8xbf16> to vector<8x8xbf16>
    %cst_205 = arith.constant dense<0.000000e+00> : vector<8x8xf32>
    %343 = tpu.matmul %340, %342, %cst_205 {dimension_numbers = #tpu.dot_dimension_numbers<[1], [0], [0], [1], [0, 0, 1, 1], [], []>} : vector<8x8xbf16>, vector<8x8xbf16>, vector<8x8xf32> -> vector<8x8xf32>
    %344 = arith.addf %338, %343 : vector<8x8xf32>
    %345 = vector.extract_strided_slice %105 {offsets = [0, 0], sizes = [8, 8], strides = [1, 1]} : vector<10x8xf32> to vector<8x8xf32>
    %346 = arith.truncf %345 : vector<8x8xf32> to vector<8x8xbf16>
    %c3_206 = arith.constant 3 : index
    %c0_207 = arith.constant 0 : index
    %c0_208 = arith.constant 0 : index
    %347 = vector.load %arg10[%c3_206, %c0_207, %c0_208] : memref<9x8x8xbf16, #tpu.memory_space<vmem>>, vector<1x8x8xbf16>
    %348 = vector.shape_cast %347 : vector<1x8x8xbf16> to vector<8x8xbf16>
    %cst_209 = arith.constant dense<0.000000e+00> : vector<8x8xf32>
    %349 = tpu.matmul %346, %348, %cst_209 {dimension_numbers = #tpu.dot_dimension_numbers<[1], [0], [0], [1], [0, 0, 1, 1], [], []>} : vector<8x8xbf16>, vector<8x8xbf16>, vector<8x8xf32> -> vector<8x8xf32>
    %350 = arith.addf %344, %349 : vector<8x8xf32>
    %351 = vector.extract_strided_slice %105 {offsets = [1, 0], sizes = [8, 8], strides = [1, 1]} : vector<10x8xf32> to vector<8x8xf32>
    %352 = arith.truncf %351 : vector<8x8xf32> to vector<8x8xbf16>
    %c4_210 = arith.constant 4 : index
    %c0_211 = arith.constant 0 : index
    %c0_212 = arith.constant 0 : index
    %353 = vector.load %arg10[%c4_210, %c0_211, %c0_212] : memref<9x8x8xbf16, #tpu.memory_space<vmem>>, vector<1x8x8xbf16>
    %354 = vector.shape_cast %353 : vector<1x8x8xbf16> to vector<8x8xbf16>
    %cst_213 = arith.constant dense<0.000000e+00> : vector<8x8xf32>
    %355 = tpu.matmul %352, %354, %cst_213 {dimension_numbers = #tpu.dot_dimension_numbers<[1], [0], [0], [1], [0, 0, 1, 1], [], []>} : vector<8x8xbf16>, vector<8x8xbf16>, vector<8x8xf32> -> vector<8x8xf32>
    %356 = arith.addf %350, %355 : vector<8x8xf32>
    %357 = vector.extract_strided_slice %105 {offsets = [2, 0], sizes = [8, 8], strides = [1, 1]} : vector<10x8xf32> to vector<8x8xf32>
    %358 = arith.truncf %357 : vector<8x8xf32> to vector<8x8xbf16>
    %c5_214 = arith.constant 5 : index
    %c0_215 = arith.constant 0 : index
    %c0_216 = arith.constant 0 : index
    %359 = vector.load %arg10[%c5_214, %c0_215, %c0_216] : memref<9x8x8xbf16, #tpu.memory_space<vmem>>, vector<1x8x8xbf16>
    %360 = vector.shape_cast %359 : vector<1x8x8xbf16> to vector<8x8xbf16>
    %cst_217 = arith.constant dense<0.000000e+00> : vector<8x8xf32>
    %361 = tpu.matmul %358, %360, %cst_217 {dimension_numbers = #tpu.dot_dimension_numbers<[1], [0], [0], [1], [0, 0, 1, 1], [], []>} : vector<8x8xbf16>, vector<8x8xbf16>, vector<8x8xf32> -> vector<8x8xf32>
    %362 = arith.addf %356, %361 : vector<8x8xf32>
    %363 = vector.extract_strided_slice %124 {offsets = [0, 0], sizes = [8, 8], strides = [1, 1]} : vector<10x8xf32> to vector<8x8xf32>
    %364 = arith.truncf %363 : vector<8x8xf32> to vector<8x8xbf16>
    %c6_218 = arith.constant 6 : index
    %c0_219 = arith.constant 0 : index
    %c0_220 = arith.constant 0 : index
    %365 = vector.load %arg10[%c6_218, %c0_219, %c0_220] : memref<9x8x8xbf16, #tpu.memory_space<vmem>>, vector<1x8x8xbf16>
    %366 = vector.shape_cast %365 : vector<1x8x8xbf16> to vector<8x8xbf16>
    %cst_221 = arith.constant dense<0.000000e+00> : vector<8x8xf32>
    %367 = tpu.matmul %364, %366, %cst_221 {dimension_numbers = #tpu.dot_dimension_numbers<[1], [0], [0], [1], [0, 0, 1, 1], [], []>} : vector<8x8xbf16>, vector<8x8xbf16>, vector<8x8xf32> -> vector<8x8xf32>
    %368 = arith.addf %362, %367 : vector<8x8xf32>
    %369 = vector.extract_strided_slice %124 {offsets = [1, 0], sizes = [8, 8], strides = [1, 1]} : vector<10x8xf32> to vector<8x8xf32>
    %370 = arith.truncf %369 : vector<8x8xf32> to vector<8x8xbf16>
    %c7_222 = arith.constant 7 : index
    %c0_223 = arith.constant 0 : index
    %c0_224 = arith.constant 0 : index
    %371 = vector.load %arg10[%c7_222, %c0_223, %c0_224] : memref<9x8x8xbf16, #tpu.memory_space<vmem>>, vector<1x8x8xbf16>
    %372 = vector.shape_cast %371 : vector<1x8x8xbf16> to vector<8x8xbf16>
    %cst_225 = arith.constant dense<0.000000e+00> : vector<8x8xf32>
    %373 = tpu.matmul %370, %372, %cst_225 {dimension_numbers = #tpu.dot_dimension_numbers<[1], [0], [0], [1], [0, 0, 1, 1], [], []>} : vector<8x8xbf16>, vector<8x8xbf16>, vector<8x8xf32> -> vector<8x8xf32>
    %374 = arith.addf %368, %373 : vector<8x8xf32>
    %375 = vector.extract_strided_slice %124 {offsets = [2, 0], sizes = [8, 8], strides = [1, 1]} : vector<10x8xf32> to vector<8x8xf32>
    %376 = arith.truncf %375 : vector<8x8xf32> to vector<8x8xbf16>
    %c8_226 = arith.constant 8 : index
    %c0_227 = arith.constant 0 : index
    %c0_228 = arith.constant 0 : index
    %377 = vector.load %arg10[%c8_226, %c0_227, %c0_228] : memref<9x8x8xbf16, #tpu.memory_space<vmem>>, vector<1x8x8xbf16>
    %378 = vector.shape_cast %377 : vector<1x8x8xbf16> to vector<8x8xbf16>
    %cst_229 = arith.constant dense<0.000000e+00> : vector<8x8xf32>
    %379 = tpu.matmul %376, %378, %cst_229 {dimension_numbers = #tpu.dot_dimension_numbers<[1], [0], [0], [1], [0, 0, 1, 1], [], []>} : vector<8x8xbf16>, vector<8x8xbf16>, vector<8x8xf32> -> vector<8x8xf32>
    %380 = arith.addf %374, %379 : vector<8x8xf32>
    %381 = vector.broadcast %2 : vector<1x8xf32> to vector<8x8xf32>
    %382 = arith.addf %380, %381 : vector<8x8xf32>
    %c0_230 = arith.constant 0 : index
    %c3_231 = arith.constant 3 : index
    %c0_232 = arith.constant 0 : index
    %c0_233 = arith.constant 0 : index
    %383 = vector.load %arg14[%c0_230, %c3_231, %c0_232, %c0_233] : memref<1x4x8x8xf32, #tpu.memory_space<vmem>>, vector<1x1x8x8xf32>
    %384 = vector.shape_cast %383 : vector<1x1x8x8xf32> to vector<8x8xf32>
    %385 = vector.shape_cast %382 : vector<8x8xf32> to vector<1x1x8x8xf32>
    tpu.vector_store %arg14[%c0_230, %c3_231, %c0_232, %c0_233], %385 {strides = array<i32>} : memref<1x4x8x8xf32, #tpu.memory_space<vmem>>, vector<1x1x8x8xf32>,
    %386 = arith.truncf %382 : vector<8x8xf32> to vector<8x8xbf16>
    %cst_234 = arith.constant dense<0.000000e+00> : vector<8x64xf32>
    %387 = tpu.matmul %386, %3, %cst_234 {dimension_numbers = #tpu.dot_dimension_numbers<[1], [0], [0], [1], [0, 0, 1, 1], [], []>} : vector<8x8xbf16>, vector<8x64xbf16>, vector<8x64xf32> -> vector<8x64xf32>
    %388 = vector.broadcast %4 : vector<1x64xf32> to vector<8x64xf32>
    %389 = arith.addf %387, %388 : vector<8x64xf32>
    %c0_235 = arith.constant 0 : index
    %c3_236 = arith.constant 3 : index
    %c0_237 = arith.constant 0 : index
    %c0_238 = arith.constant 0 : index
    %390 = vector.load %arg15[%c0_235, %c3_236, %c0_237, %c0_238] : memref<1x4x8x64xf32, #tpu.memory_space<vmem>>, vector<1x1x8x64xf32>
    %391 = vector.shape_cast %390 : vector<1x1x8x64xf32> to vector<8x64xf32>
    %392 = vector.shape_cast %389 : vector<8x64xf32> to vector<1x1x8x64xf32>
    tpu.vector_store %arg15[%c0_235, %c3_236, %c0_237, %c0_238], %392 {strides = array<i32>} : memref<1x4x8x64xf32, #tpu.memory_space<vmem>>, vector<1x1x8x64xf32>,
    return
  }
  func.func @transform_0(%arg0: i32, %arg1: i32) -> (i32, i32, i32, i32) {
    %c4_i32 = arith.constant 4 : i32
    %0 = arith.muli %arg1, %c4_i32 : i32
    %c0_i32 = arith.constant 0 : i32
    %1 = arith.addi %0, %c0_i32 : i32
    %c0_i32_0 = arith.constant 0 : i32
    %c0_i32_1 = arith.constant 0 : i32
    %c0_i32_2 = arith.constant 0 : i32
    return %arg0, %1, %c0_i32_0, %c0_i32_1 : i32, i32, i32, i32
  }
  func.func @transform_1(%arg0: i32, %arg1: i32) -> (i32, i32, i32, i32) {
    %c4_i32 = arith.constant 4 : i32
    %0 = arith.muli %arg1, %c4_i32 : i32
    %c1_i32 = arith.constant 1 : i32
    %1 = arith.addi %0, %c1_i32 : i32
    %c0_i32 = arith.constant 0 : i32
    %c0_i32_0 = arith.constant 0 : i32
    %c0_i32_1 = arith.constant 0 : i32
    return %arg0, %1, %c0_i32, %c0_i32_0 : i32, i32, i32, i32
  }
  func.func @transform_2(%arg0: i32, %arg1: i32) -> (i32, i32, i32, i32) {
    %c4_i32 = arith.constant 4 : i32
    %0 = arith.muli %arg1, %c4_i32 : i32
    %c2_i32 = arith.constant 2 : i32
    %1 = arith.addi %0, %c2_i32 : i32
    %c0_i32 = arith.constant 0 : i32
    %c0_i32_0 = arith.constant 0 : i32
    %c0_i32_1 = arith.constant 0 : i32
    return %arg0, %1, %c0_i32, %c0_i32_0 : i32, i32, i32, i32
  }
  func.func @transform_3(%arg0: i32, %arg1: i32) -> (i32, i32, i32, i32) {
    %c4_i32 = arith.constant 4 : i32
    %0 = arith.muli %arg1, %c4_i32 : i32
    %c3_i32 = arith.constant 3 : i32
    %1 = arith.addi %0, %c3_i32 : i32
    %c0_i32 = arith.constant 0 : i32
    %c0_i32_0 = arith.constant 0 : i32
    %c0_i32_1 = arith.constant 0 : i32
    return %arg0, %1, %c0_i32, %c0_i32_0 : i32, i32, i32, i32
  }
  func.func @transform_4(%arg0: i32, %arg1: i32) -> (i32, i32, i32, i32) {
    %c4_i32 = arith.constant 4 : i32
    %0 = arith.muli %arg1, %c4_i32 : i32
    %c4_i32_0 = arith.constant 4 : i32
    %1 = arith.addi %0, %c4_i32_0 : i32
    %c0_i32 = arith.constant 0 : i32
    %c0_i32_1 = arith.constant 0 : i32
    %c0_i32_2 = arith.constant 0 : i32
    return %arg0, %1, %c0_i32, %c0_i32_1 : i32, i32, i32, i32
  }
  func.func @transform_5(%arg0: i32, %arg1: i32) -> (i32, i32, i32, i32) {
    %c4_i32 = arith.constant 4 : i32
    %0 = arith.muli %arg1, %c4_i32 : i32
    %c5_i32 = arith.constant 5 : i32
    %1 = arith.addi %0, %c5_i32 : i32
    %c0_i32 = arith.constant 0 : i32
    %c0_i32_0 = arith.constant 0 : i32
    %c0_i32_1 = arith.constant 0 : i32
    return %arg0, %1, %c0_i32, %c0_i32_0 : i32, i32, i32, i32
  }
  func.func @transform_6(%arg0: i32, %arg1: i32) -> (i32, i32) {
    %c0_i32 = arith.constant 0 : i32
    %c0_i32_0 = arith.constant 0 : i32
    %c0_i32_1 = arith.constant 0 : i32
    return %c0_i32, %c0_i32_0 : i32, i32
  }
  func.func @transform_7(%arg0: i32, %arg1: i32) -> (i32, i32) {
    %c0_i32 = arith.constant 0 : i32
    %c0_i32_0 = arith.constant 0 : i32
    %c0_i32_1 = arith.constant 0 : i32
    return %c0_i32, %c0_i32_0 : i32, i32
  }
  func.func @transform_8(%arg0: i32, %arg1: i32) -> (i32, i32, i32) {
    %c0_i32 = arith.constant 0 : i32
    %c0_i32_0 = arith.constant 0 : i32
    %c0_i32_1 = arith.constant 0 : i32
    %c0_i32_2 = arith.constant 0 : i32
    return %c0_i32, %c0_i32_0, %c0_i32_1 : i32, i32, i32
  }
  func.func @transform_9(%arg0: i32, %arg1: i32) -> (i32, i32) {
    %c0_i32 = arith.constant 0 : i32
    %c0_i32_0 = arith.constant 0 : i32
    %c0_i32_1 = arith.constant 0 : i32
    return %c0_i32, %c0_i32_0 : i32, i32
  }
  func.func @transform_10(%arg0: i32, %arg1: i32) -> (i32, i32) {
    %c0_i32 = arith.constant 0 : i32
    %c0_i32_0 = arith.constant 0 : i32
    %c0_i32_1 = arith.constant 0 : i32
    return %c0_i32, %c0_i32_0 : i32, i32
  }
  func.func @transform_11(%arg0: i32, %arg1: i32) -> (i32, i32) {
    %c0_i32 = arith.constant 0 : i32
    %c0_i32_0 = arith.constant 0 : i32
    %c0_i32_1 = arith.constant 0 : i32
    return %c0_i32, %c0_i32_0 : i32, i32
  }
  func.func @transform_12(%arg0: i32, %arg1: i32) -> (i32, i32, i32, i32) {
    %c0_i32 = arith.constant 0 : i32
    %c0_i32_0 = arith.constant 0 : i32
    %c0_i32_1 = arith.constant 0 : i32
    return %arg0, %arg1, %c0_i32, %c0_i32_0 : i32, i32, i32, i32
  }
  func.func @transform_13(%arg0: i32, %arg1: i32) -> (i32, i32, i32, i32) {
    %c0_i32 = arith.constant 0 : i32
    %c0_i32_0 = arith.constant 0 : i32
    %c0_i32_1 = arith.constant 0 : i32
    return %arg0, %arg1, %c0_i32, %c0_i32_0 : i32, i32, i32, i32
  }
}

module attributes {stable_mosaic.version = 11 : i64} {
  func.func @_upsample_add_kernel(%arg0: i32, %arg1: memref<16x2x512xf32, #tpu.memory_space<vmem>>, %arg2: memref<16x1x512xf32, #tpu.memory_space<vmem>>, %arg3: memref<16x2x512xf32, #tpu.memory_space<vmem>>) attributes {dimension_semantics = [#tpu.dimension_semantics<parallel>], iteration_bounds = array<i64: 1>, scalar_prefetch = 0 : i64, scratch_operands = 0 : i64, tpu.core_type = #tpu.core_type<tc>, window_params = [{transform_indices = @transform_0, window_bounds = array<i64: 16, 2, 512>}, {transform_indices = @transform_1, window_bounds = array<i64: 16, 1, 512>}, {transform_indices = @transform_2, window_bounds = array<i64: 16, 2, 512>}]} {
    %c0 = arith.constant 0 : index
    %c0_0 = arith.constant 0 : index
    %c0_1 = arith.constant 0 : index
    %0 = vector.load %arg1[%c0, %c0_0, %c0_1] : memref<16x2x512xf32, #tpu.memory_space<vmem>>, vector<16x2x512xf32>
    %c0_2 = arith.constant 0 : index
    %c0_3 = arith.constant 0 : index
    %c0_4 = arith.constant 0 : index
    %1 = vector.load %arg2[%c0_2, %c0_3, %c0_4] : memref<16x1x512xf32, #tpu.memory_space<vmem>>, vector<16x1x512xf32>
    %2 = vector.broadcast %1 : vector<16x1x512xf32> to vector<16x2x512xf32>
    %3 = arith.addf %0, %2 : vector<16x2x512xf32>
    %c0_5 = arith.constant 0 : index
    %c0_6 = arith.constant 0 : index
    %c0_7 = arith.constant 0 : index
    %4 = vector.load %arg3[%c0_5, %c0_6, %c0_7] : memref<16x2x512xf32, #tpu.memory_space<vmem>>, vector<16x2x512xf32>
    tpu.vector_store %arg3[%c0_5, %c0_6, %c0_7], %3 {strides = array<i32>} : memref<16x2x512xf32, #tpu.memory_space<vmem>>, vector<16x2x512xf32>,
    return
  }
  func.func @transform_0(%arg0: i32) -> (i32, i32, i32) {
    %c0_i32 = arith.constant 0 : i32
    %c0_i32_0 = arith.constant 0 : i32
    %c0_i32_1 = arith.constant 0 : i32
    return %arg0, %c0_i32, %c0_i32_0 : i32, i32, i32
  }
  func.func @transform_1(%arg0: i32) -> (i32, i32, i32) {
    %c0_i32 = arith.constant 0 : i32
    %c0_i32_0 = arith.constant 0 : i32
    %c0_i32_1 = arith.constant 0 : i32
    return %arg0, %c0_i32, %c0_i32_0 : i32, i32, i32
  }
  func.func @transform_2(%arg0: i32) -> (i32, i32, i32) {
    %c0_i32 = arith.constant 0 : i32
    %c0_i32_0 = arith.constant 0 : i32
    %c0_i32_1 = arith.constant 0 : i32
    return %arg0, %c0_i32, %c0_i32_0 : i32, i32, i32
  }
}

</mosaic_0001>

<bundles_post_ra>
// kernel: frru_forward.4
= control target key start
LH: loop header
LB: loop body
LE: loop exit
PB: predicated region body
PF: predicated region fallthrough
CT: control target
= control target key end

     0   :  { %s409_s29 = smov 4   ;;  %vm18_vm0 = vcmask 286720   ;;  %vm216_vm1 = vcmask 31744   ;;  %vm233_vm2 = vcmask 293888   ;;  %s826_s1 = inlined_call_operand.vmem [shape: f32[4,128,32], index: 1, kind: input, shape index: {}]   ;;  %s827_s3 = inlined_call_operand.vmem [shape: f32[1,36], index: 3, kind: output, shape index: {1}]   ;;  %s828_s4 = inlined_call_operand.vmem [shape: f32[1,36], index: 4, kind: output, shape index: {2}]   ;;  %s829_s0 = inlined_call_operand.vmem [shape: f32[128,4], index: 0, kind: input, shape index: {}]   ;;  %s830_s2 = inlined_call_operand.vmem [shape: f32[128,36], index: 2, kind: output, shape index: {0}]  }
   0x1   :  { %v37_v0 = vld [vmem:[%s826_s1] sm:$0xff]  ;;  %v39_v4 = vld [vmem:[%s826_s1 + $0x10] sm:$0xff]  ;;  %v38_v9 = vld [vmem:[%s826_s1 + $0x8] sm:$0xff] }
   0x2   :  { %v359_v1 = vld [vmem:[%s826_s1 + $0x80] sm:$0xff]  ;;  %v361_v5 = vld [vmem:[%s826_s1 + $0x90] sm:$0xff]  ;;  %v360_v12 = vld [vmem:[%s826_s1 + $0x88] sm:$0xff] }
   0x3   :  { %v375_v2 = vld [vmem:[%s826_s1 + $0x100] sm:$0xff]  ;;  %v70_v3 = vmax.f32 %v37_v0, %v359_v1  ;;  %v72_v7 = vmax.f32 %v39_v4, %v361_v5  ;;  %v377_v8 = vld [vmem:[%s826_s1 + $0x110] sm:$0xff]  ;;  %v376_v13 = vld [vmem:[%s826_s1 + $0x108] sm:$0xff]  ;;  %v71_v15 = vmax.f32 %v38_v9, %v360_v12 }
   0x4   :  { %v391_v6 = vld [vmem:[%s826_s1 + $0x180] sm:$0xff]  ;;  %v393_v11 = vld [vmem:[%s826_s1 + $0x190] sm:$0xff]  ;;  %v40_v16 = vld [vmem:[%s826_s1 + $0x18] sm:$0xff] }
   0x5   :  { %v103_v10 = vmax.f32 %v70_v3, %v375_v2  ;;  %v105_v14 = vmax.f32 %v72_v7, %v377_v8  ;;  %v362_v17 = vld [vmem:[%s826_s1 + $0x98] sm:$0xff]  ;;  %v392_v20 = vld [vmem:[%s826_s1 + $0x188] sm:$0xff]  ;;  %v41_v22 = vld [vmem:[%s826_s1 + $0x20] sm:$0xff]  ;;  %v104_v25 = vmax.f32 %v71_v15, %v376_v13 }
   0x6   :  { %v378_v18 = vld [vmem:[%s826_s1 + $0x118] sm:$0xff]  ;;  %v73_v21 = vmax.f32 %v40_v16, %v362_v17  ;;  %v363_v23 = vld [vmem:[%s826_s1 + $0xa0] sm:$0xff]  ;;  %v42_v29 = vld [vmem:[%s826_s1 + $0x28] sm:$0xff] }
   0x7   :  { %v136_v19 = vmax.f32 %v103_v10, %v391_v6  ;;  %v138_v24 = vmax.f32 %v105_v14, %v393_v11  ;;  %v394_v26 = vld [vmem:[%s826_s1 + $0x198] sm:$0xff]  ;;  %v74_v27 = vmax.f32 %v41_v22, %v363_v23  ;;  %v379_v28 = vld [vmem:[%s826_s1 + $0x120] sm:$0xff]  ;;  %v364_v32 = vld [vmem:[%s826_s1 + $0xa8] sm:$0xff]  ;;  %v137_v34 = vmax.f32 %v104_v25, %v392_v20 }
   0x8   :  { %v106_v30 = vmax.f32 %v73_v21, %v378_v18  ;;  %v395_v31 = vld [vmem:[%s826_s1 + $0x1a0] sm:$0xff]  ;;  %v380_v33 = vld [vmem:[%s826_s1 + $0x128] sm:$0xff]  ;;  %v75_v36 = vmax.f32 %v42_v29, %v364_v32  ;;  %v43_v37 = vld [vmem:[%s826_s1 + $0x30] sm:$0xff] }
   0x9   :  { %168 = vrot.lane.b32.xlu0 %v136_v19, %s409_s29  ;;  %172 = vrot.lane.b32.xlu1 %v138_v24, %s409_s29  ;;  %v107_v35 = vmax.f32 %v74_v27, %v379_v28  ;;  %v365_v38 = vld [vmem:[%s826_s1 + $0xb0] sm:$0xff]  ;;  %v396_v41 = vld [vmem:[%s826_s1 + $0x1a8] sm:$0xff] }
   0xa   :  { %v381_v39 = vld [vmem:[%s826_s1 + $0x130] sm:$0xff]  ;;  %v139_v40 = vmax.f32 %v106_v30, %v394_v26  ;;  %v76_v42 = vmax.f32 %v43_v37, %v365_v38  ;;  %v44_v43 = vld [vmem:[%s826_s1 + $0x38] sm:$0xff]  ;;  %v108_v45 = vmax.f32 %v75_v36, %v380_v33  ;;  %v45_v48 = vld [vmem:[%s826_s1 + $0x40] sm:$0xff] }
   0xb   :  { %v366_v44 = vld [vmem:[%s826_s1 + $0xb8] sm:$0xff]  ;;  %v140_v49 = vmax.f32 %v107_v35, %v395_v31  ;;  %v397_v51 = vld [vmem:[%s826_s1 + $0x1b0] sm:$0xff]  ;;  %v367_v53 = vld [vmem:[%s826_s1 + $0xc0] sm:$0xff] }
   0xc   :  { %v77_v46 = vmax.f32 %v44_v43, %v366_v44  ;;  %v382_v47 = vld [vmem:[%s826_s1 + $0x138] sm:$0xff]  ;;  %v109_v50 = vmax.f32 %v76_v42, %v381_v39  ;;  %v141_v54 = vmax.f32 %v108_v45, %v396_v41  ;;  %v78_v56 = vmax.f32 %v45_v48, %v367_v53  ;;  %v383_v57 = vld [vmem:[%s826_s1 + $0x140] sm:$0xff]  ;;  %v46_v58 = vld [vmem:[%s826_s1 + $0x48] sm:$0xff] }
   0xd   :  { %170 = vrot.lane.b32.xlu0 %v137_v34, %s409_s29  ;;  %v398_v52 = vld [vmem:[%s826_s1 + $0x1b8] sm:$0xff]  ;;  %174 = vrot.lane.b32.xlu1 %v139_v40, %s409_s29  ;;  %v368_v59 = vld [vmem:[%s826_s1 + $0xc8] sm:$0xff] }
   0xe   :  { %v110_v55 = vmax.f32 %v77_v46, %v382_v47  ;;  %v79_v60 = vmax.f32 %v46_v58, %v368_v59  ;;  %v384_v61 = vld [vmem:[%s826_s1 + $0x148] sm:$0xff]  ;;  %v47_v62 = vld [vmem:[%s826_s1 + $0x50] sm:$0xff]  ;;  %v48_v0 = vld [vmem:[%s826_s1 + $0x58] sm:$0xff]  ;;  %v142_v1 = vmax.f32 %v109_v50, %v397_v51  ;;  %v111_v2 = vmax.f32 %v78_v56, %v383_v57 }
   0xf   :  { %v369_v63 = vld [vmem:[%s826_s1 + $0xd0] sm:$0xff]  ;;  %v399_v3 = vld [vmem:[%s826_s1 + $0x1c0] sm:$0xff]  ;;  %v400_v4 = vld [vmem:[%s826_s1 + $0x1c8] sm:$0xff]  ;;  %v410_v46 = vmov 0.0  }
  0x10   :  { %v80_v5 = vmax.f32 %v47_v62, %v369_v63  ;;  %v370_v6 = vld [vmem:[%s826_s1 + $0xd8] sm:$0xff]  ;;  %v143_v7 = vmax.f32 %v110_v55, %v398_v52  ;;  %v112_v8 = vmax.f32 %v79_v60, %v384_v61  ;;  %v385_v9 = vld [vmem:[%s826_s1 + $0x150] sm:$0xff]  ;;  %v49_v11 = vld [vmem:[%s826_s1 + $0x60] sm:$0xff]  ;;  %v144_v16 = vmax.f32 %v111_v2, %v399_v3  ;;  %19 = vst.msk [vmem:[%s827_s3] sm:$0x1] %vm18_vm0, %v410_v46 }
  0x11   :  { %176 = vrot.lane.b32.xlu0 %v140_v49, %s409_s29  ;;  %178 = vrot.lane.b32.xlu1 %v141_v54, %s409_s29  ;;  %v81_v10 = vmax.f32 %v48_v0, %v370_v6  ;;  %v371_v12 = vld [vmem:[%s826_s1 + $0xe0] sm:$0xff]  ;;  %v386_v13 = vld [vmem:[%s826_s1 + $0x158] sm:$0xff] }
  0x12   :  { %v50_v14 = vld [vmem:[%s826_s1 + $0x68] sm:$0xff]  ;;  %v113_v17 = vmax.f32 %v80_v5, %v385_v9  ;;  %v401_v18 = vld [vmem:[%s826_s1 + $0x1d0] sm:$0xff]  ;;  %v402_v19 = vld [vmem:[%s826_s1 + $0x1d8] sm:$0xff]  ;;  %v82_v20 = vmax.f32 %v49_v11, %v371_v12  ;;  %v145_v21 = vmax.f32 %v112_v8, %v400_v4  ;;  %20 = vst.msk [vmem:[%s828_s4] sm:$0x1] %vm18_vm0, %v410_v46 }
  0x13   :  { %v372_v15 = vld [vmem:[%s826_s1 + $0xe8] sm:$0xff]  ;;  %v114_v22 = vmax.f32 %v81_v10, %v386_v13  ;;  %v387_v23 = vld [vmem:[%s826_s1 + $0x160] sm:$0xff]  ;;  %v51_v25 = vld [vmem:[%s826_s1 + $0x70] sm:$0xff] }
  0x14   :  { %v83_v24 = vmax.f32 %v50_v14, %v372_v15  ;;  %v373_v26 = vld [vmem:[%s826_s1 + $0xf0] sm:$0xff]  ;;  %v388_v27 = vld [vmem:[%s826_s1 + $0x168] sm:$0xff]  ;;  %v52_v28 = vld [vmem:[%s826_s1 + $0x78] sm:$0xff]  ;;  %v146_v30 = vmax.f32 %v113_v17, %v401_v18  ;;  %v115_v31 = vmax.f32 %v82_v20, %v387_v23 }
  0x15   :  { %180 = vrot.lane.b32.xlu0 %v142_v1, %s409_s29  ;;  %182 = vrot.lane.b32.xlu1 %v143_v7, %s409_s29  ;;  %v374_v29 = vld [vmem:[%s826_s1 + $0xf8] sm:$0xff]  ;;  %v84_v32 = vmax.f32 %v51_v25, %v373_v26  ;;  %v147_v33 = vmax.f32 %v114_v22, %v402_v19  ;;  %v403_v34 = vld [vmem:[%s826_s1 + $0x1e0] sm:$0xff] }
  0x16   :  { %v116_v35 = vmax.f32 %v83_v24, %v388_v27  ;;  %v389_v36 = vld [vmem:[%s826_s1 + $0x170] sm:$0xff]  ;;  %v85_v37 = vmax.f32 %v52_v28, %v374_v29  ;;  %v404_v38 = vld [vmem:[%s826_s1 + $0x1e8] sm:$0xff]  ;;  %v390_v39 = vld [vmem:[%s826_s1 + $0x178] sm:$0xff]  ;;  %v148_v40 = vmax.f32 %v115_v31, %v403_v34 }
  0x17   :  { %v117_v41 = vmax.f32 %v84_v32, %v389_v36  ;;  %v405_v43 = vld [vmem:[%s826_s1 + $0x1f0] sm:$0xff]  ;;  %v406_v45 = vld [vmem:[%s826_s1 + $0x1f8] sm:$0xff]  ;;  %v21_v49 = vld [vmem:[%s829_s0] sm:$0xff] }
  0x18   :  { %v149_v42 = vmax.f32 %v116_v35, %v404_v38  ;;  %v118_v44 = vmax.f32 %v85_v37, %v390_v39  ;;  %v23_v50 = vld [vmem:[%s829_s0 + $0x10] sm:$0xff]  ;;  %v22_v55 = vld [vmem:[%s829_s0 + $0x8] sm:$0xff]  ;;  %v24_v56 = vld [vmem:[%s829_s0 + $0x18] sm:$0xff] }
  0x19   :  { %184 = vrot.lane.b32.xlu0 %v144_v16, %s409_s29  ;;  %186 = vrot.lane.b32.xlu1 %v145_v21, %s409_s29  ;;  %v150_v47 = vmax.f32 %v117_v41, %v405_v43  ;;  %v25_v2 = vld [vmem:[%s829_s0 + $0x20] sm:$0xff]  ;;  %v26_v5 = vld [vmem:[%s829_s0 + $0x28] sm:$0xff] }
  0x1a   :  { %v151_v48 = vmax.f32 %v118_v44, %v406_v45  ;;  %v27_v20 = vld [vmem:[%s829_s0 + $0x30] sm:$0xff]  ;;  %v28_v24 = vld [vmem:[%s829_s0 + $0x38] sm:$0xff]  ;;  %v29_v36 = vld [vmem:[%s829_s0 + $0x40] sm:$0xff] }
  0x1d   :  { %188 = vrot.lane.b32.xlu0 %v146_v30, %s409_s29  ;;  %190 = vrot.lane.b32.xlu1 %v147_v33, %s409_s29 }
  0x21   :  { %192 = vrot.lane.b32.xlu0 %v148_v40, %s409_s29  ;;  %194 = vrot.lane.b32.xlu1 %v149_v42, %s409_s29  ;;  %v30_v40 = vld [vmem:[%s829_s0 + $0x48] sm:$0xff] }
  0x25   :  { %196 = vrot.lane.b32.xlu0 %v150_v47, %s409_s29  ;;  %198 = vrot.lane.b32.xlu1 %v151_v48, %s409_s29 }
  0x7b   :  { %v169_v51 = vpop.permute.xlu0 %168  ;;  %v173_v53 = vpop.permute.xlu1 %172 }
  0x7c   :  { %v217_v52 = vsel %vm216_vm1, %v21_v49, %v169_v51  ;;  %v219_v54 = vsel %vm216_vm1, %v23_v50, %v173_v53 }
  0x7d   :  { %234 = vst.msk [vmem:[%s830_s2] sm:$0xff] %vm233_vm2, %v217_v52  ;;  %236 = vst.msk [vmem:[%s830_s2 + $0x10] sm:$0xff] %vm233_vm2, %v219_v54  ;;  %v292_v57 = vmul.f32 %v217_v52, %v217_v52  ;;  %v294_v59 = vmul.f32 %v219_v54, %v219_v54  ;;  %v251_v62 = vsel %vm233_vm2, %v217_v52, 0.0  ;;  %v254_v7 = vsel %vm233_vm2, %v219_v54, 0.0  ;;  %v31_v52 = vld [vmem:[%s829_s0 + $0x50] sm:$0xff] }
  0x7f   :  { %v171_v58 = vpop.permute.xlu0 %170  ;;  %v175_v61 = vpop.permute.xlu1 %174  ;;  %v308_v6 = vsel %vm233_vm2, %v292_v57, 0.0  ;;  %v311_v11 = vsel %vm233_vm2, %v294_v59, 0.0 }
  0x80   :  { %v218_v60 = vsel %vm216_vm1, %v22_v55, %v171_v58  ;;  %v220_v1 = vsel %vm216_vm1, %v24_v56, %v175_v61  ;;  %v32_v56 = vld [vmem:[%s829_s0 + $0x58] sm:$0xff] }
  0x81   :  { %235 = vst.msk [vmem:[%s830_s2 + $0x8] sm:$0xff] %vm233_vm2, %v218_v60  ;;  %v252_v63 = vsel %vm233_vm2, %v218_v60, 0.0  ;;  %v293_v0 = vmul.f32 %v218_v60, %v218_v60  ;;  %237 = vst.msk [vmem:[%s830_s2 + $0x18] sm:$0xff] %vm233_vm2, %v220_v1  ;;  %v295_v4 = vmul.f32 %v220_v1, %v220_v1  ;;  %v256_v9 = vsel %vm233_vm2, %v220_v1, 0.0 }
  0x82   :  { %v253_v3 = vadd.f32 %v252_v63, %v251_v62 }
  0x83   :  { %v309_v8 = vsel %vm233_vm2, %v293_v0, 0.0  ;;  %v177_v10 = vpop.permute.xlu0 %176  ;;  %v179_v15 = vpop.permute.xlu1 %178  ;;  %v313_v16 = vsel %vm233_vm2, %v295_v4, 0.0  ;;  %v33_v4 = vld [vmem:[%s829_s0 + $0x60] sm:$0xff] }
  0x84   :  { %v310_v12 = vadd.f32 %v309_v8, %v308_v6  ;;  %v255_v13 = vadd.f32 %v254_v7, %v253_v3  ;;  %v221_v14 = vsel %vm216_vm1, %v25_v2, %v177_v10  ;;  %v222_v19 = vsel %vm216_vm1, %v26_v5, %v179_v15  ;;  %v34_v8 = vld [vmem:[%s829_s0 + $0x68] sm:$0xff] }
  0x85   :  { %238 = vst.msk [vmem:[%s830_s2 + $0x20] sm:$0xff] %vm233_vm2, %v221_v14  ;;  %v258_v17 = vsel %vm233_vm2, %v221_v14, 0.0  ;;  %v296_v18 = vmul.f32 %v221_v14, %v221_v14  ;;  %239 = vst.msk [vmem:[%s830_s2 + $0x28] sm:$0xff] %vm233_vm2, %v222_v19  ;;  %v297_v23 = vmul.f32 %v222_v19, %v222_v19  ;;  %v260_v26 = vsel %vm233_vm2, %v222_v19, 0.0 }
  0x86   :  { %v257_v21 = vadd.f32 %v256_v9, %v255_v13  ;;  %v312_v22 = vadd.f32 %v311_v11, %v310_v12 }
  0x87   :  { %v315_v25 = vsel %vm233_vm2, %v296_v18, 0.0  ;;  %v181_v27 = vpop.permute.xlu0 %180  ;;  %v183_v31 = vpop.permute.xlu1 %182  ;;  %v317_v32 = vsel %vm233_vm2, %v297_v23, 0.0 }
  0x88   :  { %v314_v28 = vadd.f32 %v313_v16, %v312_v22  ;;  %v259_v29 = vadd.f32 %v258_v17, %v257_v21  ;;  %v223_v30 = vsel %vm216_vm1, %v27_v20, %v181_v27  ;;  %v224_v35 = vsel %vm216_vm1, %v28_v24, %v183_v31  ;;  %v35_v20 = vld [vmem:[%s829_s0 + $0x70] sm:$0xff]  ;;  %v36_v24 = vld [vmem:[%s829_s0 + $0x78] sm:$0xff] }
  0x89   :  { %240 = vst.msk [vmem:[%s830_s2 + $0x30] sm:$0xff] %vm233_vm2, %v223_v30  ;;  %v262_v33 = vsel %vm233_vm2, %v223_v30, 0.0  ;;  %v298_v34 = vmul.f32 %v223_v30, %v223_v30  ;;  %241 = vst.msk [vmem:[%s830_s2 + $0x38] sm:$0xff] %vm233_vm2, %v224_v35  ;;  %v299_v39 = vmul.f32 %v224_v35, %v224_v35  ;;  %v264_v42 = vsel %vm233_vm2, %v224_v35, 0.0 }
  0x8a   :  { %v316_v37 = vadd.f32 %v315_v25, %v314_v28  ;;  %v261_v38 = vadd.f32 %v260_v26, %v259_v29 }
  0x8b   :  { %v319_v41 = vsel %vm233_vm2, %v298_v34, 0.0  ;;  %v185_v43 = vpop.permute.xlu0 %184  ;;  %v187_v47 = vpop.permute.xlu1 %186  ;;  %v321_v48 = vsel %vm233_vm2, %v299_v39, 0.0 }
  0x8c   :  { %v318_v44 = vadd.f32 %v317_v32, %v316_v37  ;;  %v263_v45 = vadd.f32 %v262_v33, %v261_v38  ;;  %v225_v46 = vsel %vm216_vm1, %v29_v36, %v185_v43  ;;  %v226_v51 = vsel %vm216_vm1, %v30_v40, %v187_v47 }
  0x8d   :  { %242 = vst.msk [vmem:[%s830_s2 + $0x40] sm:$0xff] %vm233_vm2, %v225_v46  ;;  %v266_v49 = vsel %vm233_vm2, %v225_v46, 0.0  ;;  %v300_v50 = vmul.f32 %v225_v46, %v225_v46  ;;  %243 = vst.msk [vmem:[%s830_s2 + $0x48] sm:$0xff] %vm233_vm2, %v226_v51  ;;  %v301_v55 = vmul.f32 %v226_v51, %v226_v51  ;;  %v268_v58 = vsel %vm233_vm2, %v226_v51, 0.0 }
  0x8e   :  { %v320_v53 = vadd.f32 %v319_v41, %v318_v44  ;;  %v265_v54 = vadd.f32 %v264_v42, %v263_v45 }
  0x8f   :  { %v323_v57 = vsel %vm233_vm2, %v300_v50, 0.0  ;;  %v189_v59 = vpop.permute.xlu0 %188  ;;  %v191_v63 = vpop.permute.xlu1 %190  ;;  %v325_v0 = vsel %vm233_vm2, %v301_v55, 0.0 }
  0x90   :  { %v322_v60 = vadd.f32 %v321_v48, %v320_v53  ;;  %v267_v61 = vadd.f32 %v266_v49, %v265_v54  ;;  %v227_v62 = vsel %vm216_vm1, %v31_v52, %v189_v59  ;;  %v228_v3 = vsel %vm216_vm1, %v32_v56, %v191_v63  ;;  %v250_v56 = vld [vmem:[%s827_s3] sm:$0x1] }
  0x91   :  { %244 = vst.msk [vmem:[%s830_s2 + $0x50] sm:$0xff] %vm233_vm2, %v227_v62  ;;  %v270_v1 = vsel %vm233_vm2, %v227_v62, 0.0  ;;  %v302_v2 = vmul.f32 %v227_v62, %v227_v62  ;;  %245 = vst.msk [vmem:[%s830_s2 + $0x58] sm:$0xff] %vm233_vm2, %v228_v3  ;;  %v303_v7 = vmul.f32 %v228_v3, %v228_v3  ;;  %v272_v10 = vsel %vm233_vm2, %v228_v3, 0.0  ;;  %v291_v59 = vld [vmem:[%s828_s4] sm:$0x1] }
  0x92   :  { %v324_v5 = vadd.f32 %v323_v57, %v322_v60  ;;  %v269_v6 = vadd.f32 %v268_v58, %v267_v61 }
  0x93   :  { %v327_v9 = vsel %vm233_vm2, %v302_v2, 0.0  ;;  %v193_v11 = vpop.permute.xlu0 %192  ;;  %v195_v15 = vpop.permute.xlu1 %194  ;;  %v329_v16 = vsel %vm233_vm2, %v303_v7, 0.0 }
  0x94   :  { %v326_v12 = vadd.f32 %v325_v0, %v324_v5  ;;  %v271_v13 = vadd.f32 %v270_v1, %v269_v6  ;;  %v229_v14 = vsel %vm216_vm1, %v33_v4, %v193_v11  ;;  %v230_v19 = vsel %vm216_vm1, %v34_v8, %v195_v15 }
  0x95   :  { %246 = vst.msk [vmem:[%s830_s2 + $0x60] sm:$0xff] %vm233_vm2, %v229_v14  ;;  %v274_v17 = vsel %vm233_vm2, %v229_v14, 0.0  ;;  %v304_v18 = vmul.f32 %v229_v14, %v229_v14  ;;  %247 = vst.msk [vmem:[%s830_s2 + $0x68] sm:$0xff] %vm233_vm2, %v230_v19  ;;  %v305_v23 = vmul.f32 %v230_v19, %v230_v19  ;;  %v276_v26 = vsel %vm233_vm2, %v230_v19, 0.0 }
  0x96   :  { %v328_v21 = vadd.f32 %v327_v9, %v326_v12  ;;  %v273_v22 = vadd.f32 %v272_v10, %v271_v13 }
  0x97   :  { %v331_v25 = vsel %vm233_vm2, %v304_v18, 0.0  ;;  %v197_v27 = vpop.permute.xlu0 %196  ;;  %v199_v31 = vpop.permute.xlu1 %198  ;;  %v333_v32 = vsel %vm233_vm2, %v305_v23, 0.0 }
  0x98   :  { %v330_v28 = vadd.f32 %v329_v16, %v328_v21  ;;  %v275_v29 = vadd.f32 %v274_v17, %v273_v22  ;;  %v231_v30 = vsel %vm216_vm1, %v35_v20, %v197_v27  ;;  %v232_v35 = vsel %vm216_vm1, %v36_v24, %v199_v31 }
  0x99   :  { %248 = vst.msk [vmem:[%s830_s2 + $0x70] sm:$0xff] %vm233_vm2, %v231_v30  ;;  %v278_v33 = vsel %vm233_vm2, %v231_v30, 0.0  ;;  %v306_v34 = vmul.f32 %v231_v30, %v231_v30  ;;  %249 = vst.msk [vmem:[%s830_s2 + $0x78] sm:$0xff] %vm233_vm2, %v232_v35  ;;  %v307_v38 = vmul.f32 %v232_v35, %v232_v35  ;;  %v280_v40 = vsel %vm233_vm2, %v232_v35, 0.0 }
  0x9a   :  { %v332_v36 = vadd.f32 %v331_v25, %v330_v28  ;;  %v277_v37 = vadd.f32 %v276_v26, %v275_v29 }
  0x9b   :  { %v335_v39 = vsel %vm233_vm2, %v306_v34, 0.0  ;;  %v337_v43 = vsel %vm233_vm2, %v307_v38, 0.0 }
  0x9c   :  { %v334_v41 = vadd.f32 %v333_v32, %v332_v36  ;;  %v279_v42 = vadd.f32 %v278_v33, %v277_v37 }
  0x9e   :  { %v336_v44 = vadd.f32 %v335_v39, %v334_v41  ;;  %v281_v45 = vadd.f32 %v280_v40, %v279_v42 }
  0xa0   :  { %v282_v46 = vrot.slane %v281_v45, 4  ;;  %v338_v47 = vadd.f32 %v337_v43, %v336_v44 }
  0xa2   :  { %v283_v48 = vadd.f32 %v282_v46, %v281_v45  ;;  %v339_v49 = vrot.slane %v338_v47, 4 }
  0xa4   :  { %v284_v50 = vrot.slane %v283_v48, 2  ;;  %v340_v51 = vadd.f32 %v339_v49, %v338_v47 }
  0xa6   :  { %v285_v52 = vadd.f32 %v284_v50, %v283_v48  ;;  %v341_v53 = vrot.slane %v340_v51, 2 }
  0xa8   :  { %v286_v54 = vrot.slane %v285_v52, 1  ;;  %v342_v55 = vadd.f32 %v341_v53, %v340_v51 }
  0xaa   :  { %v287_v57 = vadd.f32 %v286_v54, %v285_v52  ;;  %v343_v58 = vrot.slane %v342_v55, 1 }
  0xac   :  { %v288_v60 = vadd.f32 %v287_v57, %v250_v56  ;;  %v344_v61 = vadd.f32 %v343_v58, %v342_v55 }
  0xae   :  { %290 = vst.msk [vmem:[%s827_s3] sm:$0x1] %vm18_vm0, %v288_v60  ;;  %v345_v62 = vadd.f32 %v344_v61, %v291_v59 }
  0xb0   :  { %346 = vst.msk [vmem:[%s828_s4] sm:$0x1] %vm18_vm0, %v345_v62 }

// kernel: frru_forward.7
= control target key start
LH: loop header
LB: loop body
LE: loop exit
PB: predicated region body
PF: predicated region fallthrough
CT: control target
= control target key end

     0   :  { %v59_v0 = vlaneseq  ;;  %v640_v1 = vmov 1983009808   ;;  %s906_s1 = inlined_call_operand.vmem [shape: f32[16,1,512], index: 1, kind: input, shape index: {}]   ;;  %s907_s0 = inlined_call_operand.vmem [shape: f32[16,2,512], index: 0, kind: input, shape index: {}]   ;;  %s908_s2 = inlined_call_operand.vmem [shape: f32[16,2,512], index: 2, kind: output, shape index: {}]  }
   0x1   :  { %v318_v2 = vunpack.c.l.s4 %v640_v1  ;;  %v27_v4 = vld [vmem:[%s906_s1] sm:$0xf]  ;;  %v28_v10 = vld [vmem:[%s906_s1 + $0x4] sm:$0xf]  ;;  %v29_v12 = vld [vmem:[%s906_s1 + $0x8] sm:$0xf] }
   0x2   :  { %v60_v3 = vshrl.u32 %v59_v0, 7  ;;  %v30_v21 = vld [vmem:[%s906_s1 + $0xc] sm:$0xf]  ;;  %v31_v34 = vld [vmem:[%s906_s1 + $0x10] sm:$0xf]  ;;  %v11_v35 = vld [vmem:[%s907_s0] sm:$0xff] }
   0x3   :  { %v319_v5 = vunpack.c.0.s8 %v318_v2  ;;  %v12_v41 = vld [vmem:[%s907_s0 + $0x8] sm:$0xff]  ;;  %v32_v49 = vld [vmem:[%s906_s1 + $0x14] sm:$0xf]  ;;  %v33_v59 = vld [vmem:[%s906_s1 + $0x18] sm:$0xf] }
   0x4   :  { %v659_v6 = vsub.s32 0, %v60_v3  ;;  %v661_v7 = vsub.s32 1, %v60_v3  ;;  %v663_v8 = vsub.s32 2, %v60_v3  ;;  %v665_v9 = vsub.s32 3, %v60_v3  ;;  %v13_v51 = vld [vmem:[%s907_s0 + $0x10] sm:$0xff]  ;;  %v14_v1 = vld [vmem:[%s907_s0 + $0x18] sm:$0xff] }
   0x5   :  { %v670_v11 = vsub.s32 %v319_v5, %v60_v3  ;;  %v34_v5 = vld [vmem:[%s906_s1 + $0x1c] sm:$0xf] }
   0x6   :  { %v62_v13 = vrot.slane %v27_v4, %v659_v6  ;;  %v66_v14 = vrot.slane %v27_v4, %v661_v7  ;;  %v70_v15 = vrot.slane %v27_v4, %v663_v8  ;;  %v74_v16 = vrot.slane %v27_v4, %v665_v9 }
   0x7   :  { %v78_v17 = vrot.slane %v28_v10, %v659_v6  ;;  %v82_v18 = vrot.slane %v28_v10, %v661_v7  ;;  %v86_v19 = vrot.slane %v28_v10, %v663_v8  ;;  %v90_v20 = vrot.slane %v28_v10, %v665_v9 }
   0x8   :  { %v315_v22 = vcombine.low %v62_v13, %v66_v14  ;;  %v316_v23 = vcombine.low %v70_v15, %v74_v16  ;;  %v94_v24 = vrot.slane %v29_v12, %v659_v6  ;;  %v98_v25 = vrot.slane %v29_v12, %v661_v7 }
   0x9   :  { %v332_v26 = vcombine.low %v78_v17, %v82_v18  ;;  %v333_v27 = vcombine.low %v86_v19, %v90_v20  ;;  %v102_v28 = vrot.slane %v29_v12, %v663_v8  ;;  %v106_v29 = vrot.slane %v29_v12, %v665_v9  ;;  %v35_v19 = vld [vmem:[%s906_s1 + $0x20] sm:$0xf] }
   0xa   :  { %v323_v30 = vrot.slane %v315_v22, %v670_v11  ;;  %v330_v31 = vrot.slane %v316_v23, %v670_v11  ;;  %v349_v32 = vcombine.low %v94_v24, %v98_v25  ;;  %v110_v33 = vrot.slane %v30_v21, %v659_v6 }
   0xb   :  { %v340_v36 = vrot.slane %v332_v26, %v670_v11  ;;  %v347_v37 = vrot.slane %v333_v27, %v670_v11  ;;  %v350_v38 = vcombine.low %v102_v28, %v106_v29  ;;  %v114_v39 = vrot.slane %v30_v21, %v661_v7  ;;  %v16_v29 = vld [vmem:[%s907_s0 + $0x28] sm:$0xff] }
   0xc   :  { %v331_v40 = vcombine.low %v323_v30, %v330_v31  ;;  %v357_v42 = vrot.slane %v349_v32, %v670_v11  ;;  %v118_v43 = vrot.slane %v30_v21, %v663_v8  ;;  %v122_v44 = vrot.slane %v30_v21, %v665_v9  ;;  %v15_v21 = vld [vmem:[%s907_s0 + $0x20] sm:$0xff] }
   0xd   :  { %v348_v45 = vcombine.low %v340_v36, %v347_v37  ;;  %v364_v46 = vrot.slane %v350_v38, %v670_v11  ;;  %v366_v47 = vcombine.low %v110_v33, %v114_v39  ;;  %v126_v48 = vrot.slane %v31_v34, %v659_v6 }
   0xe   :  { %v603_v50 = vadd.f32 %v331_v40, %v11_v35  ;;  %v367_v52 = vcombine.low %v118_v43, %v122_v44  ;;  %v130_v53 = vrot.slane %v31_v34, %v661_v7  ;;  %v134_v54 = vrot.slane %v31_v34, %v663_v8  ;;  %v37_v43 = vld [vmem:[%s906_s1 + $0x28] sm:$0xf] }
   0xf   :  { %v604_v55 = vadd.f32 %v348_v45, %v12_v41  ;;  %v365_v56 = vcombine.low %v357_v42, %v364_v46  ;;  %v374_v57 = vrot.slane %v366_v47, %v670_v11  ;;  %v138_v58 = vrot.slane %v31_v34, %v665_v9  ;;  %v36_v34 = vld [vmem:[%s906_s1 + $0x24] sm:$0xf]  ;;  %v17_v45 = vld [vmem:[%s907_s0 + $0x30] sm:$0xff] }
  0x10   :  { %619 = vst [vmem:[%s908_s2] sm:$0xff] %v603_v50  ;;  %v381_v60 = vrot.slane %v367_v52, %v670_v11  ;;  %v383_v61 = vcombine.low %v126_v48, %v130_v53  ;;  %v142_v62 = vrot.slane %v32_v49, %v659_v6  ;;  %v146_v63 = vrot.slane %v32_v49, %v661_v7  ;;  %v18_v53 = vld [vmem:[%s907_s0 + $0x38] sm:$0xff] }
  0x11   :  { %620 = vst [vmem:[%s908_s2 + $0x8] sm:$0xff] %v604_v55  ;;  %v605_v0 = vadd.f32 %v365_v56, %v13_v51  ;;  %v384_v2 = vcombine.low %v134_v54, %v138_v58  ;;  %v150_v3 = vrot.slane %v32_v49, %v663_v8  ;;  %v154_v4 = vrot.slane %v32_v49, %v665_v9  ;;  %v38_v58 = vld [vmem:[%s906_s1 + $0x2c] sm:$0xf] }
  0x12   :  { %v382_v10 = vcombine.low %v374_v57, %v381_v60  ;;  %v391_v12 = vrot.slane %v383_v61, %v670_v11  ;;  %v400_v13 = vcombine.low %v142_v62, %v146_v63  ;;  %v158_v14 = vrot.slane %v33_v59, %v659_v6 }
  0x13   :  { %621 = vst [vmem:[%s908_s2 + $0x10] sm:$0xff] %v605_v0  ;;  %v398_v15 = vrot.slane %v384_v2, %v670_v11  ;;  %v401_v16 = vcombine.low %v150_v3, %v154_v4  ;;  %v162_v17 = vrot.slane %v33_v59, %v661_v7  ;;  %v166_v18 = vrot.slane %v33_v59, %v663_v8  ;;  %v39_v3 = vld [vmem:[%s906_s1 + $0x30] sm:$0xf] }
  0x14   :  { %v606_v20 = vadd.f32 %v382_v10, %v14_v1  ;;  %v408_v22 = vrot.slane %v400_v13, %v670_v11  ;;  %v170_v23 = vrot.slane %v33_v59, %v665_v9  ;;  %v174_v24 = vrot.slane %v34_v5, %v659_v6 }
  0x15   :  { %v399_v25 = vcombine.low %v391_v12, %v398_v15  ;;  %v415_v26 = vrot.slane %v401_v16, %v670_v11  ;;  %v417_v27 = vcombine.low %v158_v14, %v162_v17  ;;  %v178_v28 = vrot.slane %v34_v5, %v661_v7 }
  0x16   :  { %622 = vst [vmem:[%s908_s2 + $0x18] sm:$0xff] %v606_v20  ;;  %v418_v30 = vcombine.low %v166_v18, %v170_v23  ;;  %v182_v31 = vrot.slane %v34_v5, %v663_v8  ;;  %v186_v32 = vrot.slane %v34_v5, %v665_v9  ;;  %v190_v33 = vrot.slane %v35_v19, %v659_v6  ;;  %v19_v5 = vld [vmem:[%s907_s0 + $0x40] sm:$0xff]  ;;  %v20_v18 = vld [vmem:[%s907_s0 + $0x48] sm:$0xff]  ;;  %v40_v23 = vld [vmem:[%s906_s1 + $0x34] sm:$0xf] }
  0x17   :  { %v607_v35 = vadd.f32 %v399_v25, %v15_v21  ;;  %v416_v36 = vcombine.low %v408_v22, %v415_v26  ;;  %v425_v37 = vrot.slane %v417_v27, %v670_v11  ;;  %v434_v38 = vcombine.low %v174_v24, %v178_v28 }
  0x18   :  { %v432_v39 = vrot.slane %v418_v30, %v670_v11  ;;  %v435_v40 = vcombine.low %v182_v31, %v186_v32  ;;  %v194_v41 = vrot.slane %v35_v19, %v661_v7  ;;  %v198_v42 = vrot.slane %v35_v19, %v663_v8  ;;  %v41_v32 = vld [vmem:[%s906_s1 + $0x38] sm:$0xf] }
  0x19   :  { %623 = vst [vmem:[%s908_s2 + $0x20] sm:$0xff] %v607_v35  ;;  %v608_v44 = vadd.f32 %v416_v36, %v16_v29  ;;  %v442_v46 = vrot.slane %v434_v38, %v670_v11  ;;  %v202_v47 = vrot.slane %v35_v19, %v665_v9  ;;  %v206_v48 = vrot.slane %v36_v34, %v659_v6 }
  0x1a   :  { %v433_v49 = vcombine.low %v425_v37, %v432_v39  ;;  %v449_v50 = vrot.slane %v435_v40, %v670_v11  ;;  %v451_v51 = vcombine.low %v190_v33, %v194_v41  ;;  %v210_v52 = vrot.slane %v36_v34, %v661_v7 }
  0x1b   :  { %624 = vst [vmem:[%s908_s2 + $0x28] sm:$0xff] %v608_v44  ;;  %v452_v54 = vcombine.low %v198_v42, %v202_v47  ;;  %v214_v55 = vrot.slane %v36_v34, %v663_v8  ;;  %v218_v56 = vrot.slane %v36_v34, %v665_v9  ;;  %v222_v57 = vrot.slane %v37_v43, %v659_v6  ;;  %v21_v34 = vld [vmem:[%s907_s0 + $0x50] sm:$0xff]  ;;  %v22_v42 = vld [vmem:[%s907_s0 + $0x58] sm:$0xff] }
  0x1c   :  { %v609_v59 = vadd.f32 %v433_v49, %v17_v45  ;;  %v450_v60 = vcombine.low %v442_v46, %v449_v50  ;;  %v459_v61 = vrot.slane %v451_v51, %v670_v11  ;;  %v468_v62 = vcombine.low %v206_v48, %v210_v52  ;;  %v42_v47 = vld [vmem:[%s906_s1 + $0x3c] sm:$0xf] }
  0x1d   :  { %v466_v63 = vrot.slane %v452_v54, %v670_v11  ;;  %v469_v0 = vcombine.low %v214_v55, %v218_v56  ;;  %v226_v1 = vrot.slane %v37_v43, %v661_v7  ;;  %v230_v2 = vrot.slane %v37_v43, %v663_v8 }
  0x1e   :  { %625 = vst [vmem:[%s908_s2 + $0x30] sm:$0xff] %v609_v59  ;;  %v610_v4 = vadd.f32 %v450_v60, %v18_v53  ;;  %v476_v10 = vrot.slane %v468_v62, %v670_v11  ;;  %v234_v12 = vrot.slane %v37_v43, %v665_v9  ;;  %v238_v13 = vrot.slane %v38_v58, %v659_v6 }
  0x1f   :  { %v467_v14 = vcombine.low %v459_v61, %v466_v63  ;;  %v483_v15 = vrot.slane %v469_v0, %v670_v11  ;;  %v485_v16 = vcombine.low %v222_v57, %v226_v1  ;;  %v242_v17 = vrot.slane %v38_v58, %v661_v7  ;;  %v23_v57 = vld [vmem:[%s907_s0 + $0x60] sm:$0xff]  ;;  %v24_v1 = vld [vmem:[%s907_s0 + $0x68] sm:$0xff] }
  0x20   :  { %626 = vst [vmem:[%s908_s2 + $0x38] sm:$0xff] %v610_v4  ;;  %v486_v19 = vcombine.low %v230_v2, %v234_v12  ;;  %v246_v20 = vrot.slane %v38_v58, %v663_v8  ;;  %v250_v21 = vrot.slane %v38_v58, %v665_v9  ;;  %v254_v22 = vrot.slane %v39_v3, %v659_v6 }
  0x21   :  { %v611_v24 = vadd.f32 %v467_v14, %v19_v5  ;;  %v484_v25 = vcombine.low %v476_v10, %v483_v15  ;;  %v493_v26 = vrot.slane %v485_v16, %v670_v11  ;;  %v502_v27 = vcombine.low %v238_v13, %v242_v17  ;;  %v25_v15 = vld [vmem:[%s907_s0 + $0x70] sm:$0xff]  ;;  %v26_v17 = vld [vmem:[%s907_s0 + $0x78] sm:$0xff] }
  0x22   :  { %v500_v28 = vrot.slane %v486_v19, %v670_v11  ;;  %v503_v29 = vcombine.low %v246_v20, %v250_v21  ;;  %v258_v30 = vrot.slane %v39_v3, %v661_v7  ;;  %v262_v31 = vrot.slane %v39_v3, %v663_v8 }
  0x23   :  { %627 = vst [vmem:[%s908_s2 + $0x40] sm:$0xff] %v611_v24  ;;  %v612_v33 = vadd.f32 %v484_v25, %v20_v18  ;;  %v510_v35 = vrot.slane %v502_v27, %v670_v11  ;;  %v266_v36 = vrot.slane %v39_v3, %v665_v9  ;;  %v270_v37 = vrot.slane %v40_v23, %v659_v6 }
  0x24   :  { %v501_v38 = vcombine.low %v493_v26, %v500_v28  ;;  %v517_v39 = vrot.slane %v503_v29, %v670_v11  ;;  %v519_v40 = vcombine.low %v254_v22, %v258_v30  ;;  %v274_v41 = vrot.slane %v40_v23, %v661_v7 }
  0x25   :  { %628 = vst [vmem:[%s908_s2 + $0x48] sm:$0xff] %v612_v33  ;;  %v520_v43 = vcombine.low %v262_v31, %v266_v36  ;;  %v278_v44 = vrot.slane %v40_v23, %v663_v8  ;;  %v282_v45 = vrot.slane %v40_v23, %v665_v9  ;;  %v286_v46 = vrot.slane %v41_v32, %v659_v6 }
  0x26   :  { %v613_v48 = vadd.f32 %v501_v38, %v21_v34  ;;  %v518_v49 = vcombine.low %v510_v35, %v517_v39  ;;  %v527_v50 = vrot.slane %v519_v40, %v670_v11  ;;  %v536_v51 = vcombine.low %v270_v37, %v274_v41 }
  0x27   :  { %v534_v52 = vrot.slane %v520_v43, %v670_v11  ;;  %v537_v53 = vcombine.low %v278_v44, %v282_v45  ;;  %v290_v54 = vrot.slane %v41_v32, %v661_v7  ;;  %v294_v55 = vrot.slane %v41_v32, %v663_v8 }
  0x28   :  { %629 = vst [vmem:[%s908_s2 + $0x50] sm:$0xff] %v613_v48  ;;  %v614_v56 = vadd.f32 %v518_v49, %v22_v42  ;;  %v544_v58 = vrot.slane %v536_v51, %v670_v11  ;;  %v298_v59 = vrot.slane %v41_v32, %v665_v9  ;;  %v302_v60 = vrot.slane %v42_v47, %v659_v6 }
  0x29   :  { %v535_v61 = vcombine.low %v527_v50, %v534_v52  ;;  %v551_v62 = vrot.slane %v537_v53, %v670_v11  ;;  %v553_v63 = vcombine.low %v286_v46, %v290_v54  ;;  %v306_v0 = vrot.slane %v42_v47, %v661_v7 }
  0x2a   :  { %630 = vst [vmem:[%s908_s2 + $0x58] sm:$0xff] %v614_v56  ;;  %v554_v2 = vcombine.low %v294_v55, %v298_v59  ;;  %v310_v3 = vrot.slane %v42_v47, %v663_v8  ;;  %v314_v4 = vrot.slane %v42_v47, %v665_v9 }
  0x2b   :  { %v615_v6 = vadd.f32 %v535_v61, %v23_v57  ;;  %v552_v5 = vcombine.low %v544_v58, %v551_v62  ;;  %v561_v10 = vrot.slane %v553_v63, %v670_v11  ;;  %v570_v12 = vcombine.low %v302_v60, %v306_v0 }
  0x2c   :  { %v568_v7 = vrot.slane %v554_v2, %v670_v11  ;;  %v571_v13 = vcombine.low %v310_v3, %v314_v4 }
  0x2d   :  { %631 = vst [vmem:[%s908_s2 + $0x60] sm:$0xff] %v615_v6  ;;  %v616_v14 = vadd.f32 %v552_v5, %v24_v1  ;;  %v578_v8 = vrot.slane %v570_v12, %v670_v11 }
  0x2e   :  { %v569_v9 = vcombine.low %v561_v10, %v568_v7  ;;  %v585_v16 = vrot.slane %v571_v13, %v670_v11 }
  0x2f   :  { %632 = vst [vmem:[%s908_s2 + $0x68] sm:$0xff] %v616_v14 }
  0x30   :  { %v617_v18 = vadd.f32 %v569_v9, %v25_v15  ;;  %v586_v19 = vcombine.low %v578_v8, %v585_v16 }
  0x32   :  { %633 = vst [vmem:[%s908_s2 + $0x70] sm:$0xff] %v617_v18  ;;  %v618_v20 = vadd.f32 %v586_v19, %v26_v17 }
  0x34   :  { %634 = vst [vmem:[%s908_s2 + $0x78] sm:$0xff] %v618_v20 }

// kernel: frru_forward.5
= control target key start
LH: loop header
LB: loop body
LE: loop exit
PB: predicated region body
PF: predicated region fallthrough
CT: control target
= control target key end

     0   :  { %s4723_s21 = smov 0   ;;  %s4725_s22 = smov 0   ;;  %s5697_s0 = inlined_call_operand.vmem [shape: f32[2,10,10,36], index: 0, kind: input, shape index: {}, may-alias: {0,1,2,3,4,5}]   ;;  %s5698_s1 = inlined_call_operand.vmem [shape: f32[2,10,10,36], index: 1, kind: input, shape index: {}, may-alias: {0,1,2,3,4,5}]   ;;  %s5699_s2 = inlined_call_operand.vmem [shape: f32[2,10,10,36], index: 2, kind: input, shape index: {}, may-alias: {0,1,2,3,4,5}]   ;;  %s5700_s3 = inlined_call_operand.vmem [shape: f32[2,10,10,36], index: 3, kind: input, shape index: {}, may-alias: {0,1,2,3,4,5}]   ;;  %s5701_s4 = inlined_call_operand.vmem [shape: f32[2,10,10,36], index: 4, kind: input, shape index: {}, may-alias: {0,1,2,3,4,5}]   ;;  %s5702_s5 = inlined_call_operand.vmem [shape: f32[2,10,10,36], index: 5, kind: input, shape index: {}, may-alias: {0,1,2,3,4,5}]   ;;  %s5703_s6 = inlined_call_operand.vmem [shape: f32[1,36], index: 6, kind: input, shape index: {}]   ;;  %s5704_s7 = inlined_call_operand.vmem [shape: f32[1,36], index: 7, kind: input, shape index: {}]   ;;  %s5705_s8 = inlined_call_operand.vmem [shape: bf16[9,36,8], index: 8, kind: input, shape index: {}]   ;;  %s5706_s9 = inlined_call_operand.vmem [shape: f32[1,8], index: 9, kind: input, shape index: {}]   ;;  %s5707_s10 = inlined_call_operand.vmem [shape: f32[2,8,8,8], index: 10, kind: output, shape index: {0}]   ;;  %s5708_s11 = inlined_call_operand.vmem [shape: f32[1,8], index: 11, kind: output, shape index: {1}]   ;;  %s5709_s12 = inlined_call_operand.vmem [shape: f32[1,8], index: 12, kind: output, shape index: {2}]  }
   0x1   :  { %5724 = sst [smem:[#allocation12_spill]] %s5697_s0  ;;  %s4727_s23 = smov 0  }
   0x2   :  { %5725 = sst [smem:[#allocation13_spill]] %s5698_s1  ;;  %s4729_s24 = smov 0  }
   0x3   :  { %5726 = sst [smem:[#allocation14_spill]] %s5699_s2  ;;  %s4731_s25 = smov 0  }
   0x4   :  { %5727 = sst [smem:[#allocation15_spill]] %s5700_s3 }
   0x5   :  { %5728 = sst [smem:[#allocation16_spill]] %s5703_s6 }
   0x6   :  { %5729 = sst [smem:[#allocation17_spill]] %s5704_s7 }
   0x7   :  { %5730 = sst [smem:[#allocation18_spill]] %s5706_s9 }
   0x8 LB: > { %5731 = sst [smem:[#allocation2_spill]] %s4645_s23  ;;  %s32_s26 = sadd.s32 1, %s4645_s23  ;;  %s4653_s25 = sphi %s4731_s25, %s23_s25   ;;  %s4649_s24 = sphi %s4729_s24, %s5764_s24   ;;  %s4645_s23 = sphi %s4727_s23, %s5763_s23   ;;  %s4641_s22 = sphi %s4725_s22, %s5762_s22   ;;  %s4637_s21 = sphi %s4723_s21, %s5761_s21  }
   0x9   : > { %5732 = sst [smem:[#allocation3_spill]] %s4649_s24  ;;  %s35_s27 = sadd.s32 1, %s4649_s24 }
   0xa   : > { %5733 = sst [smem:[#allocation4_spill]] %s4653_s25  ;;  %p33_p0 = scmp.ge.s32.totalorder %s32_s26, 2 }
   0xb   : > { %p3616_p1 = scmp.ge.s32.totalorder %s4653_s25, 1  ;;  %p501_p2 = scmp.lt.s32.totalorder %s4653_s25, 5 }
   0xc   : > { %s5766_s26 = smov (%p33_p0, %s32_s26), 0  ;;  %s5768_s27 = smov (!%p33_p0, %s35_s27), %s4649_s24 }
   0xd   : > { %5734 = sst [smem:[#allocation5_spill]] %s5766_s26  ;;  %p502_p3 = pnand %p3616_p1, %p501_p2 }
   0xe   : > { %p37_p4 = scmp.ge.s32.totalorder %s5768_s27, 2 }
   0xf   : > { %505 = sbr.rel (%p502_p3) target bundleno = 532 (0x214), region = 60 }
  0x10   : > { %s5770_s27 = smov (%p37_p4, %s5768_s27), 0 }
  0x11   : > { %5735 = sst [smem:[#allocation6_spill]] %s5770_s27 }
  0x16   : > { %s4758_s28 = sshll.u32 %s4637_s21, 2  ;;  %p608_p5 = scmp.lt.s32.totalorder %s4641_s22, 1 }
  0x17   : > { %p610_p6 = scmp.lt.s32.totalorder %s4758_s28, 9  ;;  %s4763_s29 = sadd.s32 1, %s4758_s28 }
  0x18   : > { %5736 = sst [smem:[#allocation7_spill]] %s4763_s29  ;;  %p622_p7 = scmp.lt.s32.totalorder %s4763_s29, 9 }
  0x19   : > { %s4766_s30 = scalar_select %p608_p5, %s4641_s22, 1 }
  0x1a   : > { %s611_s13 = scalar_select %p610_p6, %s4758_s28, 9 }
  0x1b   : > { %s4770_s14 = smul.u32 20, %s4766_s30  ;;  %s4774_s16 = sadd.s32 2, %s4758_s28 }
  0x1c   : > { %s3618_s15 = sshll.u32 %s611_s13, 1  ;;  %5737 = sst [smem:[#allocation8_spill]] %s4774_s16 }
  0x1d   : > { %s614_s17 = sadd.s32 %s4770_s14, %s3618_s15  ;;  %p635_p8 = scmp.lt.s32.totalorder %s4774_s16, 9 }
  0x1e   : > { %s3619_s18 = sshll.u32 %s614_s17, 3  ;;  %s4779_s19 = sadd.s32 3, %s4758_s28 }
  0x1f   : > { %5738 = sst [smem:[#allocation9_spill]] %s4779_s19  ;;  %s5739_s0 = sld [smem:[#allocation12_spill]] }
  0x20   : > { %p648_p9 = scmp.lt.s32.totalorder %s4779_s19, 9  ;;  %s4790_s25 = sadd.s32 4, %s4758_s28 }
  0x21   : > { %s623_s24 = scalar_select %p622_p7, %s4763_s29, 9 }
  0x22   : > { %s636_s13 = scalar_select %p635_p8, %s4774_s16, 9 }
  0x23   : > { %s3621_s23 = sshll.u32 %s623_s24, 1  ;;  %5740 = sst [smem:[#allocation10_spill]] %s4790_s25 }
  0x24   : > { %s626_s15 = sadd.s32 %s4770_s14, %s3621_s23  ;;  %s3624_s17 = sshll.u32 %s636_s13, 1 }
  0x25   : > { %s4784_s26 = scalar_lea.vmem %s5739_s0, %s3619_s18  ;;  %s3622_s9 = sshll.u32 %s626_s15, 3 }
  0x26   : > { %s639_s7 = sadd.s32 %s4770_s14, %s3624_s17  ;;  %s5741_s1 = sld [smem:[#allocation13_spill]] }
  0x27   : > { %s3625_s0 = sshll.u32 %s639_s7, 3  ;;  %s5742_s2 = sld [smem:[#allocation14_spill]] }
  0x28   : > { %p661_p10 = scmp.lt.s32.totalorder %s4790_s25, 9  ;;  %s4808_s15 = sadd.s32 5, %s4758_s28 }
  0x29   : > { %s649_s16 = scalar_select %p648_p9, %s4779_s19, 9 }
  0x2a   : > { %s662_s23 = scalar_select %p661_p10, %s4790_s25, 9 }
  0x2b   : > { %s3627_s13 = sshll.u32 %s649_s16, 1  ;;  %s5744_s3 = sld [smem:[#allocation15_spill]] }
  0x2c   : > { %s4797_s18 = scalar_lea.vmem %s5741_s1, %s3622_s9  ;;  %s652_s9 = sadd.s32 %s4770_s14, %s3627_s13 }
  0x2d   : > { %s4802_s24 = scalar_lea.vmem %s5742_s2, %s3625_s0  ;;  %s3630_s17 = sshll.u32 %s662_s23, 1 }
  0x2e   : > { %5743 = sst [smem:[#allocation11_spill]] %s4802_s24  ;;  %s3628_s7 = sshll.u32 %s652_s9, 3 }
  0x2f   : > { %s665_s27 = sadd.s32 %s4770_s14, %s3630_s17  ;;  %p674_p11 = scmp.lt.s32.totalorder %s4808_s15, 9 }
  0x30   : > { %s3631_s29 = sshll.u32 %s665_s27, 3  ;;  %p686_p12 = scmp.lt.s32.totalorder %s4758_s28, 7 }
  0x31   : > { %s4815_s0 = scalar_lea.vmem %s5744_s3, %s3628_s7  ;;  %s4820_s16 = scalar_lea.vmem %s5701_s4, %s3631_s29 }
  0x32   : > { %s3636_s25 = sshll.u32 %s4766_s30, 3  ;;  %p694_p13 = scmp.eq.s32.totalorder %s4641_s22, 0 }
  0x33   : > { %s675_s19 = scalar_select %p674_p11, %s4808_s15, 9 }
  0x34   : > { %s687_s13 = scalar_select %p686_p12, %s4758_s28, 7 }
  0x35   : > { %s3633_s23 = sshll.u32 %s675_s19, 1  ;;  %p695_p0 = scmp.eq.s32.totalorder %s4637_s21, 0 }
  0x36   : > { %s678_s9 = sadd.s32 %s4770_s14, %s3633_s23  ;;  %s689_s17 = sadd.s32 %s3636_s25, %s687_s13 }
  0x37   : > { %s3634_s24 = sshll.u32 %s678_s9, 3  ;;  %s3637_s20 = sshll.u32 %s689_s17, 3 }
  0x38   : > { %s4832_s27 = scalar_lea.vmem %s5702_s5, %s3634_s24  ;;  %s4837_s2 = scalar_lea.vmem %s5707_s10, %s3637_s20 }
  0x39   : > { %p696_p1 = pnand %p695_p0, %p694_p13 }
  0x3a   : > { %vm700_vm0 = vcmask (!%p696_p1), 57344   ;;  %v4655_v0 = vmov (!%p696_p1), 0.0  }
  0x3b   : > { %699 = sbr.rel (%p696_p1) target bundleno = 66 (0x42), region = 64  ;;  %701 = vst.msk [vmem:[%s5708_s11] sm:$0x1] (!%p696_p1), %vm700_vm0, %v4655_v0  ;;  %702 = vst.msk [vmem:[%s5709_s12] sm:$0x1] (!%p696_p1), %vm700_vm0, %v4655_v0 }
  0x42 PF: > { %v4505_v1 = vld [vmem:[%s5705_s8] sm:$0xff]   ;;  %v4656_v2 = vmov 0.0   ;;  %v4506_v3 = vld [vmem:[%s5705_s8 + $0x14] sm:$0xff]   ;;  %v706_v4 = vlaneseq  ;;  %v4507_v5 = vld [vmem:[%s5705_s8 + $0x8] sm:$0xff]   ;;  %vm910_vm1 = vcmask 1041408   ;;  %vm4657_vm2 = vmmov 0  }
  0x43   : > { %4111 = vmatprep.subr.bf16.mxu1 %v4656_v2  ;;  %4101 = vmatprep.subr.bf16.mxu0 %v4656_v2  ;;  %v4508_v6 = vld [vmem:[%s5705_s8 + $0x1c] sm:$0xff]   ;;  %v4509_v7 = vld [vmem:[%s5705_s8 + $0x10] ss:$0 sps:$4 sm:$0x33]   ;;  %s5745_s30 = sld [smem:[#allocation16_spill]]  ;;  %s5746_s25 = sld [smem:[#allocation7_spill]] }
  0x44   : > { %4112 = vmatpush3.bf16.msra.mxu1 %v4505_v1  ;;  %4102 = vmatpush3.bf16.msra.mxu0 %v4506_v3  ;;  %v715_v8 = vld [vmem:[%s4784_s26] sm:$0xff]  ;;  %v4873_v10 = vshrl.u32 %v706_v4, 7  ;;  %s5747_s24 = sld [smem:[#allocation17_spill]]  ;;  %v973_v13 = vsel %vm910_vm1, %v4509_v7, 0  ;;  %v716_v14 = vld [vmem:[%s4784_s26 + $0x8] sm:$0x3] }
  0x45   : > { %4113 = vmatprep.subr.bf16.mxu1 %v4656_v2  ;;  %4103 = vmatprep.subr.bf16.mxu0 %v4656_v2  ;;  %v4510_v9 = vld [vmem:[%s5705_s8 + $0x24] ss:$0 sps:$4 sm:$0x33]   ;;  %p736_p2 = scmp.ge.s32.totalorder %s4758_s28, 1  ;;  %p737_p3 = scmp.le.s32.totalorder %s4758_s28, 8  ;;  %v4511_v27 = vld [vmem:[%s5705_s8 + $0x3c] sm:$0xff]  }
  0x46   : > { %4117 = vmatprep.mubr.msk.bf16.mxu1 %vm4657_vm2, %v4656_v2  ;;  %4107 = vmatprep.mubr.msk.bf16.mxu0 %vm4657_vm2, %v4656_v2  ;;  %v912_v16 = vsel %vm910_vm1, %v4510_v9, 0  ;;  %v4895_v18 = vadd.s32 8, %v4873_v10  ;;  %vm709_vm3 = vcmp.ge.s32.totalorder %v4873_v10, 1  ;;  %v751_v22 = vld [vmem:[%s4797_s18] sm:$0xff]  ;;  %v752_v26 = vld [vmem:[%s4797_s18 + $0x8] sm:$0x3] }
  0x47   : > { %p4898_p4 = pnand %p737_p3, %p736_p2  ;;  %vm906_vm8 = vcmask 293888   ;;  %s5751_s18 = sld [smem:[#allocation8_spill]]  ;;  %v4513_v37 = vld [vmem:[%s5705_s8 + $0x44] sm:$0xff]   ;;  %v4515_v39 = vld [vmem:[%s5705_s8 + $0x4c] ss:$0 sps:$4 sm:$0x33]  }
  0x48   : > { %4114 = vmatpush3.bf16.msra.mxu1 %v4507_v5  ;;  %4104 = vmatpush3.bf16.msra.mxu0 %v4508_v6  ;;  %vm712_vm4 = vcmp.le.s32.totalorder %v4895_v18, 8  ;;  %s5752_s9 = sld [smem:[#allocation11_spill]]  ;;  %v4512_v42 = vld [vmem:[%s5705_s8 + $0x28] sm:$0xff]   ;;  %v4516_v43 = vld [vmem:[%s5705_s8 + $0x38] ss:$0 sps:$4 sm:$0x33]  }
  0x49   : > { %v4878_v11 = vld [vmem:[%s5745_s30] ss:$0 sm:$0xff]  ;;  %4115 = vmatprep.subr.bf16.mxu1 %v4656_v2  ;;  %4105 = vmatprep.subr.bf16.mxu0 %v4656_v2  ;;  %p760_p5 = scmp.ge.s32.totalorder %s5746_s25, 1  ;;  %p761_p6 = scmp.le.s32.totalorder %s5746_s25, 8  ;;  %v1111_v47 = vsel %vm910_vm1, %v4515_v39, 0  ;;  %v4514_v50 = vld [vmem:[%s5705_s8 + $0x30] sm:$0xff]  }
  0x4a   : > { %s5748_s3 = smov %s5747_s24  ;;  %v4883_v12 = vld [vmem:[%s5747_s24] ss:$0 sm:$0xff]  ;;  %v723_v15 = vmul.f32 %v4878_v11, %v715_v8  ;;  %v724_v17 = vmul.f32 %v4878_v11, %v716_v14  ;;  %v753_v25 = vmul.f32 %v4878_v11, %v751_v22  ;;  %v754_v32 = vmul.f32 %v4878_v11, %v752_v26  ;;  %v4517_v52 = vld [vmem:[%s5705_s8 + $0x64] sm:$0xff]   ;;  %v4519_v57 = vld [vmem:[%s5705_s8 + $0x6c] sm:$0xff]   ;;  %s5756_s24 = sld [smem:[#allocation10_spill]] }
  0x4b   : > { %s3641_s26 = scalar_select %p4898_p4, 0, 1  ;;  %v1042_v54 = vsel %vm910_vm1, %v4516_v43, 0  ;;  %v4521_v62 = vld [vmem:[%s5705_s8 + $0x74] ss:$0 sps:$4 sm:$0x33]  }
  0x4c   : > { %v731_v19 = vadd.f32 %v4883_v12, %v723_v15  ;;  %4116 = vmatpush3.bf16.msra.mxu1 %v973_v13  ;;  %v732_v20 = vadd.f32 %v4883_v12, %v724_v17  ;;  %4106 = vmatpush3.bf16.msra.mxu0 %v912_v16  ;;  %p4911_p7 = pnand %p761_p6, %p760_p5  ;;  %v755_v29 = vadd.f32 %v4883_v12, %v753_v25  ;;  %v4518_v3 = vld [vmem:[%s5705_s8 + $0x50] sm:$0xff]   ;;  %v1257_v6 = vsel %vm910_vm1, %v4521_v62, 0  ;;  %v4520_v7 = vld [vmem:[%s5705_s8 + $0x58] sm:$0xff]   ;;  %v4522_v9 = vld [vmem:[%s5705_s8 + $0x60] ss:$0 sps:$4 sm:$0x33]  }
  0x4d   : > { %4131 = vmatprep.subr.bf16.mxu1 %v4656_v2  ;;  %4121 = vmatprep.subr.bf16.mxu0 %v4656_v2  ;;  %v741_v24 = vstv %s3641_s26  ;;  %v756_v40 = vadd.f32 %v4883_v12, %v754_v32  ;;  %p784_p8 = scmp.ge.s32.totalorder %s5751_s18, 1  ;;  %p785_p9 = scmp.le.s32.totalorder %s5751_s18, 8  ;;  %v4523_v15 = vld [vmem:[%s5705_s8 + $0x8c] sm:$0xff]   ;;  %v4525_v22 = vld [vmem:[%s5705_s8 + $0x94] sm:$0xff]  }
  0x4e   : > { %v733_v21 = vmax.f32 %v731_v19, 0.0  ;;  %v734_v23 = vmax.f32 %v732_v20, 0.0  ;;  %vm742_vm5 = vcmp.eq.s32.totalorder %v741_v24, 1  ;;  %s3642_s23 = scalar_select %p4911_p7, 0, 1  ;;  %v757_v38 = vmax.f32 %v755_v29, 0.0 }
  0x4f   : > { %vm743_vm6 = vmand %vm709_vm3, %vm742_vm5  ;;  %v775_v46 = vld [vmem:[%s5752_s9] sm:$0xff]  ;;  %v758_v48 = vmax.f32 %v756_v40, 0.0  ;;  %p4972_p10 = pnand %p785_p9, %p784_p8  ;;  %v776_v55 = vld [vmem:[%s5752_s9 + $0x8] sm:$0x3]  ;;  %s5754_s18 = sld [smem:[#allocation9_spill]] }
  0x50   : > { %vm744_vm7 = vmand %vm712_vm4, %vm742_vm5  ;;  %v749_v28 = vsel %vm743_vm6, %v733_v21, 0.0  ;;  %v765_v34 = vstv %s3642_s23  ;;  %v777_v49 = vmul.f32 %v4878_v11, %v775_v46  ;;  %v778_v58 = vmul.f32 %v4878_v11, %v776_v55  ;;  %v4527_v19 = vld [vmem:[%s5705_s8 + $0x9c] ss:$0 sps:$4 sm:$0x33]   ;;  %v4526_v29 = vld [vmem:[%s5705_s8 + $0x80] sm:$0xff]   ;;  %p832_p0 = scmp.ge.s32.totalorder %s5756_s24, 1 }
  0x51   : > { %v750_v30 = vsel %vm744_vm7, %v734_v23, 0.0  ;;  %v871_v31 = vpack.c.bf16 %v749_v28, %v749_v28  ;;  %vm766_vm9 = vcmp.eq.s32.totalorder %v765_v34, 1  ;;  %s3643_s29 = scalar_select %p4972_p10, 0, 1  ;;  %v1187_v21 = vsel %vm910_vm1, %v4522_v9, 0  ;;  %v4524_v24 = vld [vmem:[%s5705_s8 + $0x78] sm:$0xff]  }
  0x52   : > { %v4929_v33 = vpack.c.bf16 %v750_v30, %v749_v28  ;;  %vm767_vm10 = vmand %vm709_vm3, %vm766_vm9  ;;  %v779_v53 = vadd.f32 %v4883_v12, %v777_v49  ;;  %v780_v60 = vadd.f32 %v4883_v12, %v778_v58  ;;  %v4528_v28 = vld [vmem:[%s5705_s8 + $0x88] ss:$0 sps:$4 sm:$0x33]   ;;  %v4533_v34 = vld [vmem:[%s5705_s8 + $0x24] ss:$0 sps:$4 sm:$0x33]  }
  0x53   : > { %4118 = vmatmul.mubr.msk.bf16.vlgmr.msra.gmra.mrb[0].mxu1 %vm906_vm8, %v871_v31  ;;  %v773_v45 = vsel %vm767_vm10, %v757_v38, 0.0  ;;  %vm768_vm11 = vmand %vm712_vm4, %vm766_vm9  ;;  %v789_v59 = vstv %s3643_s29  ;;  %v4529_v31 = vld [vmem:[%s5705_s8 + $0x14] sm:$0xff]   ;;  %v1326_v32 = vsel %vm910_vm1, %v4528_v28, 0  ;;  %v4532_v38 = vld [vmem:[%s5705_s8 + $0xa8] sm:$0xff]   ;;  %p833_p1 = scmp.le.s32.totalorder %s5756_s24, 8  ;;  %p856_p3 = scmp.ge.s32.totalorder %s4808_s15, 1 }
  0x54   : > { %4132 = vmatpush3.bf16.msra.mxu1 %v4511_v27  ;;  %v885_v35 = vshrl.u32 %v4929_v33, 16  ;;  %v887_v36 = vshll.u32 %v4929_v33, 16  ;;  %4137 = vmatprep.mubr.msk.bf16.mxu1 %vm4657_vm2, %v4656_v2  ;;  %v4968_v51 = vpack.c.bf16 %v773_v45, %v773_v45  ;;  %v774_v56 = vsel %vm768_vm11, %v758_v48, 0.0  ;;  %v4534_v39 = vld [vmem:[%s5705_s8 + $0xb0] ss:$0 sps:$4 sm:$0x33]  }
  0x55   : > { %4133 = vmatprep.subr.bf16.mxu1 %v4656_v2  ;;  %v781_v61 = vmax.f32 %v779_v53, 0.0  ;;  %vm790_vm12 = vcmp.eq.s32.totalorder %v789_v59, 1  ;;  %v1022_v63 = vrot.slane %v4929_v33, 1  ;;  %v5003_v0 = vpack.c.bf16 %v774_v56, %v773_v45  ;;  %v4531_v33 = vld [vmem:[%s5705_s8 + $0x1c] sm:$0xff]   ;;  %v4535_v40 = vld [vmem:[%s5705_s8 + $0x28] sm:$0xff]   ;;  %v4537_v43 = vld [vmem:[%s5705_s8 + $0x30] sm:$0xff]   ;;  %p5311_p2 = pnand %p833_p1, %p832_p0 }
  0x56   : > { %v889_v41 = vrot.slane %v887_v36, 1  ;;  %vm791_vm13 = vmand %vm709_vm3, %vm790_vm12  ;;  %v782_v1 = vmax.f32 %v780_v60, 0.0  ;;  %v1402_v27 = vsel %vm910_vm1, %v4527_v19, 0  ;;  %v4530_v36 = vld [vmem:[%s5705_s8 + $0xa0] sm:$0xff]   ;;  %p808_p11 = scmp.ge.s32.totalorder %s5754_s18, 1  ;;  %v4538_v48 = vld [vmem:[%s5705_s8 + $0x8] sm:$0xff]  }
  0x57   : > { %vm792_vm14 = vmand %vm712_vm4, %vm790_vm12  ;;  %v797_v4 = vsel %vm791_vm13, %v781_v61, 0.0  ;;  %v1164_v8 = vshll.u32 %v5003_v0, 16  ;;  %v1237_v13 = vrot.slane %v5003_v0, 1  ;;  %v1162_v16 = vshrl.u32 %v5003_v0, 16  ;;  %v4536_v45 = vld [vmem:[%s5705_s8] sm:$0xff]   ;;  %p809_p12 = scmp.le.s32.totalorder %s5754_s18, 8 }
  0x58   : > { %v890_v44 = vor.u32 %v889_v41, %v885_v35  ;;  %4134 = vmatpush3.bf16.msra.mxu1 %v4513_v37  ;;  %v798_v5 = vsel %vm792_vm14, %v782_v1, 0.0  ;;  %v5083_v35 = vpack.c.bf16 %v797_v4, %v797_v4  ;;  %v1567_v37 = vsel %vm910_vm1, %v4533_v34, 0  ;;  %v4539_v41 = vld [vmem:[%s5705_s8 + $0x38] ss:$0 sps:$4 sm:$0x33]   ;;  %v4541_v49 = vld [vmem:[%s5705_s8 + $0x50] sm:$0xff]  }
  0x59   : > { %4135 = vmatprep.subr.bf16.mxu1 %v4656_v2  ;;  %v5024_v14 = vpack.c.bf16 %v798_v5, %v797_v4  ;;  %v1166_v17 = vrot.slane %v1164_v8, 1  ;;  %v1688_v46 = vsel %vm910_vm1, %v4539_v41, 0  ;;  %p5159_p13 = pnand %p809_p12, %p808_p11  ;;  %v4542_v55 = vld [vmem:[%s5705_s8 + $0x3c] sm:$0xff]   ;;  %v4546_v58 = vld [vmem:[%s5705_s8 + $0x4c] ss:$0 sps:$4 sm:$0x33]  }
  0x5a   : > { %4108 = vmatmul.mubr.msk.bf16.vlgmr.msra.gmra.mrb[0].mxu0 %vm906_vm8, %v890_v44  ;;  %v4544_v59 = vld [vmem:[%s5705_s8 + $0x44] sm:$0xff]   ;;  %s3645_s19 = scalar_select %p5311_p2, 0, 1  ;;  %v4604_v10 = vld [vmem:[%s5705_s8 + $0x6c] sm:$0xff]  }
  0x5b   : > { %4122 = vmatpush3.bf16.msra.mxu0 %v4512_v42  ;;  %4127 = vmatprep.mubr.msk.bf16.mxu0 %vm4657_vm2, %v4656_v2  ;;  %v1379_v20 = vshll.u32 %v5024_v14, 16  ;;  %v1167_v23 = vor.u32 %v1166_v17, %v1162_v16  ;;  %v1377_v25 = vshrl.u32 %v5024_v14, 16  ;;  %v1472_v42 = vsel %vm910_vm1, %v4534_v39, 0  ;;  %s3644_s18 = scalar_select %p5159_p13, 0, 1  ;;  %v4549_v1 = vld [vmem:[%s5705_s8 + $0x80] sm:$0xff]  }
  0x5c   : > { %4123 = vmatprep.subr.bf16.mxu0 %v4656_v2  ;;  %4136 = vmatpush3.bf16.msra.mxu1 %v1111_v47  ;;  %v5119_v44 = vrot.slane %v5024_v14, 1  ;;  %v4540_v47 = vld [vmem:[%s5705_s8 + $0x10] ss:$0 sps:$4 sm:$0x33]   ;;  %v800_v60 = vld [vmem:[%s4815_s0 + $0x8] sm:$0x3] }
  0x5d   : > { %4151 = vmatprep.subr.bf16.mxu1 %v4656_v2  ;;  %v1381_v26 = vrot.slane %v1379_v20, 1  ;;  %v1625_v53 = vsel %vm910_vm1, %v4540_v47, 0  ;;  %v813_v62 = vstv %s3644_s18  ;;  %v802_v0 = vmul.f32 %v4878_v11, %v800_v60  ;;  %v4551_v4 = vld [vmem:[%s5705_s8 + $0x88] ss:$0 sps:$4 sm:$0x33]   ;;  %v4553_v14 = vld [vmem:[%s5705_s8 + $0xa0] sm:$0xff]  }
  0x5e   : > { %vm814_vm15 = vcmp.eq.s32.totalorder %v813_v62, 1  ;;  %v4548_v5 = vld [vmem:[%s5705_s8 + $0x64] sm:$0xff]   ;;  %v1948_v8 = vsel %vm910_vm1, %v4551_v4, 0  ;;  %v4557_v16 = vld [vmem:[%s5705_s8 + $0xb0] ss:$0 sps:$4 sm:$0x33]  }
  0x5f   : > { %4124 = vmatpush3.bf16.msra.mxu0 %v4514_v50  ;;  %4138 = vmatmul.mubr.msk.bf16.vlgmr.msra.gmra.mrb[4].mxu1 %vm906_vm8, %v4968_v51  ;;  %v5063_v30 = vor.u32 %v1381_v26, %v1377_v25  ;;  %v4543_v50 = vld [vmem:[%s5705_s8 + $0x58] sm:$0xff]   ;;  %vm815_vm0 = vmand %vm709_vm3, %vm814_vm15  ;;  %v4555_v19 = vld [vmem:[%s5705_s8 + $0xa8] sm:$0xff]   ;;  %p857_p4 = scmp.le.s32.totalorder %s4808_s15, 8 }
  0x60   : > { %4125 = vmatprep.subr.bf16.mxu0 %v4656_v2  ;;  %4152 = vmatpush3.bf16.msra.mxu1 %v4517_v52  ;;  %v4545_v52 = vld [vmem:[%s5705_s8 + $0x60] ss:$0 sps:$4 sm:$0x33]   ;;  %vm816_vm5 = vmand %vm712_vm4, %vm814_vm15  ;;  %v4558_v25 = vld [vmem:[%s5705_s8 + $0x9c] ss:$0 sps:$4 sm:$0x33]  }
  0x61   : > { %4153 = vmatprep.subr.bf16.mxu1 %v4656_v2  ;;  %4157 = vmatprep.mubr.msk.bf16.mxu1 %vm4657_vm2, %v4656_v2  ;;  %v4564_v39 = vld [vmem:[%s5705_s8 + $0x24] ss:$0 sps:$4 sm:$0x33]   ;;  %v5339_v47 = vld [vmem:[%s5745_s30] ss:$0 sm:$0xff]  ;;  %p5521_p5 = pnand %p857_p4, %p856_p3  ;;  %v4609_v18 = vld [vmem:[%s5705_s8 + $0xa8] sm:$0xff]  }
  0x62   : > { %v2181_v41 = vsel %vm910_vm1, %v4564_v39, 0  ;;  %v4575_v62 = vld [vmem:[%s5705_s8 + $0x74] ss:$0 sps:$4 sm:$0x33]   ;;  %v4592_v39 = vld [vmem:[%s5705_s8 + $0x8] sm:$0xff]  }
  0x63   : > { %4126 = vmatpush3.bf16.msra.mxu0 %v1042_v54  ;;  %v799_v54 = vld [vmem:[%s4815_s0] sm:$0xff]  ;;  %s3646_s13 = scalar_select %p5521_p5, 0, 1 }
  0x64   : > { %4141 = vmatprep.subr.bf16.mxu0 %v4656_v2  ;;  %4154 = vmatpush3.bf16.msra.mxu1 %v4519_v57  ;;  %v801_v56 = vmul.f32 %v4878_v11, %v799_v54  ;;  %v1816_v57 = vsel %vm910_vm1, %v4545_v52, 0  ;;  %v804_v11 = vadd.f32 %v4883_v12, %v802_v0  ;;  %v837_v52 = vstv %s3645_s19  ;;  %v4570_v54 = vld [vmem:[%s5705_s8 + $0x38] ss:$0 sps:$4 sm:$0x33]  }
  0x65   : > { %4155 = vmatprep.subr.bf16.mxu1 %v4656_v2  ;;  %vm838_vm6 = vcmp.eq.s32.totalorder %v837_v52, 1  ;;  %v4600_v52 = vld [vmem:[%s5705_s8 + $0x4c] ss:$0 sps:$4 sm:$0x33]  }
  0x66   : > { %4128 = vmatmul.mubr.msk.bf16.vlgmr.msra.gmra.mrb[4].mxu0 %vm906_vm8, %v1022_v63  ;;  %v803_v61 = vadd.f32 %v4883_v12, %v801_v56  ;;  %v4547_v63 = vld [vmem:[%s5705_s8 + $0x78] sm:$0xff]   ;;  %v4550_v12 = vld [vmem:[%s5705_s8 + $0x6c] sm:$0xff]   ;;  %v806_v9 = vmax.f32 %v804_v11, 0.0  ;;  %vm839_vm7 = vmand %vm709_vm3, %vm838_vm6 }
  0x67   : > { %4142 = vmatpush3.bf16.msra.mxu0 %v4518_v3  ;;  %4147 = vmatprep.mubr.msk.bf16.mxu0 %vm4657_vm2, %v4656_v2  ;;  %vm840_vm9 = vmand %vm712_vm4, %vm838_vm6  ;;  %v4576_v11 = vld [vmem:[%s5705_s8 + $0x60] ss:$0 sps:$4 sm:$0x33]  }
  0x68   : > { %4143 = vmatprep.subr.bf16.mxu0 %v4656_v2  ;;  %4156 = vmatpush3.bf16.msra.mxu1 %v1257_v6  ;;  %v805_v3 = vmax.f32 %v803_v61, 0.0  ;;  %v4552_v6 = vld [vmem:[%s5705_s8 + $0x74] ss:$0 sps:$4 sm:$0x33]   ;;  %v822_v17 = vsel %vm816_vm5, %v806_v9, 0.0 }
  0x69   : > { %4171 = vmatprep.subr.bf16.mxu1 %v4656_v2 }
  0x6b   : > { %4144 = vmatpush3.bf16.msra.mxu0 %v4520_v7  ;;  %4158 = vmatmul.mubr.msk.bf16.vlgmr.msra.gmra.mrb[8].mxu1 %vm906_vm8, %v1237_v13  ;;  %v821_v7 = vsel %vm815_vm0, %v805_v3, 0.0  ;;  %v4574_v3 = vld [vmem:[%s5705_s8 + $0x58] sm:$0xff]  }
  0x6c   : > { %4145 = vmatprep.subr.bf16.mxu0 %v4656_v2  ;;  %4172 = vmatpush3.bf16.msra.mxu1 %v4523_v15  ;;  %v1880_v15 = vsel %vm910_vm1, %v4552_v6, 0  ;;  %v1991_v20 = vpack.c.bf16 %v822_v17, %v821_v7  ;;  %v2430_v6 = vsel %vm910_vm1, %v4576_v11, 0  ;;  %v4611_v11 = vld [vmem:[%s5705_s8 + $0xb0] ss:$0 sps:$4 sm:$0x33]  }
  0x6d   : > { %4173 = vmatprep.subr.bf16.mxu1 %v4656_v2  ;;  %4177 = vmatprep.mubr.msk.bf16.mxu1 %vm4657_vm2, %v4656_v2 }
  0x6e   : > { %v5266_v26 = vrot.slane %v1991_v20, 1  ;;  %v1998_v28 = vshrl.u32 %v1991_v20, 16 }
  0x6f   : > { %4146 = vmatpush3.bf16.msra.mxu0 %v1187_v21  ;;  %v4554_v21 = vld [vmem:[%s5705_s8 + $0x8c] sm:$0xff]  }
  0x70   : > { %4161 = vmatprep.subr.bf16.mxu0 %v4656_v2  ;;  %4174 = vmatpush3.bf16.msra.mxu1 %v4525_v22  ;;  %v2092_v22 = vsel %vm910_vm1, %v4557_v16, 0  ;;  %v4580_v16 = vld [vmem:[%s5705_s8 + $0x80] sm:$0xff]  }
  0x71   : > { %4175 = vmatprep.subr.bf16.mxu1 %v4656_v2 }
  0x72   : > { %4148 = vmatmul.mubr.msk.bf16.vlgmr.msra.gmra.mrb[8].mxu0 %vm906_vm8, %v1167_v23 }
  0x73   : > { %4162 = vmatpush3.bf16.msra.mxu0 %v4524_v24  ;;  %4167 = vmatprep.mubr.msk.bf16.mxu0 %vm4657_vm2, %v4656_v2  ;;  %v2000_v24 = vshll.u32 %v1991_v20, 16  ;;  %v4583_v20 = vld [vmem:[%s5705_s8 + $0x14] sm:$0xff]  }
  0x74   : > { %4163 = vmatprep.subr.bf16.mxu0 %v4656_v2  ;;  %4176 = vmatpush3.bf16.msra.mxu1 %v1402_v27  ;;  %v4559_v27 = vld [vmem:[%s5705_s8] sm:$0xff]  }
  0x75   : > { %4191 = vmatprep.subr.bf16.mxu1 %v4656_v2 }
  0x77   : > { %4164 = vmatpush3.bf16.msra.mxu0 %v4526_v29  ;;  %4178 = vmatmul.mubr.msk.bf16.vlgmr.msra.gmra.mrb[12].mxu1 %vm906_vm8, %v5063_v30  ;;  %v2002_v29 = vrot.slane %v2000_v24, 1 }
  0x78   : > { %4165 = vmatprep.subr.bf16.mxu0 %v4656_v2  ;;  %4192 = vmatpush3.bf16.msra.mxu1 %v4529_v31  ;;  %v2023_v31 = vsel %vm910_vm1, %v4558_v25, 0  ;;  %v4584_v25 = vld [vmem:[%s5705_s8 + $0xa0] sm:$0xff]  }
  0x79   : > { %4193 = vmatprep.subr.bf16.mxu1 %v4656_v2  ;;  %4197 = vmatprep.mubr.msk.bf16.mxu1 %vm4657_vm2, %v4656_v2  ;;  %v5286_v34 = vor.u32 %v2002_v29, %v1998_v28  ;;  %v4586_v28 = vld [vmem:[%s5705_s8 + $0xa8] sm:$0xff]   ;;  %v4588_v29 = vld [vmem:[%s5705_s8 + $0xb0] ss:$0 sps:$4 sm:$0x33]  }
  0x7b   : > { %4166 = vmatpush3.bf16.msra.mxu0 %v1326_v32  ;;  %v4561_v32 = vld [vmem:[%s5705_s8 + $0x8] sm:$0xff]  }
  0x7c   : > { %4181 = vmatprep.subr.bf16.mxu0 %v4656_v2  ;;  %4194 = vmatpush3.bf16.msra.mxu1 %v4531_v33  ;;  %v4563_v33 = vld [vmem:[%s5705_s8 + $0x10] ss:$0 sps:$4 sm:$0x33]  }
  0x7d   : > { %4195 = vmatprep.subr.bf16.mxu1 %v4656_v2 }
  0x7e   : > { %4168 = vmatmul.mubr.msk.bf16.vlgmr.msra.gmra.mrb[12].mxu0 %vm906_vm8, %v5083_v35 }
  0x7f   : > { %4182 = vmatpush3.bf16.msra.mxu0 %v4530_v36  ;;  %4187 = vmatprep.mubr.msk.bf16.mxu0 %vm4657_vm2, %v4656_v2  ;;  %v4560_v36 = vld [vmem:[%s5705_s8 + $0x14] sm:$0xff]  }
  0x80   : > { %4183 = vmatprep.subr.bf16.mxu0 %v4656_v2  ;;  %4196 = vmatpush3.bf16.msra.mxu1 %v1567_v37  ;;  %v2239_v37 = vsel %vm910_vm1, %v4563_v33, 0  ;;  %v4591_v33 = vld [vmem:[%s5705_s8 + $0x30] sm:$0xff]  }
  0x81   : > { %4211 = vmatprep.subr.bf16.mxu1 %v4656_v2 }
  0x83   : > { %4184 = vmatpush3.bf16.msra.mxu0 %v4532_v38  ;;  %4198 = vmatmul.mubr.msk.bf16.vlgmr.msra.gmra.mrb[16].mxu1 %vm906_vm8, %v1167_v23  ;;  %v4556_v23 = vld [vmem:[%s5705_s8 + $0x94] sm:$0xff]   ;;  %v4562_v38 = vld [vmem:[%s5705_s8 + $0x1c] sm:$0xff]  }
  0x84   : > { %4185 = vmatprep.subr.bf16.mxu0 %v4656_v2  ;;  %4212 = vmatpush3.bf16.msra.mxu1 %v4535_v40  ;;  %v4565_v40 = vld [vmem:[%s5705_s8 + $0x3c] sm:$0xff]  }
  0x85   : > { %4213 = vmatprep.subr.bf16.mxu1 %v4656_v2  ;;  %4217 = vmatprep.mubr.msk.bf16.mxu1 %vm4657_vm2, %v4656_v2 }
  0x87   : > { %4186 = vmatpush3.bf16.msra.mxu0 %v1472_v42  ;;  %v4567_v42 = vld [vmem:[%s5705_s8 + $0x44] sm:$0xff]  }
  0x88   : > { %4201 = vmatprep.subr.bf16.mxu0 %v4656_v2  ;;  %4214 = vmatpush3.bf16.msra.mxu1 %v4537_v43  ;;  %v4569_v43 = vld [vmem:[%s5705_s8 + $0x4c] ss:$0 sps:$4 sm:$0x33]  }
  0x89   : > { %4215 = vmatprep.subr.bf16.mxu1 %v4656_v2 }
  0x8a   : > { %4188 = vmatmul.mubr.msk.bf16.vlgmr.msra.gmra.mrb[16].mxu0 %vm906_vm8, %v5119_v44 }
  0x8b   : > { %4202 = vmatpush3.bf16.msra.mxu0 %v4536_v45  ;;  %4207 = vmatprep.mubr.msk.bf16.mxu0 %vm4657_vm2, %v4656_v2  ;;  %v823_v45 = vld [vmem:[%s4820_s16] sm:$0xff] }
  0x8c   : > { %4203 = vmatprep.subr.bf16.mxu0 %v4656_v2  ;;  %4216 = vmatpush3.bf16.msra.mxu1 %v1688_v46  ;;  %v4566_v46 = vld [vmem:[%s5705_s8 + $0x28] sm:$0xff]  }
  0x8d   : > { %4231 = vmatprep.subr.bf16.mxu1 %v4656_v2 }
  0x8f   : > { %4204 = vmatpush3.bf16.msra.mxu0 %v4538_v48  ;;  %4218 = vmatmul.mubr.msk.bf16.vlgmr.msra.gmra.mrb[20].mxu1 %vm906_vm8, %v1237_v13  ;;  %v5227_v13 = vpack.c.bf16 %v821_v7, %v821_v7  ;;  %v825_v48 = vmul.f32 %v5339_v47, %v823_v45  ;;  %v4579_v7 = vld [vmem:[%s5705_s8 + $0x94] sm:$0xff]   ;;  %v847_v45 = vld [vmem:[%s4832_s27] sm:$0xff] }
  0x90   : > { %4205 = vmatprep.subr.bf16.mxu0 %v4656_v2  ;;  %4232 = vmatpush3.bf16.msra.mxu1 %v4541_v49 }
  0x91   : > { %4233 = vmatprep.subr.bf16.mxu1 %v4656_v2  ;;  %4237 = vmatprep.mubr.msk.bf16.mxu1 %vm4657_vm2, %v4656_v2 }
  0x93   : > { %4206 = vmatpush3.bf16.msra.mxu0 %v1625_v53  ;;  %v4568_v53 = vld [vmem:[%s5705_s8 + $0x30] sm:$0xff]  }
  0x94   : > { %4221 = vmatprep.subr.bf16.mxu0 %v4656_v2  ;;  %4234 = vmatpush3.bf16.msra.mxu1 %v4543_v50  ;;  %v2366_v50 = vsel %vm910_vm1, %v4569_v43, 0  ;;  %v4597_v43 = vld [vmem:[%s5705_s8 + $0x58] sm:$0xff]  }
  0x95   : > { %4235 = vmatprep.subr.bf16.mxu1 %v4656_v2 }
  0x96   : > { %4208 = vmatmul.mubr.msk.bf16.vlgmr.msra.gmra.mrb[20].mxu0 %vm906_vm8, %v4968_v51  ;;  %v1752_v51 = vsel %vm910_vm1, %v4546_v58, 0  ;;  %v2302_v58 = vsel %vm910_vm1, %v4570_v54, 0 }
  0x97   : > { %4222 = vmatpush3.bf16.msra.mxu0 %v4542_v55  ;;  %4227 = vmatprep.mubr.msk.bf16.mxu0 %vm4657_vm2, %v4656_v2  ;;  %v5362_v55 = vld [vmem:[%s5748_s3] ss:$0 sm:$0xff] }
  0x98   : > { %4223 = vmatprep.subr.bf16.mxu0 %v4656_v2  ;;  %4236 = vmatpush3.bf16.msra.mxu1 %v1816_v57  ;;  %v827_v56 = vadd.f32 %v5362_v55, %v825_v48 }
  0x99   : > { %4251 = vmatprep.subr.bf16.mxu1 %v4656_v2 }
  0x9a   : > { %v829_v60 = vmax.f32 %v827_v56, 0.0  ;;  %v2980_v56 = vsel %vm910_vm1, %v4600_v52, 0 }
  0x9b   : > { %4224 = vmatpush3.bf16.msra.mxu0 %v4544_v59  ;;  %4238 = vmatmul.mubr.msk.bf16.vlgmr.msra.gmra.mrb[24].mxu1 %vm906_vm8, %v5063_v30  ;;  %v4573_v59 = vld [vmem:[%s5705_s8 + $0x6c] sm:$0xff]  }
  0x9c   : > { %4225 = vmatprep.subr.bf16.mxu0 %v4656_v2  ;;  %4252 = vmatpush3.bf16.msra.mxu1 %v4547_v63  ;;  %v4572_v63 = vld [vmem:[%s5705_s8 + $0x50] sm:$0xff]  }
  0x9d   : > { %4253 = vmatprep.subr.bf16.mxu1 %v4656_v2  ;;  %4257 = vmatprep.mubr.msk.bf16.mxu1 %vm4657_vm2, %v4656_v2 }
  0x9f   : > { %4226 = vmatpush3.bf16.msra.mxu0 %v1752_v51  ;;  %v845_v51 = vsel %vm839_vm7, %v829_v60, 0.0 }
  0xa0   : > { %4241 = vmatprep.subr.bf16.mxu0 %v4656_v2  ;;  %4254 = vmatpush3.bf16.msra.mxu1 %v4549_v1  ;;  %v2494_v1 = vsel %vm910_vm1, %v4575_v62, 0  ;;  %v5458_v24 = vpack.c.bf16 %v845_v51, %v845_v51 }
  0xa1   : > { %4255 = vmatprep.subr.bf16.mxu1 %v4656_v2 }
  0xa2   : > { %4228 = vmatmul.mubr.msk.bf16.vlgmr.msra.gmra.mrb[24].mxu0 %vm906_vm8, %v5083_v35 }
  0xa3   : > { %4242 = vmatpush3.bf16.msra.mxu0 %v4548_v5  ;;  %4247 = vmatprep.mubr.msk.bf16.mxu0 %vm4657_vm2, %v4656_v2 }
  0xa4   : > { %4243 = vmatprep.subr.bf16.mxu0 %v4656_v2  ;;  %4256 = vmatpush3.bf16.msra.mxu1 %v1948_v8  ;;  %v4581_v8 = vld [vmem:[%s5705_s8 + $0x9c] ss:$0 sps:$4 sm:$0x33]  }
  0xa5   : > { %4271 = vmatprep.subr.bf16.mxu1 %v4656_v2 }
  0xa7   : > { %4244 = vmatpush3.bf16.msra.mxu0 %v4550_v12  ;;  %4258 = vmatmul.mubr.msk.bf16.vlgmr.msra.gmra.mrb[28].mxu1 %vm906_vm8, %v5227_v13  ;;  %v4578_v12 = vld [vmem:[%s5705_s8 + $0x78] sm:$0xff]  }
  0xa8   : > { %4245 = vmatprep.subr.bf16.mxu0 %v4656_v2  ;;  %4272 = vmatpush3.bf16.msra.mxu1 %v4553_v14 }
  0xa9   : > { %4273 = vmatprep.subr.bf16.mxu1 %v4656_v2  ;;  %4277 = vmatprep.mubr.msk.bf16.mxu1 %vm4657_vm2, %v4656_v2 }
  0xab   : > { %4246 = vmatpush3.bf16.msra.mxu0 %v1880_v15  ;;  %v2637_v15 = vsel %vm910_vm1, %v4581_v8, 0  ;;  %v4610_v8 = vld [vmem:[%s5705_s8 + $0x94] sm:$0xff]  }
  0xac   : > { %4261 = vmatprep.subr.bf16.mxu0 %v4656_v2  ;;  %4274 = vmatpush3.bf16.msra.mxu1 %v4555_v19  ;;  %v4582_v19 = vld [vmem:[%s5705_s8 + $0x88] ss:$0 sps:$4 sm:$0x33]  }
  0xad   : > { %4275 = vmatprep.subr.bf16.mxu1 %v4656_v2 }
  0xae   : > { %4248 = vmatmul.mubr.msk.bf16.vlgmr.msra.gmra.mrb[28].mxu0 %vm906_vm8, %v5119_v44 }
  0xaf   : > { %4262 = vmatpush3.bf16.msra.mxu0 %v4554_v21  ;;  %4267 = vmatprep.mubr.msk.bf16.mxu0 %vm4657_vm2, %v4656_v2  ;;  %v2562_v21 = vsel %vm910_vm1, %v4582_v19, 0 }
  0xb0   : > { %4263 = vmatprep.subr.bf16.mxu0 %v4656_v2  ;;  %4276 = vmatpush3.bf16.msra.mxu1 %v2092_v22  ;;  %v4585_v22 = vld [vmem:[%s5705_s8 + $0x1c] sm:$0xff]  }
  0xb1   : > { %4291 = vmatprep.subr.bf16.mxu1 %v4656_v2 }
  0xb3   : > { %4264 = vmatpush3.bf16.msra.mxu0 %v4556_v23  ;;  %4278 = vmatmul.mubr.msk.bf16.vlgmr.msra.gmra.mrb[32].mxu1 %vm906_vm8, %v5266_v26  ;;  %v4587_v23 = vld [vmem:[%s5705_s8 + $0x24] ss:$0 sps:$4 sm:$0x33]  }
  0xb4   : > { %4265 = vmatprep.subr.bf16.mxu0 %v4656_v2  ;;  %4292 = vmatpush3.bf16.msra.mxu1 %v4559_v27  ;;  %v2795_v27 = vsel %vm910_vm1, %v4587_v23, 0 }
  0xb5   : > { %4293 = vmatprep.subr.bf16.mxu1 %v4656_v2  ;;  %4297 = vmatprep.mubr.msk.bf16.mxu1 %vm4657_vm2, %v4656_v2 }
  0xb7   : > { %4266 = vmatpush3.bf16.msra.mxu0 %v2023_v31  ;;  %v4589_v31 = vld [vmem:[%s5705_s8 + $0x28] sm:$0xff]  }
  0xb8   : > { %4281 = vmatprep.subr.bf16.mxu0 %v4656_v2  ;;  %4294 = vmatpush3.bf16.msra.mxu1 %v4561_v32  ;;  %v2706_v32 = vsel %vm910_vm1, %v4588_v29, 0 }
  0xb9   : > { %4295 = vmatprep.subr.bf16.mxu1 %v4656_v2 }
  0xba   : > { %4268 = vmatmul.mubr.msk.bf16.vlgmr.msra.gmra.mrb[32].mxu0 %vm906_vm8, %v5286_v34 }
  0xbb   : > { %4282 = vmatpush3.bf16.msra.mxu0 %v4560_v36  ;;  %4287 = vmatprep.mubr.msk.bf16.mxu0 %vm4657_vm2, %v4656_v2  ;;  %v4593_v36 = vld [vmem:[%s5705_s8 + $0x38] ss:$0 sps:$4 sm:$0x33]  }
  0xbc   : > { %4283 = vmatprep.subr.bf16.mxu0 %v4656_v2  ;;  %4296 = vmatpush3.bf16.msra.mxu1 %v2239_v37  ;;  %v4590_v37 = vld [vmem:[%s5705_s8] sm:$0xff]  }
  0xbd   : > { %4311 = vmatprep.subr.bf16.mxu1 %v4656_v2 }
  0xbf   : > { %4284 = vmatpush3.bf16.msra.mxu0 %v4562_v38  ;;  %4298 = vmatmul.mubr.msk.bf16.vlgmr.msra.gmra.mrb[36].mxu1 %vm906_vm8, %v5083_v35  ;;  %v824_v35 = vld [vmem:[%s4820_s16 + $0x8] sm:$0x3]  ;;  %v2916_v38 = vsel %vm910_vm1, %v4593_v36, 0 }
  0xc0   : > { %4285 = vmatprep.subr.bf16.mxu0 %v4656_v2  ;;  %4312 = vmatpush3.bf16.msra.mxu1 %v4565_v40  ;;  %v826_v49 = vmul.f32 %v5339_v47, %v824_v35  ;;  %v4594_v40 = vld [vmem:[%s5705_s8 + $0x10] ss:$0 sps:$4 sm:$0x33]   ;;  %v4596_v35 = vld [vmem:[%s5705_s8 + $0x3c] sm:$0xff]  }
  0xc1   : > { %4313 = vmatprep.subr.bf16.mxu1 %v4656_v2  ;;  %4317 = vmatprep.mubr.msk.bf16.mxu1 %vm4657_vm2, %v4656_v2 }
  0xc2   : > { %v828_v57 = vadd.f32 %v5362_v55, %v826_v49  ;;  %v4598_v49 = vld [vmem:[%s5705_s8 + $0x44] sm:$0xff]  }
  0xc3   : > { %4286 = vmatpush3.bf16.msra.mxu0 %v2181_v41  ;;  %v4595_v41 = vld [vmem:[%s5705_s8 + $0x50] sm:$0xff]  }
  0xc4   : > { %4301 = vmatprep.subr.bf16.mxu0 %v4656_v2  ;;  %4314 = vmatpush3.bf16.msra.mxu1 %v4567_v42  ;;  %v830_v61 = vmax.f32 %v828_v57, 0.0  ;;  %v2853_v42 = vsel %vm910_vm1, %v4594_v40, 0  ;;  %v4603_v57 = vld [vmem:[%s5705_s8 + $0x80] sm:$0xff]  }
  0xc5   : > { %4315 = vmatprep.subr.bf16.mxu1 %v4656_v2 }
  0xc6   : > { %4288 = vmatmul.mubr.msk.bf16.vlgmr.msra.gmra.mrb[36].mxu0 %vm906_vm8, %v5063_v30  ;;  %v4571_v30 = vld [vmem:[%s5705_s8 + $0x64] sm:$0xff]   ;;  %v846_v0 = vsel %vm840_vm9, %v830_v61, 0.0 }
  0xc7   : > { %4302 = vmatpush3.bf16.msra.mxu0 %v4566_v46  ;;  %4307 = vmatprep.mubr.msk.bf16.mxu0 %vm4657_vm2, %v4656_v2  ;;  %v5397_v4 = vpack.c.bf16 %v846_v0, %v845_v51  ;;  %v849_v46 = vmul.f32 %v5339_v47, %v847_v45  ;;  %v4606_v51 = vld [vmem:[%s5705_s8 + $0x74] ss:$0 sps:$4 sm:$0x33]   ;;  %v4607_v0 = vld [vmem:[%s5705_s8 + $0xa0] sm:$0xff]  }
  0xc8   : > { %4303 = vmatprep.subr.bf16.mxu0 %v4656_v2  ;;  %4316 = vmatpush3.bf16.msra.mxu1 %v2366_v50  ;;  %v861_v50 = vstv %s3646_s13 }
  0xc9   : > { %4331 = vmatprep.subr.bf16.mxu1 %v4656_v2  ;;  %v2614_v5 = vshll.u32 %v5397_v4, 16  ;;  %v2612_v9 = vshrl.u32 %v5397_v4, 16  ;;  %v851_v54 = vadd.f32 %v5362_v55, %v849_v46  ;;  %vm862_vm10 = vcmp.eq.s32.totalorder %v861_v50, 1 }
  0xca   : > { %vm863_vm11 = vmand %vm709_vm3, %vm862_vm10 }
  0xcb   : > { %4304 = vmatpush3.bf16.msra.mxu0 %v4568_v53  ;;  %4318 = vmatmul.mubr.msk.bf16.vlgmr.msra.gmra.mrb[40].mxu1 %vm906_vm8, %v5227_v13  ;;  %v2616_v14 = vrot.slane %v2614_v5, 1  ;;  %v848_v53 = vld [vmem:[%s4832_s27 + $0x8] sm:$0x3]  ;;  %vm864_vm3 = vmand %vm712_vm4, %vm862_vm10  ;;  %v4608_v5 = vld [vmem:[%s5705_s8 + $0x8c] sm:$0xff]   ;;  %s5759_s27 = sld [smem:[#allocation18_spill]] }
  0xcc   : > { %4305 = vmatprep.subr.bf16.mxu0 %v4656_v2  ;;  %4332 = vmatpush3.bf16.msra.mxu1 %v4571_v30  ;;  %v850_v30 = vmul.f32 %v5339_v47, %v848_v53  ;;  %v4602_v47 = vld [vmem:[%s5705_s8 + $0x64] sm:$0xff]  }
  0xcd   : > { %4333 = vmatprep.subr.bf16.mxu1 %v4656_v2  ;;  %4337 = vmatprep.mubr.msk.bf16.mxu1 %vm4657_vm2, %v4656_v2  ;;  %v5435_v17 = vor.u32 %v2616_v14, %v2612_v9  ;;  %v4612_v9 = vld [vmem:[%s5705_s8 + $0x9c] ss:$0 sps:$4 sm:$0x33]  }
  0xce   : > { %v852_v60 = vadd.f32 %v5362_v55, %v850_v30 }
  0xcf   : > { %4306 = vmatpush3.bf16.msra.mxu0 %v2302_v58  ;;  %v853_v58 = vmax.f32 %v851_v54, 0.0 }
  0xd0   : > { %4321 = vmatprep.subr.bf16.mxu0 %v4656_v2  ;;  %4334 = vmatpush3.bf16.msra.mxu1 %v4573_v59  ;;  %v4605_v59 = vld [vmem:[%s5705_s8 + $0x88] ss:$0 sps:$4 sm:$0x33]   ;;  %v854_v55 = vmax.f32 %v852_v60, 0.0 }
  0xd1   : > { %4335 = vmatprep.subr.bf16.mxu1 %v4656_v2  ;;  %v869_v61 = vsel %vm863_vm11, %v853_v58, 0.0  ;;  %v3176_v62 = vsel %vm910_vm1, %v4605_v59, 0 }
  0xd2   : > { %4308 = vmatmul.mubr.msk.bf16.vlgmr.msra.gmra.mrb[40].mxu0 %vm906_vm8, %v5119_v44  ;;  %v4577_v44 = vld [vmem:[%s5705_s8 + $0x8c] sm:$0xff]  }
  0xd3   : > { %4322 = vmatpush3.bf16.msra.mxu0 %v4572_v63  ;;  %4327 = vmatprep.mubr.msk.bf16.mxu0 %vm4657_vm2, %v4656_v2  ;;  %v3151_v63 = vpack.c.bf16 %v869_v61, %v869_v61 }
  0xd4   : > { %4323 = vmatprep.subr.bf16.mxu0 %v4656_v2  ;;  %4336 = vmatpush3.bf16.msra.mxu1 %v2494_v1  ;;  %v870_v1 = vsel %vm864_vm3, %v854_v55, 0.0 }
  0xd5   : > { %4351 = vmatprep.subr.bf16.mxu1 %v4656_v2 }
  0xd7   : > { %4324 = vmatpush3.bf16.msra.mxu0 %v4574_v3  ;;  %4338 = vmatmul.mubr.msk.bf16.vlgmr.msra.gmra.mrb[44].mxu1 %vm906_vm8, %v5266_v26  ;;  %v3108_v3 = vsel %vm910_vm1, %v4606_v51, 0 }
  0xd8   : > { %4325 = vmatprep.subr.bf16.mxu0 %v4656_v2  ;;  %4352 = vmatpush3.bf16.msra.mxu1 %v4577_v44  ;;  %v3219_v44 = vpack.c.bf16 %v870_v1, %v869_v61 }
  0xd9   : > { %4353 = vmatprep.subr.bf16.mxu1 %v4656_v2  ;;  %4357 = vmatprep.mubr.msk.bf16.mxu1 %vm4657_vm2, %v4656_v2 }
  0xdb   : > { %4326 = vmatpush3.bf16.msra.mxu0 %v2430_v6  ;;  %v3320_v6 = vsel %vm910_vm1, %v4611_v11, 0 }
  0xdc   : > { %4341 = vmatprep.subr.bf16.mxu0 %v4656_v2  ;;  %4354 = vmatpush3.bf16.msra.mxu1 %v4579_v7  ;;  %v3228_v7 = vshll.u32 %v3219_v44, 16 }
  0xdd   : > { %4355 = vmatprep.subr.bf16.mxu1 %v4656_v2 }
  0xde   : > { %4328 = vmatmul.mubr.msk.bf16.vlgmr.msra.gmra.mrb[44].mxu0 %vm906_vm8, %v5286_v34  ;;  %v3230_v14 = vrot.slane %v3228_v7, 1 }
  0xdf   : > { %4342 = vmatpush3.bf16.msra.mxu0 %v4578_v12  ;;  %4347 = vmatprep.mubr.msk.bf16.mxu0 %vm4657_vm2, %v4656_v2  ;;  %v3300_v12 = vrot.slane %v3219_v44, 1 }
  0xe0   : > { %4343 = vmatprep.subr.bf16.mxu0 %v4656_v2  ;;  %4356 = vmatpush3.bf16.msra.mxu1 %v2637_v15  ;;  %v3251_v15 = vsel %vm910_vm1, %v4612_v9, 0 }
  0xe1   : > { %4371 = vmatprep.subr.bf16.mxu1 %v4656_v2 }
  0xe3   : > { %4344 = vmatpush3.bf16.msra.mxu0 %v4580_v16  ;;  %4358 = vmatmul.mubr.msk.bf16.vlgmr.msra.gmra.mrb[48].mxu1 %vm906_vm8, %v5435_v17 }
  0xe4   : > { %4345 = vmatprep.subr.bf16.mxu0 %v4656_v2  ;;  %4372 = vmatpush3.bf16.msra.mxu1 %v4583_v20 }
  0xe5   : > { %4373 = vmatprep.subr.bf16.mxu1 %v4656_v2  ;;  %4377 = vmatprep.mubr.msk.bf16.mxu1 %vm4657_vm2, %v4656_v2 }
  0xe7   : > { %4346 = vmatpush3.bf16.msra.mxu0 %v2562_v21 }
  0xe8   : > { %4361 = vmatprep.subr.bf16.mxu0 %v4656_v2  ;;  %4374 = vmatpush3.bf16.msra.mxu1 %v4585_v22 }
  0xe9   : > { %4375 = vmatprep.subr.bf16.mxu1 %v4656_v2 }
  0xea   : > { %4348 = vmatmul.mubr.msk.bf16.vlgmr.msra.gmra.mrb[48].mxu0 %vm906_vm8, %v5458_v24 }
  0xeb   : > { %4362 = vmatpush3.bf16.msra.mxu0 %v4584_v25  ;;  %4367 = vmatprep.mubr.msk.bf16.mxu0 %vm4657_vm2, %v4656_v2 }
  0xec   : > { %4363 = vmatprep.subr.bf16.mxu0 %v4656_v2  ;;  %4376 = vmatpush3.bf16.msra.mxu1 %v2795_v27 }
  0xed   : > { %4391 = vmatprep.subr.bf16.mxu1 %v4656_v2 }
  0xef   : > { %4364 = vmatpush3.bf16.msra.mxu0 %v4586_v28  ;;  %4378 = vmatmul.mubr.msk.bf16.vlgmr.msra.gmra.mrb[52].mxu1 %vm906_vm8, %v5286_v34  ;;  %v2686_v34 = vrot.slane %v5397_v4, 1  ;;  %v3226_v4 = vshrl.u32 %v3219_v44, 16 }
  0xf0   : > { %4365 = vmatprep.subr.bf16.mxu0 %v4656_v2  ;;  %4392 = vmatpush3.bf16.msra.mxu1 %v4589_v31 }
  0xf1   : > { %4393 = vmatprep.subr.bf16.mxu1 %v4656_v2  ;;  %4397 = vmatprep.mubr.msk.bf16.mxu1 %vm4657_vm2, %v4656_v2  ;;  %v3231_v16 = vor.u32 %v3230_v14, %v3226_v4 }
  0xf3   : > { %4366 = vmatpush3.bf16.msra.mxu0 %v2706_v32 }
  0xf4   : > { %4381 = vmatprep.subr.bf16.mxu0 %v4656_v2  ;;  %4394 = vmatpush3.bf16.msra.mxu1 %v4591_v33 }
  0xf5   : > { %4395 = vmatprep.subr.bf16.mxu1 %v4656_v2 }
  0xf6   : > { %4368 = vmatmul.mubr.msk.bf16.vlgmr.msra.gmra.mrb[52].mxu0 %vm906_vm8, %v2686_v34 }
  0xf7   : > { %4382 = vmatpush3.bf16.msra.mxu0 %v4590_v37  ;;  %4387 = vmatprep.mubr.msk.bf16.mxu0 %vm4657_vm2, %v4656_v2 }
  0xf8   : > { %4383 = vmatprep.subr.bf16.mxu0 %v4656_v2  ;;  %4396 = vmatpush3.bf16.msra.mxu1 %v2916_v38 }
  0xf9   : > { %4411 = vmatprep.subr.bf16.mxu1 %v4656_v2 }
  0xfb   : > { %4384 = vmatpush3.bf16.msra.mxu0 %v4592_v39  ;;  %4398 = vmatmul.mubr.msk.bf16.vlgmr.msra.gmra.mrb[56].mxu1 %vm906_vm8, %v5266_v26  ;;  %v4599_v26 = vld [vmem:[%s5705_s8 + $0x60] ss:$0 sps:$4 sm:$0x33]  }
  0xfc   : > { %4385 = vmatprep.subr.bf16.mxu0 %v4656_v2  ;;  %4412 = vmatpush3.bf16.msra.mxu1 %v4595_v41  ;;  %v3044_v48 = vsel %vm910_vm1, %v4599_v26, 0  ;;  %vm1522_vm1 = vcmask 64512  }
  0xfd   : > { %4413 = vmatprep.subr.bf16.mxu1 %v4656_v2  ;;  %4417 = vmatprep.mubr.msk.bf16.mxu1 %vm4657_vm2, %v4656_v2 }
  0xff   : > { %4386 = vmatpush3.bf16.msra.mxu0 %v2853_v42 }
 0x100   : > { %4401 = vmatprep.subr.bf16.mxu0 %v4656_v2  ;;  %4414 = vmatpush3.bf16.msra.mxu1 %v4597_v43 }
 0x101   : > { %4415 = vmatprep.subr.bf16.mxu1 %v4656_v2 }
 0x102   : > { %4388 = vmatmul.mubr.msk.bf16.vlgmr.msra.gmra.mrb[56].mxu0 %vm906_vm8, %v5227_v13  ;;  %v4601_v13 = vld [vmem:[%s5705_s8 + $0x78] sm:$0xff]  }
 0x103   : > { %4402 = vmatpush3.bf16.msra.mxu0 %v4596_v35  ;;  %4407 = vmatprep.mubr.msk.bf16.mxu0 %vm4657_vm2, %v4656_v2 }
 0x104   : > { %4403 = vmatprep.subr.bf16.mxu0 %v4656_v2  ;;  %4416 = vmatpush3.bf16.msra.mxu1 %v3044_v48 }
 0x105   : > { %4431 = vmatprep.subr.bf16.mxu1 %v4656_v2 }
 0x107   : > { %4404 = vmatpush3.bf16.msra.mxu0 %v4598_v49  ;;  %4418 = vmatmul.mubr.msk.bf16.vlgmr.msra.gmra.mrb[60].mxu1 %vm906_vm8, %v5435_v17 }
 0x108   : > { %4405 = vmatprep.subr.bf16.mxu0 %v4656_v2  ;;  %4432 = vmatpush3.bf16.msra.mxu1 %v4601_v13 }
 0x109   : > { %4433 = vmatprep.subr.bf16.mxu1 %v4656_v2  ;;  %4437 = vmatprep.mubr.msk.bf16.mxu1 %vm4657_vm2, %v4656_v2 }
 0x10b   : > { %4406 = vmatpush3.bf16.msra.mxu0 %v2980_v56 }
 0x10c   : > { %4421 = vmatprep.subr.bf16.mxu0 %v4656_v2  ;;  %4434 = vmatpush3.bf16.msra.mxu1 %v4603_v57 }
 0x10d   : > { %4435 = vmatprep.subr.bf16.mxu1 %v4656_v2 }
 0x10e   : > { %4408 = vmatmul.mubr.msk.bf16.vlgmr.msra.gmra.mrb[60].mxu0 %vm906_vm8, %v5458_v24 }
 0x10f   : > { %4422 = vmatpush3.bf16.msra.mxu0 %v4602_v47  ;;  %4427 = vmatprep.mubr.msk.bf16.mxu0 %vm4657_vm2, %v4656_v2 }
 0x110   : > { %4423 = vmatprep.subr.bf16.mxu0 %v4656_v2  ;;  %4436 = vmatpush3.bf16.msra.mxu1 %v3176_v62  ;;  %v5642_v62 = vld [vmem:[%s5759_s27] ss:$0 sm:$0xff] }
 0x111   : > { %4451 = vmatprep.subr.bf16.mxu1 %v4656_v2 }
 0x113   : > { %4424 = vmatpush3.bf16.msra.mxu0 %v4604_v10  ;;  %4438 = vmatmul.mubr.msk.bf16.vlgmr.msra.gmra.mrb[64].mxu1 %vm906_vm8, %v3151_v63 }
 0x114   : > { %4425 = vmatprep.subr.bf16.mxu0 %v4656_v2  ;;  %4452 = vmatpush3.bf16.msra.mxu1 %v4607_v0 }
 0x115   : > { %4453 = vmatprep.subr.bf16.mxu1 %v4656_v2  ;;  %4457 = vmatprep.mubr.msk.bf16.mxu1 %vm4657_vm2, %v4656_v2 }
 0x117   : > { %4426 = vmatpush3.bf16.msra.mxu0 %v3108_v3 }
 0x118   : > { %4441 = vmatprep.subr.bf16.mxu0 %v4656_v2  ;;  %4454 = vmatpush3.bf16.msra.mxu1 %v4609_v18 }
 0x119   : > { %4455 = vmatprep.subr.bf16.mxu1 %v4656_v2 }
 0x11a   : > { %4428 = vmatmul.mubr.msk.bf16.vlgmr.msra.gmra.mrb[64].mxu0 %vm906_vm8, %v2686_v34 }
 0x11b   : > { %4442 = vmatpush3.bf16.msra.mxu0 %v4608_v5  ;;  %4447 = vmatprep.mubr.msk.bf16.mxu0 %vm4657_vm2, %v4656_v2  ;;  %vm3385_vm2 = vcmask 57344  }
 0x11c   : > { %4443 = vmatprep.subr.bf16.mxu0 %v4656_v2  ;;  %4456 = vmatpush3.bf16.msra.mxu1 %v3320_v6 }
 0x11f   : > { %4444 = vmatpush3.bf16.msra.mxu0 %v4610_v8  ;;  %4458 = vmatmul.mubr.msk.bf16.vlgmr.msra.gmra.mrb[68].mxu1 %vm906_vm8, %v3300_v12 }
 0x120   : > { %4445 = vmatprep.subr.bf16.mxu0 %v4656_v2 }
 0x123   : > { %4446 = vmatpush3.bf16.msra.mxu0 %v3251_v15 }
 0x126   : > { %4448 = vmatmul.mubr.msk.bf16.vlgmr.msra.gmra.mrb[68].mxu0 %vm906_vm8, %v3231_v16  ;;  %v1009_v17 = vpop.f32.mrb[0].mxu1 }
 0x127   : > { %v4119_v19 = vpop.f32.mrb[1].mxu1 }
 0x128   : > { %v1012_v20 = vpop.f32.mrb[2].mxu1 }
 0x129   : > { %v4120_v21 = vpop.f32.mrb[3].mxu1 }
 0x12d   : > { %v948_v22 = vpop.f32.mrb[0].mxu0 }
 0x12e   : > { %v1010_v23 = vadd.f32 %v1009_v17, %v948_v22  ;;  %v4109_v24 = vpop.f32.mrb[1].mxu0 }
 0x12f   : > { %v951_v25 = vpop.f32.mrb[2].mxu0 }
 0x130   : > { %v4110_v27 = vpop.f32.mrb[3].mxu0 }
 0x132   : > { %v1147_v28 = vpop.f32.mrb[4].mxu1 }
 0x133   : > { %v4139_v29 = vpop.f32.mrb[5].mxu1 }
 0x134   : > { %v1150_v31 = vpop.f32.mrb[6].mxu1 }
 0x135   : > { %v4140_v32 = vpop.f32.mrb[7].mxu1 }
 0x139   : > { %v1078_v2 = vpop.f32.mrb[4].mxu0 }
 0x13a   : > { %v1084_v33 = vadd.f32 %v1078_v2, %v1010_v23  ;;  %v4129_v36 = vpop.f32.mrb[5].mxu0 }
 0x13b   : > { %v1081_v34 = vpop.f32.mrb[6].mxu0 }
 0x13c   : > { %v1153_v37 = vadd.f32 %v1147_v28, %v1084_v33  ;;  %v4130_v38 = vpop.f32.mrb[7].mxu0 }
 0x13e   : > { %v1293_v39 = vpop.f32.mrb[8].mxu1 }
 0x13f   : > { %v4159_v40 = vpop.f32.mrb[9].mxu1 }
 0x140   : > { %v1296_v41 = vpop.f32.mrb[10].mxu1 }
 0x141   : > { %v4160_v42 = vpop.f32.mrb[11].mxu1 }
 0x145   : > { %v1223_v43 = vpop.f32.mrb[8].mxu0 }
 0x146   : > { %v1229_v26 = vadd.f32 %v1223_v43, %v1153_v37  ;;  %v4149_v45 = vpop.f32.mrb[9].mxu0 }
 0x147   : > { %v1226_v35 = vpop.f32.mrb[10].mxu0 }
 0x148   : > { %v1299_v46 = vadd.f32 %v1293_v39, %v1229_v26  ;;  %v4150_v48 = vpop.f32.mrb[11].mxu0 }
 0x14a   : > { %v1438_v49 = vpop.f32.mrb[12].mxu1 }
 0x14b   : > { %v4179_v50 = vpop.f32.mrb[13].mxu1 }
 0x14c   : > { %v1441_v52 = vpop.f32.mrb[14].mxu1 }
 0x14d   : > { %v4180_v13 = vpop.f32.mrb[15].mxu1 }
 0x151   : > { %v1362_v53 = vpop.f32.mrb[12].mxu0 }
 0x152   : > { %v1368_v54 = vadd.f32 %v1362_v53, %v1299_v46  ;;  %v4169_v30 = vpop.f32.mrb[13].mxu0 }
 0x153   : > { %v1365_v56 = vpop.f32.mrb[14].mxu0 }
 0x154   : > { %v1444_v57 = vadd.f32 %v1438_v49, %v1368_v54  ;;  %v4170_v58 = vpop.f32.mrb[15].mxu0 }
 0x156   : > { %v1603_v59 = vpop.f32.mrb[16].mxu1 }
 0x157   : > { %v4199_v47 = vpop.f32.mrb[17].mxu1 }
 0x158   : > { %v1606_v60 = vpop.f32.mrb[18].mxu1 }
 0x159   : > { %v4200_v61 = vpop.f32.mrb[19].mxu1 }
 0x15d   : > { %v1508_v10 = vpop.f32.mrb[16].mxu0 }
 0x15e   : > { %v1514_v55 = vadd.f32 %v1508_v10, %v1444_v57  ;;  %v4189_v63 = vpop.f32.mrb[17].mxu0 }
 0x15f   : > { %v1511_v51 = vpop.f32.mrb[18].mxu0 }
 0x160   : > { %v1521_v0 = vadd.f32 %v5642_v62, %v1514_v55  ;;  %v4190_v1 = vpop.f32.mrb[19].mxu0 }
 0x162   : > { %1523 = vst.msk [vmem:[%s4837_s2] sm:$0xff] %vm1522_vm1, %v1521_v0  ;;  %v1724_v3 = vpop.f32.mrb[20].mxu1  ;;  %v1532_v34 = vmul.f32 %v1521_v0, %v1521_v0  ;;  %v1524_v39 = vsel %vm1522_vm1, %v1521_v0, 0.0 }
 0x163   : > { %v4219_v18 = vpop.f32.mrb[21].mxu1  ;;  %v1525_v43 = vrot.slane %v1524_v39, 4 }
 0x164   : > { %v1727_v11 = vpop.f32.mrb[22].mxu1  ;;  %v1533_v42 = vsel %vm1522_vm1, %v1532_v34, 0.0 }
 0x165   : > { %v4220_v44 = vpop.f32.mrb[23].mxu1  ;;  %v1534_v26 = vrot.slane %v1533_v42, 4  ;;  %v1526_v48 = vadd.f32 %v1525_v43, %v1524_v39 }
 0x167   : > { %v1535_v13 = vadd.f32 %v1534_v26, %v1533_v42  ;;  %v1527_v30 = vrot.slane %v1526_v48, 2 }
 0x169   : > { %v1661_v5 = vpop.f32.mrb[20].mxu0  ;;  %v1536_v47 = vrot.slane %v1535_v13, 2  ;;  %v1528_v55 = vadd.f32 %v1527_v30, %v1526_v48 }
 0x16a   : > { %v1662_v6 = vadd.f32 %v1661_v5, %v1603_v59  ;;  %v4209_v7 = vpop.f32.mrb[21].mxu0 }
 0x16b   : > { %v1664_v8 = vpop.f32.mrb[22].mxu0  ;;  %v1537_v0 = vadd.f32 %v1536_v47, %v1535_v13  ;;  %v1529_v5 = vrot.slane %v1528_v55, 1 }
 0x16c   : > { %v1730_v12 = vadd.f32 %v1724_v3, %v1662_v6  ;;  %v4210_v9 = vpop.f32.mrb[23].mxu0 }
 0x16d   : > { %v1538_v9 = vrot.slane %v1537_v0, 1 }
 0x16e   : > { %v1852_v4 = vpop.f32.mrb[24].mxu1 }
 0x16f   : > { %v4239_v14 = vpop.f32.mrb[25].mxu1 }
 0x170   : > { %v1855_v15 = vpop.f32.mrb[26].mxu1 }
 0x171   : > { %v4240_v16 = vpop.f32.mrb[27].mxu1 }
 0x172   : > { %v1530_v16 = vadd.f32 %v1529_v5, %v1528_v55 }
 0x175   : > { %v1788_v17 = vpop.f32.mrb[24].mxu0 }
 0x176   : > { %v1794_v19 = vadd.f32 %v1788_v17, %v1730_v12  ;;  %v4229_v20 = vpop.f32.mrb[25].mxu0 }
 0x177   : > { %v1791_v21 = vpop.f32.mrb[26].mxu0 }
 0x178   : > { %v1858_v22 = vadd.f32 %v1852_v4, %v1794_v19  ;;  %v4230_v23 = vpop.f32.mrb[27].mxu0 }
 0x17a   : > { %v1984_v24 = vpop.f32.mrb[28].mxu1 }
 0x17b   : > { %v4259_v25 = vpop.f32.mrb[29].mxu1 }
 0x17c   : > { %v1987_v27 = vpop.f32.mrb[30].mxu1 }
 0x17d   : > { %v4260_v28 = vpop.f32.mrb[31].mxu1 }
 0x181   : > { %v1916_v29 = vpop.f32.mrb[28].mxu0 }
 0x182   : > { %v1922_v31 = vadd.f32 %v1916_v29, %v1858_v22  ;;  %v4249_v32 = vpop.f32.mrb[29].mxu0  ;;  %v1539_v22 = vadd.f32 %v1538_v9, %v1537_v0 }
 0x183   : > { %v1919_v2 = vpop.f32.mrb[30].mxu0 }
 0x184   : > { %v1990_v33 = vadd.f32 %v1984_v24, %v1922_v31  ;;  %v4250_v36 = vpop.f32.mrb[31].mxu0 }
 0x186   : > { %v2128_v37 = vpop.f32.mrb[32].mxu1 }
 0x187   : > { %v4279_v38 = vpop.f32.mrb[33].mxu1 }
 0x188   : > { %v2131_v40 = vpop.f32.mrb[34].mxu1 }
 0x189   : > { %v4280_v41 = vpop.f32.mrb[35].mxu1 }
 0x18d   : > { %v2059_v45 = vpop.f32.mrb[32].mxu0 }
 0x18e   : > { %v2065_v35 = vadd.f32 %v2059_v45, %v1990_v33  ;;  %v4269_v46 = vpop.f32.mrb[33].mxu0 }
 0x18f   : > { %v2062_v49 = vpop.f32.mrb[34].mxu0 }
 0x190   : > { %v2134_v50 = vadd.f32 %v2128_v37, %v2065_v35  ;;  %v4270_v52 = vpop.f32.mrb[35].mxu0 }
 0x192   : > { %v2135_v53 = vadd.f32 %v5642_v62, %v2134_v50  ;;  %v2275_v54 = vpop.f32.mrb[36].mxu1 }
 0x193   : > { %v4299_v56 = vpop.f32.mrb[37].mxu1 }
 0x194   : > { %3800 = vst.msk [vmem:[%s4837_s2 + $0x8] sm:$0xff] %vm1522_vm1, %v2135_v53  ;;  %v2138_v57 = vsel %vm1522_vm1, %v2135_v53, 0.0  ;;  %v2146_v58 = vmul.f32 %v2135_v53, %v2135_v53  ;;  %v2278_v59 = vpop.f32.mrb[38].mxu1 }
 0x195   : > { %v2139_v60 = vrot.slane %v2138_v57, 4  ;;  %v4300_v61 = vpop.f32.mrb[39].mxu1 }
 0x196   : > { %v2147_v10 = vsel %vm1522_vm1, %v2146_v58, 0.0 }
 0x197   : > { %v2140_v63 = vadd.f32 %v2139_v60, %v2138_v57  ;;  %v2148_v51 = vrot.slane %v2147_v10, 4 }
 0x199   : > { %v2141_v1 = vrot.slane %v2140_v63, 2  ;;  %v2149_v3 = vadd.f32 %v2148_v51, %v2147_v10  ;;  %v2217_v18 = vpop.f32.mrb[36].mxu0 }
 0x19a   : > { %v2276_v11 = vadd.f32 %v2275_v54, %v2217_v18  ;;  %v4289_v44 = vpop.f32.mrb[37].mxu0 }
 0x19b   : > { %v2142_v6 = vadd.f32 %v2141_v1, %v2140_v63  ;;  %v2150_v7 = vrot.slane %v2149_v3, 2  ;;  %v2220_v8 = vpop.f32.mrb[38].mxu0 }
 0x19c   : > { %v4290_v12 = vpop.f32.mrb[39].mxu0 }
 0x19d   : > { %v2143_v4 = vrot.slane %v2142_v6, 1  ;;  %v2151_v14 = vadd.f32 %v2150_v7, %v2149_v3 }
 0x19e   : > { %v2402_v15 = vpop.f32.mrb[40].mxu1 }
 0x19f   : > { %v2144_v17 = vadd.f32 %v2143_v4, %v2142_v6  ;;  %v2152_v19 = vrot.slane %v2151_v14, 1  ;;  %v4319_v20 = vpop.f32.mrb[41].mxu1 }
 0x1a0   : > { %v2405_v21 = vpop.f32.mrb[42].mxu1 }
 0x1a1   : > { %v5654_v23 = vadd.f32 %v2144_v17, %v1530_v16  ;;  %v2153_v24 = vadd.f32 %v2152_v19, %v2151_v14  ;;  %v4320_v25 = vpop.f32.mrb[43].mxu1 }
 0x1a3   : > { %v5656_v27 = vadd.f32 %v2153_v24, %v1539_v22 }
 0x1a5   : > { %v2338_v28 = vpop.f32.mrb[40].mxu0 }
 0x1a6   : > { %v2344_v29 = vadd.f32 %v2338_v28, %v2276_v11  ;;  %v4309_v31 = vpop.f32.mrb[41].mxu0 }
 0x1a7   : > { %v2341_v32 = vpop.f32.mrb[42].mxu0 }
 0x1a8   : > { %v2408_v2 = vadd.f32 %v2402_v15, %v2344_v29  ;;  %v4310_v33 = vpop.f32.mrb[43].mxu0 }
 0x1aa   : > { %v2530_v36 = vpop.f32.mrb[44].mxu1 }
 0x1ab   : > { %v4339_v34 = vpop.f32.mrb[45].mxu1 }
 0x1ac   : > { %v2533_v37 = vpop.f32.mrb[46].mxu1 }
 0x1ad   : > { %v4340_v38 = vpop.f32.mrb[47].mxu1 }
 0x1b1   : > { %v2466_v39 = vpop.f32.mrb[44].mxu0 }
 0x1b2   : > { %v2472_v40 = vadd.f32 %v2466_v39, %v2408_v2  ;;  %v4329_v41 = vpop.f32.mrb[45].mxu0 }
 0x1b3   : > { %v2469_v42 = vpop.f32.mrb[46].mxu0 }
 0x1b4   : > { %v2536_v43 = vadd.f32 %v2530_v36, %v2472_v40  ;;  %v4330_v26 = vpop.f32.mrb[47].mxu0 }
 0x1b6   : > { %v2673_v45 = vpop.f32.mrb[48].mxu1 }
 0x1b7   : > { %v4359_v35 = vpop.f32.mrb[49].mxu1 }
 0x1b8   : > { %v2676_v46 = vpop.f32.mrb[50].mxu1 }
 0x1b9   : > { %v4360_v48 = vpop.f32.mrb[51].mxu1 }
 0x1bd   : > { %v2598_v49 = vpop.f32.mrb[48].mxu0 }
 0x1be   : > { %v2604_v50 = vadd.f32 %v2598_v49, %v2536_v43  ;;  %v4349_v52 = vpop.f32.mrb[49].mxu0 }
 0x1bf   : > { %v2601_v13 = vpop.f32.mrb[50].mxu0 }
 0x1c0   : > { %v2679_v53 = vadd.f32 %v2673_v45, %v2604_v50  ;;  %v4350_v54 = vpop.f32.mrb[51].mxu0 }
 0x1c2   : > { %v2831_v30 = vpop.f32.mrb[52].mxu1 }
 0x1c3   : > { %v4379_v56 = vpop.f32.mrb[53].mxu1 }
 0x1c4   : > { %v2834_v57 = vpop.f32.mrb[54].mxu1 }
 0x1c5   : > { %v4380_v58 = vpop.f32.mrb[55].mxu1 }
 0x1c9   : > { %v2742_v59 = vpop.f32.mrb[52].mxu0 }
 0x1ca   : > { %v2748_v47 = vadd.f32 %v2742_v59, %v2679_v53  ;;  %v4369_v60 = vpop.f32.mrb[53].mxu0 }
 0x1cb   : > { %v2745_v61 = vpop.f32.mrb[54].mxu0 }
 0x1cc   : > { %v2749_v10 = vadd.f32 %v5642_v62, %v2748_v47  ;;  %v4370_v55 = vpop.f32.mrb[55].mxu0 }
 0x1ce   : > { %3877 = vst.msk [vmem:[%s4837_s2 + $0x10] sm:$0xff] %vm1522_vm1, %v2749_v10  ;;  %v2752_v63 = vsel %vm1522_vm1, %v2749_v10, 0.0  ;;  %v2760_v51 = vmul.f32 %v2749_v10, %v2749_v10  ;;  %v2952_v0 = vpop.f32.mrb[56].mxu1 }
 0x1cf   : > { %v2753_v1 = vrot.slane %v2752_v63, 4  ;;  %v4399_v3 = vpop.f32.mrb[57].mxu1 }
 0x1d0   : > { %v2761_v18 = vsel %vm1522_vm1, %v2760_v51, 0.0  ;;  %v2955_v11 = vpop.f32.mrb[58].mxu1 }
 0x1d1   : > { %v2754_v44 = vadd.f32 %v2753_v1, %v2752_v63  ;;  %v2762_v5 = vrot.slane %v2761_v18, 4  ;;  %v4400_v6 = vpop.f32.mrb[59].mxu1 }
 0x1d3   : > { %v2755_v7 = vrot.slane %v2754_v44, 2  ;;  %v2763_v8 = vadd.f32 %v2762_v5, %v2761_v18 }
 0x1d5   : > { %v2756_v12 = vadd.f32 %v2755_v7, %v2754_v44  ;;  %v2764_v9 = vrot.slane %v2763_v8, 2  ;;  %v2889_v4 = vpop.f32.mrb[56].mxu0 }
 0x1d6   : > { %v2890_v14 = vadd.f32 %v2889_v4, %v2831_v30  ;;  %v4389_v15 = vpop.f32.mrb[57].mxu0 }
 0x1d7   : > { %v2757_v16 = vrot.slane %v2756_v12, 1  ;;  %v2765_v17 = vadd.f32 %v2764_v9, %v2763_v8  ;;  %v2892_v19 = vpop.f32.mrb[58].mxu0  ;;  %v3387_v8 = vld [vmem:[%s5709_s12] sm:$0x1] }
 0x1d8   : > { %v2958_v20 = vadd.f32 %v2952_v0, %v2890_v14  ;;  %v4390_v21 = vpop.f32.mrb[59].mxu0 }
 0x1d9   : > { %v2758_v22 = vadd.f32 %v2757_v16, %v2756_v12  ;;  %v2766_v24 = vrot.slane %v2765_v17, 1 }
 0x1da   : > { %v3080_v25 = vpop.f32.mrb[60].mxu1 }
 0x1db   : > { %v2759_v28 = vadd.f32 %v2758_v22, %v5654_v23  ;;  %v2767_v29 = vadd.f32 %v2766_v24, %v2765_v17  ;;  %v4419_v31 = vpop.f32.mrb[61].mxu1 }
 0x1dc   : > { %v3083_v32 = vpop.f32.mrb[62].mxu1 }
 0x1dd   : > { %v2768_v2 = vadd.f32 %v2767_v29, %v5656_v27  ;;  %v4420_v33 = vpop.f32.mrb[63].mxu1 }
 0x1e1   : > { %v3016_v36 = vpop.f32.mrb[60].mxu0 }
 0x1e2   : > { %v3022_v34 = vadd.f32 %v3016_v36, %v2958_v20  ;;  %v4409_v37 = vpop.f32.mrb[61].mxu0 }
 0x1e3   : > { %v3019_v38 = vpop.f32.mrb[62].mxu0 }
 0x1e4   : > { %v3086_v39 = vadd.f32 %v3080_v25, %v3022_v34  ;;  %v4410_v40 = vpop.f32.mrb[63].mxu0 }
 0x1e6   : > { %v3212_v41 = vpop.f32.mrb[64].mxu1 }
 0x1e7   : > { %v4439_v42 = vpop.f32.mrb[65].mxu1 }
 0x1e8   : > { %v3215_v43 = vpop.f32.mrb[66].mxu1 }
 0x1e9   : > { %v4440_v26 = vpop.f32.mrb[67].mxu1 }
 0x1ed   : > { %v3144_v45 = vpop.f32.mrb[64].mxu0 }
 0x1ee   : > { %v3150_v35 = vadd.f32 %v3144_v45, %v3086_v39  ;;  %v4429_v23 = vpop.f32.mrb[65].mxu0 }
 0x1ef   : > { %v3147_v46 = vpop.f32.mrb[66].mxu0 }
 0x1f0   : > { %v3218_v48 = vadd.f32 %v3212_v41, %v3150_v35  ;;  %v4430_v49 = vpop.f32.mrb[67].mxu0 }
 0x1f2   : > { %v3356_v50 = vpop.f32.mrb[68].mxu1 }
 0x1f3   : > { %v4459_v27 = vpop.f32.mrb[69].mxu1 }
 0x1f4   : > { %v3359_v52 = vpop.f32.mrb[70].mxu1 }
 0x1f5   : > { %v4460_v13 = vpop.f32.mrb[71].mxu1 }
 0x1f9   : > { %v3287_v53 = vpop.f32.mrb[68].mxu0 }
 0x1fa   : > { %v3293_v54 = vadd.f32 %v3287_v53, %v3218_v48  ;;  %v4449_v30 = vpop.f32.mrb[69].mxu0 }
 0x1fb   : > { %v3290_v56 = vpop.f32.mrb[70].mxu0 }
 0x1fc   : > { %v3362_v57 = vadd.f32 %v3356_v50, %v3293_v54  ;;  %v4450_v58 = vpop.f32.mrb[71].mxu0 }
 0x1fe   : > { %v3363_v59 = vadd.f32 %v5642_v62, %v3362_v57  ;;  %v3383_v62 = vld [vmem:[%s5708_s11] sm:$0x1] }
 0x200   : > { %3954 = vst.msk [vmem:[%s4837_s2 + $0x18] sm:$0xff] %vm1522_vm1, %v3363_v59  ;;  %v3366_v47 = vsel %vm1522_vm1, %v3363_v59, 0.0  ;;  %v3374_v60 = vmul.f32 %v3363_v59, %v3363_v59 }
 0x201   : > { %v3367_v61 = vrot.slane %v3366_v47, 4 }
 0x202   : > { %v3375_v10 = vsel %vm1522_vm1, %v3374_v60, 0.0 }
 0x203   : > { %v3368_v55 = vadd.f32 %v3367_v61, %v3366_v47  ;;  %v3376_v63 = vrot.slane %v3375_v10, 4 }
 0x205   : > { %v3369_v51 = vrot.slane %v3368_v55, 2  ;;  %v3377_v0 = vadd.f32 %v3376_v63, %v3375_v10 }
 0x207   : > { %v3370_v1 = vadd.f32 %v3369_v51, %v3368_v55  ;;  %v3378_v3 = vrot.slane %v3377_v0, 2 }
 0x209   : > { %v3371_v18 = vrot.slane %v3370_v1, 1  ;;  %v3379_v11 = vadd.f32 %v3378_v3, %v3377_v0 }
 0x20b   : > { %v3372_v44 = vadd.f32 %v3371_v18, %v3370_v1  ;;  %v3380_v5 = vrot.slane %v3379_v11, 1 }
 0x20d   : > { %v3373_v6 = vadd.f32 %v3372_v44, %v2759_v28  ;;  %v3381_v7 = vadd.f32 %v3380_v5, %v3379_v11 }
 0x20f   : > { %v3382_v12 = vadd.f32 %v3381_v7, %v2768_v2  ;;  %v3384_v9 = vadd.f32 %v3383_v62, %v3373_v6 }
 0x211   : > { %3386 = vst.msk [vmem:[%s5708_s11] sm:$0x1] %vm3385_vm2, %v3384_v9  ;;  %v3388_v4 = vadd.f32 %v3387_v8, %v3382_v12 }
 0x213   : > { %3389 = vst.msk [vmem:[%s5709_s12] sm:$0x1] %vm3385_vm2, %v3388_v4 }
 0x214 PF: > { %s5760_s21 = sld [smem:[#allocation4_spill]]  ;;  %s5762_s22 = sld [smem:[#allocation3_spill]] }
 0x215   : > { %s5763_s23 = sld [smem:[#allocation5_spill]]  ;;  %s5764_s24 = sld [smem:[#allocation6_spill]] }
 0x21a   : > { %s23_s25 = sadd.s32 1, %s5760_s21   ;;  %s5761_s21 = sld [smem:[#allocation2_spill]] }
 0x21b   : > { %p20_p6 = scmp.ge.s32.totalorder %s23_s25, 6  }
 0x21d   :  { %22 = sbr.rel (!%p20_p6) target bundleno = 8 (0x8), region = 136 }

// kernel: frru_forward.6
= control target key start
LH: loop header
LB: loop body
LE: loop exit
PB: predicated region body
PF: predicated region fallthrough
CT: control target
= control target key end

     0   :  { %s3727_s25 = smov 0   ;;  %s3729_s26 = smov 0   ;;  %s4366_s0 = inlined_call_operand.vmem [shape: f32[2,10,10,8], index: 0, kind: input, shape index: {}, may-alias: {0,1,2,3,4,5}]   ;;  %s4367_s1 = inlined_call_operand.vmem [shape: f32[2,10,10,8], index: 1, kind: input, shape index: {}, may-alias: {0,1,2,3,4,5}]   ;;  %s4368_s2 = inlined_call_operand.vmem [shape: f32[2,10,10,8], index: 2, kind: input, shape index: {}, may-alias: {0,1,2,3,4,5}]   ;;  %s4369_s3 = inlined_call_operand.vmem [shape: f32[2,10,10,8], index: 3, kind: input, shape index: {}, may-alias: {0,1,2,3,4,5}]   ;;  %s4370_s4 = inlined_call_operand.vmem [shape: f32[2,10,10,8], index: 4, kind: input, shape index: {}, may-alias: {0,1,2,3,4,5}]   ;;  %s4371_s5 = inlined_call_operand.vmem [shape: f32[2,10,10,8], index: 5, kind: input, shape index: {}, may-alias: {0,1,2,3,4,5}]   ;;  %s4372_s6 = inlined_call_operand.vmem [shape: f32[1,8], index: 6, kind: input, shape index: {}]   ;;  %s4373_s7 = inlined_call_operand.vmem [shape: f32[1,8], index: 7, kind: input, shape index: {}]   ;;  %s4374_s8 = inlined_call_operand.vmem [shape: bf16[9,8,8], index: 8, kind: input, shape index: {}]   ;;  %s4375_s9 = inlined_call_operand.vmem [shape: f32[1,8], index: 9, kind: input, shape index: {}]   ;;  %s4376_s10 = inlined_call_operand.vmem [shape: bf16[8,64], index: 10, kind: input, shape index: {}]   ;;  %s4377_s11 = inlined_call_operand.vmem [shape: f32[1,64], index: 11, kind: input, shape index: {}]   ;;  %s4378_s12 = inlined_call_operand.vmem [shape: f32[2,8,8,8], index: 12, kind: output, shape index: {0}]   ;;  %s4379_s13 = inlined_call_operand.vmem [shape: f32[2,8,8,64], index: 13, kind: output, shape index: {1}]  }
   0x1   :  { %s3731_s27 = smov 0   ;;  %s3733_s28 = smov 0  }
   0x2   :  { %s3735_s29 = smov 0  }
   0x3 LB: > { %4381 = sst [smem:[#allocation2_spill]] %s3649_s28  ;;  %s33_s30 = sadd.s32 1, %s3645_s27  ;;  %s3653_s29 = sphi %s3735_s29, %s24_s29   ;;  %s3649_s28 = sphi %s3733_s28, %s4388_s28   ;;  %s3645_s27 = sphi %s3731_s27, %s4390_s27   ;;  %s3641_s26 = sphi %s3729_s26, %s4386_s26   ;;  %s3637_s25 = sphi %s3727_s25, %s4389_s25  }
   0x4   : > { %s36_s14 = sadd.s32 1, %s3649_s28  ;;  %p34_p0 = scmp.ge.s32.totalorder %s33_s30, 2 }
   0x5   : > { %p3136_p1 = scmp.ge.s32.totalorder %s3653_s29, 1  ;;  %p536_p2 = scmp.lt.s32.totalorder %s3653_s29, 5 }
   0x6   : > { %s4392_s30 = smov (%p34_p0, %s33_s30), 0  ;;  %s4394_s14 = smov (!%p34_p0, %s36_s14), %s3649_s28 }
   0x7   : > { %4382 = sst [smem:[#allocation3_spill]] %s4392_s30  ;;  %p537_p3 = pnand %p3136_p1, %p536_p2 }
   0x8   : > { %p38_p4 = scmp.ge.s32.totalorder %s4394_s14, 2  ;;  %v3170_v0 = vld [vmem:[%s4374_s8 + $0x4] sm:$0xf] (!%p537_p3)  ;;  %vm936_vm0 = vcmask (!%p537_p3), 1043456   ;;  %v921_v1 = vld [vmem:[%s4374_s8] sm:$0xf] (!%p537_p3)  ;;  %v755_v2 = vlaneseq (!%p537_p3) }
   0x9   : > { %540 = sbr.rel (%p537_p3) target bundleno = 1260 (0x4ec), region = 68  ;;  %v3655_v3 = vmov (!%p537_p3), 0.0   ;;  %v938_v4 = vsel (!%p537_p3), %vm936_vm0, %v3170_v0, 0  ;;  %v984_v5 = vsel (!%p537_p3), %vm936_vm0, %v921_v1, 0  ;;  %s3769_s19 = sshll.u32 (!%p537_p3), %s3637_s25, 2  ;;  %vm3656_vm1 = vmmov (!%p537_p3), 0  }
   0xa   : > { %s4396_s14 = smov (%p38_p4, %s4394_s14), 0  ;;  %3332 = vmatprep.subr.bf16.mxu0 (!%p537_p3), %v3655_v3  ;;  %3338 = vmatprep.subr.bf16.mxu1 (!%p537_p3), %v3655_v3  ;;  %p654_p5 = scmp.lt.s32.totalorder (!%p537_p3), %s3641_s26, 1  ;;  %v3782_v6 = vshrl.u32 (!%p537_p3), %v755_v2, 7  ;;  %v3795_v7 = vld [vmem:[%s4372_s6] ss:$0 sm:$0xff] (!%p537_p3)  ;;  %vm932_vm7 = vcmask (!%p537_p3), 64512  }
   0xb   : > { %4383 = sst [smem:[#allocation4_spill]] %s4396_s14  ;;  %3333 = vmatpush3.bf16.msra.mxu0 (!%p537_p3), %v938_v4  ;;  %3339 = vmatpush3.bf16.msra.mxu1 (!%p537_p3), %v984_v5  ;;  %p656_p6 = scmp.lt.s32.totalorder (!%p537_p3), %s3769_s19, 9  ;;  %v3806_v9 = vld [vmem:[%s4373_s7] ss:$0 sm:$0xff] (!%p537_p3)  ;;  %v3175_v17 = vld [vmem:[%s4374_s8 + $0xc] sm:$0xf] (!%p537_p3) }
   0xc   : > { %3334 = vmatprep.mubr.msk.bf16.mxu0 (!%p537_p3), %vm3656_vm1, %v3655_v3  ;;  %3340 = vmatprep.mubr.msk.bf16.mxu1 (!%p537_p3), %vm3656_vm1, %v3655_v3  ;;  %p785_p7 = scmp.ge.s32.totalorder (!%p537_p3), %s3769_s19, 1  ;;  %p786_p8 = scmp.le.s32.totalorder (!%p537_p3), %s3769_s19, 8  ;;  %v3798_v8 = vadd.s32 (!%p537_p3), 8, %v3782_v6  ;;  %vm758_vm2 = vcmp.ge.s32.totalorder (!%p537_p3), %v3782_v6, 1  ;;  %v1084_v20 = vsel (!%p537_p3), %vm936_vm0, %v3175_v17, 0 }
   0xd   : > { %3344 = vmatprep.subr.bf16.mxu0 (!%p537_p3), %v3655_v3  ;;  %3350 = vmatprep.subr.bf16.mxu1 (!%p537_p3), %v3655_v3  ;;  %s665_s24 = sadd.s32 (!%p537_p3), 1, %s3769_s19  ;;  %v3173_v29 = vld [vmem:[%s4374_s8 + $0x8] sm:$0xf] (!%p537_p3)  ;;  %v3179_v38 = vld [vmem:[%s4374_s8 + $0x14] sm:$0xf] (!%p537_p3) }
   0xe   : > { %p787_p9 = pnand (!%p537_p3), %p786_p8, %p785_p7  ;;  %p668_p10 = scmp.lt.s32.totalorder (!%p537_p3), %s665_s24, 9  ;;  %vm761_vm3 = vcmp.le.s32.totalorder (!%p537_p3), %v3798_v8, 8  ;;  %v1034_v36 = vsel (!%p537_p3), %vm936_vm0, %v3173_v29, 0  ;;  %v1192_v48 = vsel (!%p537_p3), %vm936_vm0, %v3179_v38, 0  ;;  %v3177_v54 = vld [vmem:[%s4374_s8 + $0x10] sm:$0xf] (!%p537_p3) }
   0xf   : > { %p809_p11 = scmp.ge.s32.totalorder (!%p537_p3), %s665_s24, 1  ;;  %p810_p12 = scmp.le.s32.totalorder (!%p537_p3), %s665_s24, 8  ;;  %v3183_v59 = vld [vmem:[%s4374_s8 + $0x1c] sm:$0xf] (!%p537_p3)  ;;  %v1141_v61 = vsel (!%p537_p3), %vm936_vm0, %v3177_v54, 0 }
  0x10   : > { %s4398_s26 = smov (!%p654_p5, %s3641_s26), 1  ;;  %v1299_v2 = vsel %vm936_vm0, %v3183_v59, 0  ;;  %p732_p8 = scmp.lt.s32.totalorder %s3769_s19, 7 }
  0x11   : > { %s657_s20 = scalar_select %p656_p6, %s3769_s19, 9 }
  0x12   : > { %s3786_s21 = smul.u32 20, %s4398_s26  ;;  %p3823_p13 = pnand %p810_p12, %p809_p11 }
  0x13   : > { %s3138_s22 = sshll.u32 %s657_s20, 1 }
  0x14   : > { %s660_s23 = sadd.s32 %s3786_s21, %s3138_s22 }
  0x15   : > { %s3139_s25 = sshll.u32 %s660_s23, 3  ;;  %s3818_s23 = sadd.s32 2, %s3769_s19 }
  0x16   : > { %s662_s14 = scalar_lea.vmem %s4366_s0, %s3139_s25  ;;  %p681_p0 = scmp.lt.s32.totalorder %s3818_s23, 9 }
  0x17   : > { %v764_v10 = vld [vmem:[%s662_s14] sm:$0xff]  ;;  %v765_v11 = vld [vmem:[%s662_s14 + $0x8] sm:$0x3]  ;;  %s3164_s20 = scalar_select %p787_p9, 0, 1 }
  0x18   : > { %v772_v12 = vmul.f32 %v3795_v7, %v764_v10  ;;  %v773_v13 = vmul.f32 %v3795_v7, %v765_v11  ;;  %s669_s22 = scalar_select %p668_p10, %s665_s24, 9  ;;  %v3181_v11 = vld [vmem:[%s4374_s8 + $0x18] sm:$0xf] }
  0x19   : > { %v790_v14 = vstv %s3164_s20  ;;  %p833_p1 = scmp.ge.s32.totalorder %s3818_s23, 1  ;;  %p834_p2 = scmp.le.s32.totalorder %s3818_s23, 8 }
  0x1a   : > { %v780_v15 = vadd.f32 %v3806_v9, %v772_v12  ;;  %v781_v16 = vadd.f32 %v3806_v9, %v773_v13  ;;  %vm791_vm4 = vcmp.eq.s32.totalorder %v790_v14, 1  ;;  %s3141_s14 = sshll.u32 %s669_s22, 1  ;;  %v1242_v13 = vsel %vm936_vm0, %v3181_v11, 0 }
  0x1b   : > { %vm792_vm5 = vmand %vm758_vm2, %vm791_vm4  ;;  %s672_s25 = sadd.s32 %s3786_s21, %s3141_s14  ;;  %p3856_p3 = pnand %p834_p2, %p833_p1 }
  0x1c   : > { %v782_v18 = vmax.f32 %v780_v15, 0.0  ;;  %v783_v19 = vmax.f32 %v781_v16, 0.0  ;;  %vm793_vm6 = vmand %vm761_vm3, %vm791_vm4  ;;  %s3142_s15 = sshll.u32 %s672_s25, 3  ;;  %v3185_v15 = vld [vmem:[%s4374_s8 + $0x20] sm:$0xf] }
  0x1d   : > { %s674_s18 = scalar_lea.vmem %s4367_s1, %s3142_s15  ;;  %v1350_v17 = vsel %vm936_vm0, %v3185_v15, 0 }
  0x1e   : > { %v798_v21 = vsel %vm792_vm5, %v782_v18, 0.0  ;;  %v799_v22 = vsel %vm793_vm6, %v783_v19, 0.0  ;;  %v800_v23 = vld [vmem:[%s674_s18] sm:$0xff]  ;;  %v801_v24 = vld [vmem:[%s674_s18 + $0x8] sm:$0x3]  ;;  %s682_s20 = scalar_select %p681_p0, %s3818_s23, 9 }
  0x1f   : > { %v3836_v25 = vpack.c.bf16 %v799_v22, %v798_v21  ;;  %v920_v26 = vpack.c.bf16 %v798_v21, %v798_v21  ;;  %v802_v27 = vmul.f32 %v3795_v7, %v800_v23  ;;  %v803_v28 = vmul.f32 %v3795_v7, %v801_v24  ;;  %s3165_s22 = scalar_select %p3823_p13, 0, 1  ;;  %v753_v19 = vld [vmem:[%s4376_s10] sm:$0xf]  ;;  %v3190_v21 = vld [vmem:[%s4374_s8 + $0x4] sm:$0xf] }
  0x20   : > { %s3144_s14 = sshll.u32 %s682_s20, 1  ;;  %v1459_v22 = vsel %vm936_vm0, %v3190_v21, 0  ;;  %v3193_v23 = vld [vmem:[%s4374_s8 + $0x8] sm:$0xf] }
  0x21   : > { %v926_v30 = vshrl.u32 %v3836_v25, 16  ;;  %v928_v31 = vshll.u32 %v3836_v25, 16  ;;  %3341 = vmatmul.mubr.msk.bf16.vlgmr.msra.gmra.mrb[0].mxu1 %vm932_vm7, %v920_v26  ;;  %v804_v32 = vadd.f32 %v3806_v9, %v802_v27  ;;  %s685_s25 = sadd.s32 %s3786_s21, %s3144_s14  ;;  %v805_v33 = vadd.f32 %v3806_v9, %v803_v28  ;;  %s691_s14 = sadd.s32 3, %s3769_s19 }
  0x22   : > { %3351 = vmatpush3.bf16.msra.mxu1 %v1084_v20  ;;  %3352 = vmatprep.mubr.msk.bf16.mxu1 %vm3656_vm1, %v3655_v3  ;;  %v814_v34 = vstv %s3165_s22  ;;  %s3145_s24 = sshll.u32 %s685_s25, 3  ;;  %v1029_v56 = vrot.slane %v3836_v25, 1  ;;  %v3951_v20 = vsel %vm936_vm0, %v753_v19, 0  ;;  %v1546_v24 = vsel %vm936_vm0, %v3193_v23, 0  ;;  %p694_p4 = scmp.lt.s32.totalorder %s691_s14, 9 }
  0x23   : > { %v930_v35 = vrot.slane %v928_v31, 1  ;;  %v806_v37 = vmax.f32 %v804_v32, 0.0  ;;  %vm815_vm8 = vcmp.eq.s32.totalorder %v814_v34, 1  ;;  %3362 = vmatprep.subr.bf16.mxu1 %v3655_v3  ;;  %s687_s23 = scalar_lea.vmem %s4368_s2, %s3145_s24  ;;  %v807_v39 = vmax.f32 %v805_v33, 0.0  ;;  %v3197_v25 = vld [vmem:[%s4374_s8 + $0x10] sm:$0xf] }
  0x24   : > { %vm816_vm9 = vmand %vm758_vm2, %vm815_vm8  ;;  %v824_v40 = vld [vmem:[%s687_s23] sm:$0xff]  ;;  %v825_v41 = vld [vmem:[%s687_s23 + $0x8] sm:$0x3]  ;;  %s3166_s22 = scalar_select %p3856_p3, 0, 1  ;;  %v1636_v26 = vsel %vm936_vm0, %v3197_v25, 0 }
  0x25   : > { %v931_v42 = vor.u32 %v930_v35, %v926_v30  ;;  %vm817_vm10 = vmand %vm761_vm3, %vm815_vm8  ;;  %v822_v43 = vsel %vm816_vm9, %v806_v37, 0.0  ;;  %v826_v44 = vmul.f32 %v3795_v7, %v824_v40  ;;  %v827_v45 = vmul.f32 %v3795_v7, %v825_v41  ;;  %s695_s25 = scalar_select %p694_p4, %s691_s14, 9  ;;  %v3201_v31 = vld [vmem:[%s4374_s8 + $0x18] sm:$0xf]  ;;  %v3205_v41 = vld [vmem:[%s4374_s8 + $0x20] sm:$0xf] }
  0x26   : > { %v823_v46 = vsel %vm817_vm10, %v807_v39, 0.0  ;;  %v3876_v47 = vpack.c.bf16 %v822_v43, %v822_v43  ;;  %v838_v49 = vstv %s3166_s22  ;;  %p857_p5 = scmp.ge.s32.totalorder %s691_s14, 1  ;;  %p858_p6 = scmp.le.s32.totalorder %s691_s14, 8  ;;  %v1730_v33 = vsel %vm936_vm0, %v3201_v31, 0 }
  0x27   : > { %3335 = vmatmul.mubr.msk.bf16.vlgmr.msra.gmra.mrb[0].mxu0 %vm932_vm7, %v931_v42  ;;  %v3880_v50 = vpack.c.bf16 %v823_v46, %v822_v43  ;;  %v828_v51 = vadd.f32 %v3806_v9, %v826_v44  ;;  %v829_v52 = vadd.f32 %v3806_v9, %v827_v45  ;;  %vm839_vm11 = vcmp.eq.s32.totalorder %v838_v49, 1  ;;  %s3147_s16 = sshll.u32 %s695_s25, 1  ;;  %s704_s14 = sadd.s32 4, %s3769_s19 }
  0x28   : > { %3345 = vmatpush3.bf16.msra.mxu0 %v1034_v36  ;;  %3346 = vmatprep.mubr.msk.bf16.mxu0 %vm3656_vm1, %v3655_v3  ;;  %vm840_vm12 = vmand %vm758_vm2, %vm839_vm11  ;;  %s698_s17 = sadd.s32 %s3786_s21, %s3147_s16  ;;  %p859_p7 = pnand %p858_p6, %p857_p5  ;;  %v1836_v43 = vsel %vm936_vm0, %v3205_v41, 0  ;;  %v3195_v41 = vld [vmem:[%s4374_s8 + $0xc] sm:$0xf]  ;;  %vm1454_vm9 = vcmask 523264  }
  0x29   : > { %3356 = vmatprep.subr.bf16.mxu0 %v3655_v3  ;;  %3353 = vmatmul.mubr.msk.bf16.vlgmr.msra.gmra.mrb[4].mxu1 %vm932_vm7, %v3876_v47  ;;  %v830_v53 = vmax.f32 %v828_v51, 0.0  ;;  %vm841_vm13 = vmand %vm761_vm3, %vm839_vm11  ;;  %v831_v55 = vmax.f32 %v829_v52, 0.0  ;;  %v1133_v57 = vshll.u32 %v3880_v50, 16  ;;  %v1187_v62 = vrot.slane %v3880_v50, 1  ;;  %s3148_s18 = sshll.u32 %s698_s17, 3  ;;  %s3156_s16 = sshll.u32 %s4398_s26, 3 }
  0x2a   : > { %3363 = vmatpush3.bf16.msra.mxu1 %v1192_v48  ;;  %3364 = vmatprep.mubr.msk.bf16.mxu1 %vm3656_vm1, %v3655_v3  ;;  %v1131_v0 = vshrl.u32 %v3880_v50, 16  ;;  %s700_s22 = scalar_lea.vmem %s4369_s3, %s3148_s18  ;;  %p707_p9 = scmp.lt.s32.totalorder %s704_s14, 9 }
  0x2b   : > { %3374 = vmatprep.subr.bf16.mxu1 %v3655_v3  ;;  %v846_v58 = vsel %vm840_vm12, %v830_v53, 0.0  ;;  %v847_v60 = vsel %vm841_vm13, %v831_v55, 0.0  ;;  %v1135_v1 = vrot.slane %v1133_v57, 1  ;;  %v848_v27 = vld [vmem:[%s700_s22] sm:$0xff]  ;;  %v849_v29 = vld [vmem:[%s700_s22 + $0x8] sm:$0x3] }
  0x2c   : > { %v1285_v63 = vpack.c.bf16 %v847_v60, %v846_v58  ;;  %v3933_v16 = vpack.c.bf16 %v846_v58, %v846_v58  ;;  %v850_v28 = vmul.f32 %v3795_v7, %v848_v27  ;;  %s3167_s28 = scalar_select %p859_p7, 0, 1  ;;  %v851_v32 = vmul.f32 %v3795_v7, %v849_v29 }
  0x2d   : > { %v1136_v12 = vor.u32 %v1135_v1, %v1131_v0  ;;  %s733_s15 = scalar_select %p732_p8, %s3769_s19, 7 }
  0x2e   : > { %v1291_v4 = vshll.u32 %v1285_v63, 16  ;;  %v1289_v5 = vshrl.u32 %v1285_v63, 16  ;;  %v3941_v18 = vrot.slane %v1285_v63, 1  ;;  %v852_v30 = vadd.f32 %v3806_v9, %v850_v28  ;;  %s708_s24 = scalar_select %p707_p9, %s704_s14, 9 }
  0x2f   : > { %3347 = vmatmul.mubr.msk.bf16.vlgmr.msra.gmra.mrb[4].mxu0 %vm932_vm7, %v1029_v56  ;;  %v862_v35 = vstv %s3167_s28  ;;  %v853_v36 = vadd.f32 %v3806_v9, %v851_v32  ;;  %s4021_s17 = sadd.s32 %s3156_s16, %s733_s15  ;;  %p881_p10 = scmp.ge.s32.totalorder %s704_s14, 1 }
  0x30   : > { %3357 = vmatpush3.bf16.msra.mxu0 %v1141_v61  ;;  %3358 = vmatprep.mubr.msk.bf16.mxu0 %vm3656_vm1, %v3655_v3  ;;  %v1293_v10 = vrot.slane %v1291_v4, 1  ;;  %v854_v34 = vmax.f32 %v852_v30, 0.0  ;;  %vm863_vm14 = vcmp.eq.s32.totalorder %v862_v35, 1  ;;  %s3157_s18 = sshll.u32 %s4021_s17, 3  ;;  %v4027_v30 = vld [vmem:[%s4375_s9] ss:$0 sm:$0xff] }
  0x31   : > { %3368 = vmatprep.subr.bf16.mxu0 %v3655_v3  ;;  %3365 = vmatmul.mubr.msk.bf16.vlgmr.msra.gmra.mrb[8].mxu1 %vm932_vm7, %v1187_v62  ;;  %vm864_vm15 = vmand %vm758_vm2, %vm863_vm14  ;;  %v855_v37 = vmax.f32 %v853_v36, 0.0  ;;  %s4034_s26 = scalar_lea.vmem %s4378_s12, %s3157_s18  ;;  %v1456_v35 = vld [vmem:[%s4374_s8] sm:$0xf]  ;;  %s3150_s20 = sshll.u32 %s708_s24, 1 }
  0x32   : > { %3375 = vmatpush3.bf16.msra.mxu1 %v1299_v2  ;;  %3376 = vmatprep.mubr.msk.bf16.mxu1 %vm3656_vm1, %v3655_v3  ;;  %v3920_v14 = vor.u32 %v1293_v10, %v1289_v5  ;;  %vm865_vm4 = vmand %vm761_vm3, %vm863_vm14  ;;  %v870_v38 = vsel %vm864_vm15, %v854_v34, 0.0  ;;  %s711_s23 = sadd.s32 %s3786_s21, %s3150_s20  ;;  %p882_p11 = scmp.le.s32.totalorder %s704_s14, 8 }
  0x33   : > { %3386 = vmatprep.subr.bf16.mxu1 %v3655_v3  ;;  %v3998_v39 = vpack.c.bf16 %v870_v38, %v870_v38  ;;  %v871_v40 = vsel %vm865_vm4, %v855_v37, 0.0  ;;  %s3151_s22 = sshll.u32 %s711_s23, 3 }
  0x34   : > { %v4007_v42 = vpack.c.bf16 %v871_v40, %v870_v38  ;;  %v1502_v40 = vsel %vm936_vm0, %v1456_v35, 0  ;;  %s713_s25 = scalar_lea.vmem %s4370_s4, %s3151_s22  ;;  %p883_p12 = pnand %p882_p11, %p881_p10 }
  0x36   : > { %v4011_v44 = vrot.slane %v4007_v42, 1  ;;  %s3168_s24 = scalar_select %p883_p12, 0, 1 }
  0x37   : > { %3359 = vmatmul.mubr.msk.bf16.vlgmr.msra.gmra.mrb[8].mxu0 %vm932_vm7, %v1136_v12 }
  0x38   : > { %3369 = vmatpush3.bf16.msra.mxu0 %v1242_v13  ;;  %3370 = vmatprep.mubr.msk.bf16.mxu0 %vm3656_vm1, %v3655_v3 }
  0x39   : > { %3380 = vmatprep.subr.bf16.mxu0 %v3655_v3  ;;  %3377 = vmatmul.mubr.msk.bf16.vlgmr.msra.gmra.mrb[12].mxu1 %vm932_vm7, %v3920_v14 }
  0x3a   : > { %3388 = vmatprep.mubr.msk.bf16.mxu1 %vm3656_vm1, %v3655_v3  ;;  %3387 = vmatpush3.bf16.msra.mxu1 %v3951_v20 }
  0x3b   : > { %3398 = vmatprep.subr.bf16.mxu1 %v3655_v3 }
  0x3f   : > { %3371 = vmatmul.mubr.msk.bf16.vlgmr.msra.gmra.mrb[12].mxu0 %vm932_vm7, %v3933_v16 }
  0x40   : > { %3381 = vmatpush3.bf16.msra.mxu0 %v1350_v17  ;;  %3382 = vmatprep.mubr.msk.bf16.mxu0 %vm3656_vm1, %v3655_v3 }
  0x41   : > { %3392 = vmatprep.subr.bf16.mxu0 %v3655_v3 }
  0x47   : > { %3383 = vmatmul.mubr.msk.bf16.vlgmr.msra.gmra.mrb[16].mxu0 %vm932_vm7, %v3941_v18 }
  0x48   : > { %3394 = vmatprep.mubr.msk.bf16.mxu0 %vm3656_vm1, %v3655_v3  ;;  %3393 = vmatpush3.bf16.msra.mxu0 %v1459_v22 }
  0x49   : > { %3404 = vmatprep.subr.bf16.mxu0 %v3655_v3 }
  0x4f   : > { %3395 = vmatmul.mubr.msk.bf16.vlgmr.msra.gmra.mrb[20].mxu0 %vm932_vm7, %v1136_v12 }
  0x50   : > { %3406 = vmatprep.mubr.msk.bf16.mxu0 %vm3656_vm1, %v3655_v3  ;;  %3405 = vmatpush3.bf16.msra.mxu0 %v1546_v24 }
  0x51   : > { %3416 = vmatprep.subr.bf16.mxu0 %v3655_v3 }
  0x57   : > { %3407 = vmatmul.mubr.msk.bf16.vlgmr.msra.gmra.mrb[24].mxu0 %vm932_vm7, %v1187_v62 }
  0x58   : > { %3418 = vmatprep.mubr.msk.bf16.mxu0 %vm3656_vm1, %v3655_v3  ;;  %3417 = vmatpush3.bf16.msra.mxu0 %v1636_v26 }
  0x59   : > { %3428 = vmatprep.subr.bf16.mxu0 %v3655_v3 }
  0x5f   : > { %3419 = vmatmul.mubr.msk.bf16.vlgmr.msra.gmra.mrb[28].mxu0 %vm932_vm7, %v3920_v14 }
  0x60   : > { %3430 = vmatprep.mubr.msk.bf16.mxu0 %vm3656_vm1, %v3655_v3  ;;  %3429 = vmatpush3.bf16.msra.mxu0 %v1730_v33 }
  0x61   : > { %3440 = vmatprep.subr.bf16.mxu0 %v3655_v3 }
  0x67   : > { %3431 = vmatmul.mubr.msk.bf16.vlgmr.msra.gmra.mrb[32].mxu0 %vm932_vm7, %v3998_v39 }
  0x68   : > { %3442 = vmatprep.mubr.msk.bf16.mxu0 %vm3656_vm1, %v3655_v3  ;;  %3441 = vmatpush3.bf16.msra.mxu0 %v1836_v43  ;;  %v1591_v43 = vsel %vm936_vm0, %v3195_v41, 0  ;;  %v4161_v41 = vld [vmem:[%s4377_s11] ss:$0 sm:$0xff] }
  0x69   : > { %3452 = vmatprep.subr.bf16.mxu0 %v3655_v3 }
  0x6f   : > { %3443 = vmatmul.mubr.msk.bf16.vlgmr.msra.gmra.mrb[36].mxu0 %vm932_vm7, %v4011_v44 }
  0x70   : > { %3454 = vmatprep.mubr.msk.bf16.mxu0 %vm3656_vm1, %v3655_v3 }
  0xf4   : > { %v1020_v45 = vpop.f32.mrb[0].mxu1 }
  0xf5   : > { %v3342_v46 = vpop.f32.mrb[1].mxu1 }
  0xf6   : > { %v1023_v48 = vpop.f32.mrb[2].mxu1 }
  0xf7   : > { %v3343_v49 = vpop.f32.mrb[3].mxu1  ;;  %v1778_v48 = vshll.u32 %v4007_v42, 16 }
  0xfa   : > { %v974_v50 = vpop.f32.mrb[0].mxu0 }
  0xfb   : > { %v1021_v51 = vadd.f32 %v1020_v45, %v974_v50  ;;  %v3336_v52 = vpop.f32.mrb[1].mxu0  ;;  %v3199_v45 = vld [vmem:[%s4374_s8 + $0x14] sm:$0xf]  ;;  %v1776_v50 = vshrl.u32 %v4007_v42, 16 }
  0xfc   : > { %v977_v53 = vpop.f32.mrb[2].mxu0  ;;  %v1120_v54 = vpop.f32.mrb[4].mxu1  ;;  %v1681_v46 = vsel %vm936_vm0, %v3199_v45, 0 }
  0xfd   : > { %v3337_v55 = vpop.f32.mrb[3].mxu0  ;;  %v3354_v56 = vpop.f32.mrb[5].mxu1 }
  0xfe   : > { %v1123_v57 = vpop.f32.mrb[6].mxu1 }
  0xff   : > { %v3355_v58 = vpop.f32.mrb[7].mxu1 }
 0x102   : > { %v1070_v59 = vpop.f32.mrb[4].mxu0 }
 0x103   : > { %v1076_v60 = vadd.f32 %v1070_v59, %v1021_v51  ;;  %v3348_v61 = vpop.f32.mrb[5].mxu0  ;;  %v1780_v51 = vrot.slane %v1778_v48, 1 }
 0x104   : > { %v1073_v62 = vpop.f32.mrb[6].mxu0  ;;  %v1228_v63 = vpop.f32.mrb[8].mxu1 }
 0x105   : > { %v1126_v0 = vadd.f32 %v1120_v54, %v1076_v60  ;;  %v3349_v1 = vpop.f32.mrb[7].mxu0  ;;  %v3366_v2 = vpop.f32.mrb[9].mxu1  ;;  %v4076_v52 = vor.u32 %v1780_v51, %v1776_v50 }
 0x106   : > { %v1231_v4 = vpop.f32.mrb[10].mxu1 }
 0x107   : > { %v3367_v5 = vpop.f32.mrb[11].mxu1 }
 0x10a   : > { %v1177_v10 = vpop.f32.mrb[8].mxu0 }
 0x10b   : > { %v1183_v11 = vadd.f32 %v1177_v10, %v1126_v0  ;;  %v3360_v12 = vpop.f32.mrb[9].mxu0 }
 0x10c   : > { %v1180_v13 = vpop.f32.mrb[10].mxu0  ;;  %v1335_v15 = vpop.f32.mrb[12].mxu1 }
 0x10d   : > { %v1234_v17 = vadd.f32 %v1228_v63, %v1183_v11  ;;  %v3361_v19 = vpop.f32.mrb[11].mxu0  ;;  %v3378_v21 = vpop.f32.mrb[13].mxu1  ;;  %v3210_v13 = vld [vmem:[%s4374_s8 + $0x4] sm:$0xf] }
 0x10e   : > { %v1338_v22 = vpop.f32.mrb[14].mxu1 }
 0x10f   : > { %v3379_v23 = vpop.f32.mrb[15].mxu1 }
 0x110   : > { %v873_v23 = vld [vmem:[%s713_s25 + $0x8] sm:$0x3] }
 0x112   : > { %v1278_v24 = vpop.f32.mrb[12].mxu0 }
 0x113   : > { %v1284_v25 = vadd.f32 %v1278_v24, %v1234_v17  ;;  %v3372_v26 = vpop.f32.mrb[13].mxu0  ;;  %v3213_v17 = vld [vmem:[%s4374_s8 + $0x8] sm:$0xf] }
 0x114   : > { %v1281_v27 = vpop.f32.mrb[14].mxu0  ;;  %v2018_v19 = vsel %vm936_vm0, %v3213_v17, 0  ;;  %v875_v26 = vmul.f32 %v3795_v7, %v873_v23 }
 0x115   : > { %v1341_v28 = vadd.f32 %v1335_v15, %v1284_v25  ;;  %v3373_v29 = vpop.f32.mrb[15].mxu0  ;;  %v1931_v15 = vsel %vm936_vm0, %v3210_v13, 0  ;;  %v3221_v25 = vld [vmem:[%s4374_s8 + $0x18] sm:$0xf] }
 0x116   : > { %3453 = vmatpush3.bf16.msra.mxu0 %v1931_v15  ;;  %v2202_v27 = vsel %vm936_vm0, %v3221_v25, 0  ;;  %v886_v29 = vstv %s3168_s24 }
 0x117   : > { %3464 = vmatprep.subr.bf16.mxu0 %v3655_v3  ;;  %vm887_vm5 = vcmp.eq.s32.totalorder %v886_v29, 1 }
 0x118   : > { %vm888_vm6 = vmand %vm758_vm2, %vm887_vm5 }
 0x119   : > { %3455 = vmatmul.mubr.msk.bf16.vlgmr.msra.gmra.mrb[40].mxu0 %vm932_vm7, %v3920_v14  ;;  %v3217_v14 = vld [vmem:[%s4374_s8 + $0x10] sm:$0xf]  ;;  %vm889_vm8 = vmand %vm761_vm3, %vm887_vm5 }
 0x11a   : > { %v1386_v31 = vpop.f32.mrb[16].mxu0  ;;  %3466 = vmatprep.mubr.msk.bf16.mxu0 %vm3656_vm1, %v3655_v3  ;;  %3465 = vmatpush3.bf16.msra.mxu0 %v2018_v19  ;;  %v2108_v21 = vsel %vm936_vm0, %v3217_v14, 0  ;;  %v1928_v14 = vld [vmem:[%s4374_s8] sm:$0xf] }
 0x11b   : > { %v1392_v32 = vadd.f32 %v1386_v31, %v1341_v28  ;;  %v3384_v33 = vpop.f32.mrb[17].mxu0  ;;  %3476 = vmatprep.subr.bf16.mxu0 %v3655_v3  ;;  %v877_v31 = vadd.f32 %v3806_v9, %v875_v26 }
 0x11c   : > { %v1389_v34 = vpop.f32.mrb[18].mxu0 }
 0x11d   : > { %v1399_v36 = vadd.f32 %v4027_v30, %v1392_v32  ;;  %v3385_v37 = vpop.f32.mrb[19].mxu0  ;;  %v879_v32 = vmax.f32 %v877_v31, 0.0 }
 0x11f   : > { %1400 = vst.msk [vmem:[%s4034_s26] sm:$0xff] %vm932_vm7, %v1399_v36  ;;  %v1401_v38 = vpack.c.bf16 %v1399_v36, %v1399_v36  ;;  %v895_v35 = vsel %vm889_vm8, %v879_v32, 0.0  ;;  %v3225_v36 = vld [vmem:[%s4374_s8 + $0x20] sm:$0xf] }
 0x121   : > { %3389 = vmatmul.mubr.msk.bf16.vlgmr.msra.gmra.mrb[16].mxu1 %vm932_vm7, %v1401_v38  ;;  %3467 = vmatmul.mubr.msk.bf16.vlgmr.msra.gmra.mrb[44].mxu0 %vm932_vm7, %v3941_v18  ;;  %v2308_v38 = vsel %vm936_vm0, %v3225_v36, 0 }
 0x122   : > { %3399 = vmatpush3.bf16.msra.mxu1 %v1502_v40  ;;  %3400 = vmatprep.mubr.msk.bf16.mxu1 %vm3656_vm1, %v3655_v3  ;;  %v4084_v42 = vpop.f32.mrb[20].mxu0 }
 0x123   : > { %3410 = vmatprep.subr.bf16.mxu1 %v3655_v3  ;;  %v3396_v53 = vpop.f32.mrb[21].mxu0  ;;  %3478 = vmatprep.mubr.msk.bf16.mxu0 %vm3656_vm1, %v3655_v3 }
 0x124   : > { %v1498_v54 = vpop.f32.mrb[22].mxu0  ;;  %3477 = vmatpush3.bf16.msra.mxu0 %v2108_v21 }
 0x125   : > { %v3397_v55 = vpop.f32.mrb[23].mxu0  ;;  %3488 = vmatprep.subr.bf16.mxu0 %v3655_v3 }
 0x129   : > { %3401 = vmatmul.mubr.msk.bf16.vlgmr.msra.gmra.mrb[20].mxu1 %vm932_vm7, %v3876_v47  ;;  %v3203_v47 = vld [vmem:[%s4374_s8 + $0x1c] sm:$0xf]  ;;  %3479 = vmatmul.mubr.msk.bf16.vlgmr.msra.gmra.mrb[48].mxu0 %vm932_vm7, %v4076_v52 }
 0x12a   : > { %3411 = vmatpush3.bf16.msra.mxu1 %v1591_v43  ;;  %3412 = vmatprep.mubr.msk.bf16.mxu1 %vm3656_vm1, %v3655_v3  ;;  %v1786_v49 = vsel %vm936_vm0, %v3203_v47, 0  ;;  %v4086_v56 = vpop.f32.mrb[24].mxu0 }
 0x12b   : > { %3422 = vmatprep.subr.bf16.mxu1 %v3655_v3  ;;  %v3408_v57 = vpop.f32.mrb[25].mxu0  ;;  %3490 = vmatprep.mubr.msk.bf16.mxu0 %vm3656_vm1, %v3655_v3 }
 0x12c   : > { %v1585_v58 = vpop.f32.mrb[26].mxu0  ;;  %3489 = vmatpush3.bf16.msra.mxu0 %v2202_v27 }
 0x12d   : > { %v3409_v59 = vpop.f32.mrb[27].mxu0  ;;  %3500 = vmatprep.subr.bf16.mxu0 %v3655_v3 }
 0x131   : > { %3413 = vmatmul.mubr.msk.bf16.vlgmr.msra.gmra.mrb[24].mxu1 %vm932_vm7, %v3933_v16 }
 0x132   : > { %3423 = vmatpush3.bf16.msra.mxu1 %v1681_v46  ;;  %3424 = vmatprep.mubr.msk.bf16.mxu1 %vm3656_vm1, %v3655_v3  ;;  %v4088_v60 = vpop.f32.mrb[28].mxu0 }
 0x133   : > { %3434 = vmatprep.subr.bf16.mxu1 %v3655_v3  ;;  %v3420_v61 = vpop.f32.mrb[29].mxu0 }
 0x134   : > { %v1675_v62 = vpop.f32.mrb[30].mxu0 }
 0x135   : > { %v3421_v63 = vpop.f32.mrb[31].mxu0 }
 0x139   : > { %3425 = vmatmul.mubr.msk.bf16.vlgmr.msra.gmra.mrb[28].mxu1 %vm932_vm7, %v3941_v18  ;;  %v872_v18 = vld [vmem:[%s713_s25] sm:$0xff]  ;;  %s4168_s25 = scalar_lea.vmem %s4379_s13, %s3157_s18  ;;  %s717_s18 = sadd.s32 5, %s3769_s19 }
 0x13a   : > { %3435 = vmatpush3.bf16.msra.mxu1 %v1786_v49  ;;  %3436 = vmatprep.mubr.msk.bf16.mxu1 %vm3656_vm1, %v3655_v3  ;;  %v4090_v0 = vpop.f32.mrb[32].mxu0  ;;  %v874_v22 = vmul.f32 %v3795_v7, %v872_v18  ;;  %v1974_v18 = vsel %vm936_vm0, %v1928_v14, 0  ;;  %p720_p13 = scmp.lt.s32.totalorder %s717_s18, 9  ;;  %p905_p0 = scmp.ge.s32.totalorder %s717_s18, 1 }
 0x13b   : > { %3446 = vmatprep.subr.bf16.mxu1 %v3655_v3  ;;  %v3432_v1 = vpop.f32.mrb[33].mxu0  ;;  %p906_p1 = scmp.le.s32.totalorder %s717_s18, 8 }
 0x13c   : > { %v1769_v2 = vpop.f32.mrb[34].mxu0  ;;  %v876_v24 = vadd.f32 %v3806_v9, %v874_v22  ;;  %v3219_v22 = vld [vmem:[%s4374_s8 + $0x14] sm:$0xf]  ;;  %s721_s24 = scalar_select %p720_p13, %s717_s18, 9 }
 0x13d   : > { %v3433_v4 = vpop.f32.mrb[35].mxu0  ;;  %v2153_v23 = vsel %vm936_vm0, %v3219_v22, 0  ;;  %p907_p2 = pnand %p906_p1, %p905_p0 }
 0x13e   : > { %v878_v28 = vmax.f32 %v876_v24, 0.0  ;;  %s3153_s14 = sshll.u32 %s721_s24, 1 }
 0x13f   : > { %s724_s20 = sadd.s32 %s3786_s21, %s3153_s14 }
 0x140   : > { %v894_v33 = vsel %vm888_vm6, %v878_v28, 0.0  ;;  %s3154_s23 = sshll.u32 %s724_s20, 3 }
 0x141   : > { %3437 = vmatmul.mubr.msk.bf16.vlgmr.msra.gmra.mrb[32].mxu1 %vm932_vm7, %v4076_v52  ;;  %v4139_v34 = vpack.c.bf16 %v894_v33, %v894_v33  ;;  %v4148_v37 = vpack.c.bf16 %v895_v35, %v894_v33  ;;  %s726_s28 = scalar_lea.vmem %s4371_s5, %s3154_s23 }
 0x142   : > { %3447 = vmatpush3.bf16.msra.mxu1 %v3951_v20  ;;  %3448 = vmatprep.mubr.msk.bf16.mxu1 %vm3656_vm1, %v3655_v3  ;;  %v4092_v5 = vpop.f32.mrb[36].mxu0  ;;  %s3169_s21 = scalar_select %p907_p2, 0, 1 }
 0x143   : > { %3458 = vmatprep.subr.bf16.mxu1 %v3655_v3  ;;  %v3444_v10 = vpop.f32.mrb[37].mxu0  ;;  %3491 = vmatmul.mubr.msk.bf16.vlgmr.msra.gmra.mrb[52].mxu0 %vm932_vm7, %v4139_v34  ;;  %v2303_v40 = vrot.slane %v4148_v37, 1  ;;  %v2250_v24 = vshll.u32 %v4148_v37, 16  ;;  %v2248_v26 = vshrl.u32 %v4148_v37, 16 }
 0x144   : > { %v1875_v11 = vpop.f32.mrb[38].mxu0  ;;  %3502 = vmatprep.mubr.msk.bf16.mxu0 %vm3656_vm1, %v3655_v3  ;;  %3501 = vmatpush3.bf16.msra.mxu0 %v2308_v38 }
 0x145   : > { %v3445_v12 = vpop.f32.mrb[39].mxu0  ;;  %3512 = vmatprep.subr.bf16.mxu0 %v3655_v3  ;;  %v2252_v27 = vrot.slane %v2250_v24, 1 }
 0x147   : > { %v2253_v28 = vor.u32 %v2252_v27, %v2248_v26 }
 0x14b   : > { %3503 = vmatmul.mubr.msk.bf16.vlgmr.msra.gmra.mrb[56].mxu0 %vm932_vm7, %v2303_v40 }
 0x14c   : > { %3514 = vmatprep.mubr.msk.bf16.mxu0 %vm3656_vm1, %v3655_v3 }
 0x1ec   : > { %v4223_v29 = vpop.f32.mrb[40].mxu0 }
 0x1ed   : > { %v3456_v31 = vpop.f32.mrb[41].mxu0 }
 0x1ee   : > { %v1970_v32 = vpop.f32.mrb[42].mxu0 }
 0x1ef   : > { %v3457_v33 = vpop.f32.mrb[43].mxu0 }
 0x1f4   : > { %v1448_v43 = vpop.f32.mrb[16].mxu1  ;;  %v4225_v35 = vpop.f32.mrb[44].mxu0 }
 0x1f5   : > { %v1449_v45 = vadd.f32 %v4161_v41, %v1448_v43  ;;  %v3390_v46 = vpop.f32.mrb[17].mxu1  ;;  %v3468_v36 = vpop.f32.mrb[45].mxu0 }
 0x1f6   : > { %v1451_v47 = vpop.f32.mrb[18].mxu1  ;;  %v2057_v38 = vpop.f32.mrb[46].mxu0 }
 0x1f7   : > { %1455 = vst.msk [vmem:[%s4168_s25] sm:$0xff] %vm1454_vm9, %v1449_v45  ;;  %v3391_v48 = vpop.f32.mrb[19].mxu1  ;;  %v3469_v43 = vpop.f32.mrb[47].mxu0 }
 0x1fc   : > { %v1538_v49 = vpop.f32.mrb[20].mxu1  ;;  %v4227_v45 = vpop.f32.mrb[48].mxu0 }
 0x1fd   : > { %v1539_v50 = vadd.f32 %v1538_v49, %v4084_v42  ;;  %v3402_v51 = vpop.f32.mrb[21].mxu1  ;;  %v3480_v46 = vpop.f32.mrb[49].mxu0 }
 0x1fe   : > { %v1541_v53 = vpop.f32.mrb[22].mxu1  ;;  %v2147_v47 = vpop.f32.mrb[50].mxu0 }
 0x1ff   : > { %v3403_v54 = vpop.f32.mrb[23].mxu1  ;;  %v1588_v55 = vadd.f32 %v4086_v56, %v1539_v50  ;;  %v3481_v48 = vpop.f32.mrb[51].mxu0 }
 0x204   : > { %v1627_v57 = vpop.f32.mrb[24].mxu1 }
 0x205   : > { %v1633_v58 = vadd.f32 %v1627_v57, %v1588_v55  ;;  %v3414_v59 = vpop.f32.mrb[25].mxu1 }
 0x206   : > { %v1630_v61 = vpop.f32.mrb[26].mxu1  ;;  %v3230_v59 = vld [vmem:[%s4374_s8 + $0x4] sm:$0xf] }
 0x207   : > { %v3415_v62 = vpop.f32.mrb[27].mxu1  ;;  %v1678_v63 = vadd.f32 %v4088_v60, %v1633_v58  ;;  %v2403_v61 = vsel %vm936_vm0, %v3230_v59, 0  ;;  %v2400_v59 = vld [vmem:[%s4374_s8] sm:$0xf] }
 0x208   : > { %3513 = vmatpush3.bf16.msra.mxu0 %v2403_v61  ;;  %v3233_v62 = vld [vmem:[%s4374_s8 + $0x8] sm:$0xf] }
 0x209   : > { %3524 = vmatprep.subr.bf16.mxu0 %v3655_v3 }
 0x20b   : > { %3515 = vmatmul.mubr.msk.bf16.vlgmr.msra.gmra.mrb[60].mxu0 %vm932_vm7, %v4076_v52  ;;  %v3237_v52 = vld [vmem:[%s4374_s8 + $0x10] sm:$0xf] }
 0x20c   : > { %v1717_v1 = vpop.f32.mrb[28].mxu1  ;;  %3526 = vmatprep.mubr.msk.bf16.mxu0 %vm3656_vm1, %v3655_v3 }
 0x20d   : > { %v1723_v2 = vadd.f32 %v1717_v1, %v1678_v63  ;;  %v3426_v4 = vpop.f32.mrb[29].mxu1  ;;  %v2490_v63 = vsel %vm936_vm0, %v3233_v62, 0  ;;  %v2580_v1 = vsel %vm936_vm0, %v3237_v52, 0  ;;  %v2446_v62 = vsel %vm936_vm0, %v2400_v59, 0 }
 0x20e   : > { %v1720_v10 = vpop.f32.mrb[30].mxu1  ;;  %3525 = vmatpush3.bf16.msra.mxu0 %v2490_v63  ;;  %v897_v4 = vld [vmem:[%s726_s28 + $0x8] sm:$0x3]  ;;  %v3239_v63 = vld [vmem:[%s4374_s8 + $0x14] sm:$0xf] }
 0x20f   : > { %v3427_v11 = vpop.f32.mrb[31].mxu1  ;;  %v1772_v42 = vadd.f32 %v4090_v0, %v1723_v2  ;;  %v3215_v0 = vld [vmem:[%s4374_s8 + $0xc] sm:$0xf]  ;;  %3536 = vmatprep.subr.bf16.mxu0 %v3655_v3  ;;  %v2625_v52 = vsel %vm936_vm0, %v3239_v63, 0 }
 0x210   : > { %v3241_v11 = vld [vmem:[%s4374_s8 + $0x18] sm:$0xf] }
 0x213   : > { %3527 = vmatmul.mubr.msk.bf16.vlgmr.msra.gmra.mrb[64].mxu0 %vm932_vm7, %v4011_v44 }
 0x214   : > { %v1822_v12 = vpop.f32.mrb[32].mxu1  ;;  %3538 = vmatprep.mubr.msk.bf16.mxu0 %vm3656_vm1, %v3655_v3  ;;  %3537 = vmatpush3.bf16.msra.mxu0 %v2580_v1 }
 0x215   : > { %v1828_v13 = vadd.f32 %v1822_v12, %v1772_v42  ;;  %v3438_v15 = vpop.f32.mrb[33].mxu1  ;;  %3548 = vmatprep.subr.bf16.mxu0 %v3655_v3  ;;  %v899_v42 = vmul.f32 %v3795_v7, %v897_v4  ;;  %v2674_v12 = vsel %vm936_vm0, %v3241_v11, 0 }
 0x216   : > { %v1825_v17 = vpop.f32.mrb[34].mxu1  ;;  %v4229_v49 = vpop.f32.mrb[52].mxu0  ;;  %v910_v15 = vstv %s3169_s21 }
 0x217   : > { %v1878_v56 = vadd.f32 %v4092_v5, %v1828_v13  ;;  %v3439_v19 = vpop.f32.mrb[35].mxu1  ;;  %v2063_v5 = vsel %vm936_vm0, %v3215_v0, 0  ;;  %v3492_v50 = vpop.f32.mrb[53].mxu0  ;;  %v901_v17 = vadd.f32 %v3806_v9, %v899_v42  ;;  %vm911_vm10 = vcmp.eq.s32.totalorder %v910_v15, 1 }
 0x218   : > { %v2241_v51 = vpop.f32.mrb[54].mxu0  ;;  %vm912_vm11 = vmand %vm758_vm2, %vm911_vm10 }
 0x219   : > { %v1879_v60 = vadd.f32 %v4027_v30, %v1878_v56  ;;  %v3493_v53 = vpop.f32.mrb[55].mxu0  ;;  %v903_v56 = vmax.f32 %v901_v17, 0.0  ;;  %vm913_vm12 = vmand %vm761_vm3, %vm911_vm10 }
 0x21b   : > { %3207 = vst.msk [vmem:[%s4034_s26 + $0x8] sm:$0xff] %vm932_vm7, %v1879_v60  ;;  %v1882_v21 = vpack.c.bf16 %v1879_v60, %v1879_v60  ;;  %3539 = vmatmul.mubr.msk.bf16.vlgmr.msra.gmra.mrb[68].mxu0 %vm932_vm7, %v2253_v28  ;;  %v919_v14 = vsel %vm913_vm12, %v903_v56, 0.0 }
 0x21c   : > { %3550 = vmatprep.mubr.msk.bf16.mxu0 %vm3656_vm1, %v3655_v3  ;;  %3549 = vmatpush3.bf16.msra.mxu0 %v2674_v12 }
 0x21d   : > { %3449 = vmatmul.mubr.msk.bf16.vlgmr.msra.gmra.mrb[36].mxu1 %vm932_vm7, %v1882_v21  ;;  %3560 = vmatprep.subr.bf16.mxu0 %v3655_v3 }
 0x21e   : > { %3459 = vmatpush3.bf16.msra.mxu1 %v1974_v18  ;;  %3460 = vmatprep.mubr.msk.bf16.mxu1 %vm3656_vm1, %v3655_v3  ;;  %v4231_v54 = vpop.f32.mrb[56].mxu0 }
 0x21f   : > { %3470 = vmatprep.subr.bf16.mxu1 %v3655_v3  ;;  %v3504_v55 = vpop.f32.mrb[57].mxu0 }
 0x220   : > { %v2347_v57 = vpop.f32.mrb[58].mxu0 }
 0x221   : > { %v3505_v58 = vpop.f32.mrb[59].mxu0 }
 0x225   : > { %3461 = vmatmul.mubr.msk.bf16.vlgmr.msra.gmra.mrb[40].mxu1 %vm932_vm7, %v3933_v16  ;;  %v3223_v16 = vld [vmem:[%s4374_s8 + $0x1c] sm:$0xf] }
 0x226   : > { %3471 = vmatpush3.bf16.msra.mxu1 %v2063_v5  ;;  %3472 = vmatprep.mubr.msk.bf16.mxu1 %vm3656_vm1, %v3655_v3  ;;  %v2258_v25 = vsel %vm936_vm0, %v3223_v16, 0 }
 0x227   : > { %3482 = vmatprep.subr.bf16.mxu1 %v3655_v3 }
 0x22d   : > { %3473 = vmatmul.mubr.msk.bf16.vlgmr.msra.gmra.mrb[44].mxu1 %vm932_vm7, %v3998_v39 }
 0x22e   : > { %3483 = vmatpush3.bf16.msra.mxu1 %v2153_v23  ;;  %3484 = vmatprep.mubr.msk.bf16.mxu1 %vm3656_vm1, %v3655_v3 }
 0x22f   : > { %3494 = vmatprep.subr.bf16.mxu1 %v3655_v3 }
 0x235   : > { %3485 = vmatmul.mubr.msk.bf16.vlgmr.msra.gmra.mrb[48].mxu1 %vm932_vm7, %v4011_v44  ;;  %v896_v44 = vld [vmem:[%s726_s28] sm:$0xff] }
 0x236   : > { %3495 = vmatpush3.bf16.msra.mxu1 %v2258_v25  ;;  %3496 = vmatprep.mubr.msk.bf16.mxu1 %vm3656_vm1, %v3655_v3  ;;  %v898_v2 = vmul.f32 %v3795_v7, %v896_v44 }
 0x237   : > { %3506 = vmatprep.subr.bf16.mxu1 %v3655_v3 }
 0x238   : > { %v900_v10 = vadd.f32 %v3806_v9, %v898_v2  ;;  %v3245_v9 = vld [vmem:[%s4374_s8 + $0x20] sm:$0xf] }
 0x239   : > { %v2780_v60 = vsel %vm936_vm0, %v3245_v9, 0 }
 0x23a   : > { %v902_v13 = vmax.f32 %v900_v10, 0.0 }
 0x23c   : > { %v918_v19 = vsel %vm912_vm11, %v902_v13, 0.0 }
 0x23d   : > { %3497 = vmatmul.mubr.msk.bf16.vlgmr.msra.gmra.mrb[52].mxu1 %vm932_vm7, %v2253_v28  ;;  %v2668_v7 = vpack.c.bf16 %v918_v19, %v918_v19  ;;  %v4283_v6 = vpack.c.bf16 %v919_v14, %v918_v19 }
 0x23e   : > { %3507 = vmatpush3.bf16.msra.mxu1 %v3951_v20  ;;  %3508 = vmatprep.mubr.msk.bf16.mxu1 %vm3656_vm1, %v3655_v3 }
 0x23f   : > { %3518 = vmatprep.subr.bf16.mxu1 %v3655_v3  ;;  %3551 = vmatmul.mubr.msk.bf16.vlgmr.msra.gmra.mrb[72].mxu0 %vm932_vm7, %v2668_v7  ;;  %v2775_v8 = vrot.slane %v4283_v6, 1  ;;  %v2722_v1 = vshll.u32 %v4283_v6, 16 }
 0x240   : > { %3562 = vmatprep.mubr.msk.bf16.mxu0 %vm3656_vm1, %v3655_v3  ;;  %3561 = vmatpush3.bf16.msra.mxu0 %v2780_v60 }
 0x241   : > { %v2724_v2 = vrot.slane %v2722_v1, 1 }
 0x247   : > { %3563 = vmatmul.mubr.msk.bf16.vlgmr.msra.gmra.mrb[76].mxu0 %vm932_vm7, %v2775_v8 }
 0x2de   : > { %v2439_v37 = vpop.f32.mrb[60].mxu0 }
 0x2df   : > { %v3516_v10 = vpop.f32.mrb[61].mxu0 }
 0x2f0   : > { %v1920_v21 = vpop.f32.mrb[36].mxu1 }
 0x2f1   : > { %v1921_v18 = vadd.f32 %v4161_v41, %v1920_v21  ;;  %v3450_v0 = vpop.f32.mrb[37].mxu1 }
 0x2f2   : > { %v1923_v5 = vpop.f32.mrb[38].mxu1 }
 0x2f3   : > { %3209 = vst.msk [vmem:[%s4168_s25 + $0x8] sm:$0xff] %vm1454_vm9, %v1921_v18  ;;  %v3451_v22 = vpop.f32.mrb[39].mxu1 }
 0x2f8   : > { %v2010_v23 = vpop.f32.mrb[40].mxu1 }
 0x2f9   : > { %v2011_v16 = vadd.f32 %v2010_v23, %v4223_v29  ;;  %v3462_v24 = vpop.f32.mrb[41].mxu1 }
 0x2fa   : > { %v2013_v25 = vpop.f32.mrb[42].mxu1 }
 0x2fb   : > { %v3463_v26 = vpop.f32.mrb[43].mxu1  ;;  %v2060_v27 = vadd.f32 %v4225_v35, %v2011_v16 }
 0x300   : > { %v2099_v28 = vpop.f32.mrb[44].mxu1 }
 0x301   : > { %v2105_v31 = vadd.f32 %v2099_v28, %v2060_v27  ;;  %v3474_v32 = vpop.f32.mrb[45].mxu1 }
 0x302   : > { %v2102_v33 = vpop.f32.mrb[46].mxu1 }
 0x303   : > { %v3475_v36 = vpop.f32.mrb[47].mxu1  ;;  %v2150_v38 = vadd.f32 %v4227_v45, %v2105_v31 }
 0x308   : > { %v2189_v43 = vpop.f32.mrb[48].mxu1 }
 0x309   : > { %v2195_v46 = vadd.f32 %v2189_v43, %v2150_v38  ;;  %v3486_v47 = vpop.f32.mrb[49].mxu1 }
 0x30a   : > { %v2192_v48 = vpop.f32.mrb[50].mxu1 }
 0x30b   : > { %v3487_v50 = vpop.f32.mrb[51].mxu1  ;;  %v2244_v29 = vadd.f32 %v4229_v49, %v2195_v46  ;;  %v3235_v49 = vld [vmem:[%s4374_s8 + $0xc] sm:$0xf] }
 0x310   : > { %v2294_v51 = vpop.f32.mrb[52].mxu1 }
 0x311   : > { %v2300_v53 = vadd.f32 %v2294_v51, %v2244_v29  ;;  %v3498_v55 = vpop.f32.mrb[53].mxu1 }
 0x312   : > { %v2297_v57 = vpop.f32.mrb[54].mxu1 }
 0x313   : > { %v2350_v35 = vadd.f32 %v4231_v54, %v2300_v53  ;;  %v3499_v58 = vpop.f32.mrb[55].mxu1  ;;  %v2535_v54 = vsel %vm936_vm0, %v3235_v49, 0 }
 0x315   : > { %v2351_v45 = vadd.f32 %v4027_v30, %v2350_v35 }
 0x317   : > { %3227 = vst.msk [vmem:[%s4034_s26 + $0x10] sm:$0xff] %vm932_vm7, %v2351_v45  ;;  %v2354_v61 = vpack.c.bf16 %v2351_v45, %v2351_v45 }
 0x319   : > { %3509 = vmatmul.mubr.msk.bf16.vlgmr.msra.gmra.mrb[56].mxu1 %vm932_vm7, %v2354_v61 }
 0x31a   : > { %3519 = vmatpush3.bf16.msra.mxu1 %v2446_v62  ;;  %3520 = vmatprep.mubr.msk.bf16.mxu1 %vm3656_vm1, %v3655_v3 }
 0x31b   : > { %3530 = vmatprep.subr.bf16.mxu1 %v3655_v3 }
 0x321   : > { %3521 = vmatmul.mubr.msk.bf16.vlgmr.msra.gmra.mrb[60].mxu1 %vm932_vm7, %v3998_v39  ;;  %v3243_v39 = vld [vmem:[%s4374_s8 + $0x1c] sm:$0xf] }
 0x322   : > { %3531 = vmatpush3.bf16.msra.mxu1 %v2535_v54  ;;  %3532 = vmatprep.mubr.msk.bf16.mxu1 %vm3656_vm1, %v3655_v3  ;;  %v2730_v44 = vsel %vm936_vm0, %v3243_v39, 0 }
 0x323   : > { %3542 = vmatprep.subr.bf16.mxu1 %v3655_v3 }
 0x329   : > { %3533 = vmatmul.mubr.msk.bf16.vlgmr.msra.gmra.mrb[64].mxu1 %vm932_vm7, %v4139_v34  ;;  %v2720_v34 = vshrl.u32 %v4283_v6, 16 }
 0x32a   : > { %3543 = vmatpush3.bf16.msra.mxu1 %v2625_v52  ;;  %3544 = vmatprep.mubr.msk.bf16.mxu1 %vm3656_vm1, %v3655_v3 }
 0x32b   : > { %3554 = vmatprep.subr.bf16.mxu1 %v3655_v3  ;;  %v2725_v4 = vor.u32 %v2724_v2, %v2720_v34 }
 0x331   : > { %3545 = vmatmul.mubr.msk.bf16.vlgmr.msra.gmra.mrb[68].mxu1 %vm932_vm7, %v2303_v40  ;;  %v2442_v40 = vpop.f32.mrb[62].mxu0 }
 0x332   : > { %3555 = vmatpush3.bf16.msra.mxu1 %v2730_v44  ;;  %3556 = vmatprep.mubr.msk.bf16.mxu1 %vm3656_vm1, %v3655_v3  ;;  %v3517_v11 = vpop.f32.mrb[63].mxu0 }
 0x333   : > { %3566 = vmatprep.subr.bf16.mxu1 %v3655_v3  ;;  %v2526_v42 = vpop.f32.mrb[64].mxu0 }
 0x334   : > { %v3528_v12 = vpop.f32.mrb[65].mxu0 }
 0x335   : > { %v2529_v13 = vpop.f32.mrb[66].mxu0 }
 0x336   : > { %v3529_v15 = vpop.f32.mrb[67].mxu0 }
 0x337   : > { %v2616_v17 = vpop.f32.mrb[68].mxu0 }
 0x338   : > { %v3540_v56 = vpop.f32.mrb[69].mxu0 }
 0x339   : > { %3557 = vmatmul.mubr.msk.bf16.vlgmr.msra.gmra.mrb[72].mxu1 %vm932_vm7, %v2725_v4  ;;  %v2619_v19 = vpop.f32.mrb[70].mxu0 }
 0x33a   : > { %3567 = vmatpush3.bf16.msra.mxu1 %v3951_v20  ;;  %3568 = vmatprep.mubr.msk.bf16.mxu1 %vm3656_vm1, %v3655_v3  ;;  %v3541_v7 = vpop.f32.mrb[71].mxu0 }
 0x33b   : > { %v2710_v14 = vpop.f32.mrb[72].mxu0 }
 0x33c   : > { %v3552_v9 = vpop.f32.mrb[73].mxu0 }
 0x33d   : > { %v2713_v6 = vpop.f32.mrb[74].mxu0 }
 0x33e   : > { %v3553_v20 = vpop.f32.mrb[75].mxu0 }
 0x33f   : > { %v2816_v60 = vpop.f32.mrb[76].mxu0 }
 0x340   : > { %v3564_v8 = vpop.f32.mrb[77].mxu0 }
 0x341   : > { %v2819_v3 = vpop.f32.mrb[78].mxu0 }
 0x342   : > { %v3565_v21 = vpop.f32.mrb[79].mxu0 }
 0x3ec   : > { %v2392_v18 = vpop.f32.mrb[56].mxu1 }
 0x3ed   : > { %v2393_v0 = vadd.f32 %v4161_v41, %v2392_v18  ;;  %v3510_v5 = vpop.f32.mrb[57].mxu1 }
 0x3ee   : > { %v2395_v22 = vpop.f32.mrb[58].mxu1 }
 0x3ef   : > { %3229 = vst.msk [vmem:[%s4168_s25 + $0x10] sm:$0xff] %vm1454_vm9, %v2393_v0  ;;  %v3511_v23 = vpop.f32.mrb[59].mxu1 }
 0x3f4   : > { %v2482_v16 = vpop.f32.mrb[60].mxu1 }
 0x3f5   : > { %v2483_v24 = vadd.f32 %v2482_v16, %v2439_v37  ;;  %v3522_v25 = vpop.f32.mrb[61].mxu1 }
 0x3f6   : > { %v2485_v26 = vpop.f32.mrb[62].mxu1 }
 0x3f7   : > { %v3523_v27 = vpop.f32.mrb[63].mxu1  ;;  %v2532_v28 = vadd.f32 %v2526_v42, %v2483_v24 }
 0x3fc   : > { %v2571_v31 = vpop.f32.mrb[64].mxu1 }
 0x3fd   : > { %v2577_v32 = vadd.f32 %v2571_v31, %v2532_v28  ;;  %v3534_v33 = vpop.f32.mrb[65].mxu1 }
 0x3fe   : > { %v2574_v36 = vpop.f32.mrb[66].mxu1 }
 0x3ff   : > { %v3535_v38 = vpop.f32.mrb[67].mxu1  ;;  %v2622_v43 = vadd.f32 %v2616_v17, %v2577_v32 }
 0x404   : > { %v2661_v46 = vpop.f32.mrb[68].mxu1 }
 0x405   : > { %v2667_v47 = vadd.f32 %v2661_v46, %v2622_v43  ;;  %v3546_v48 = vpop.f32.mrb[69].mxu1 }
 0x406   : > { %v2664_v50 = vpop.f32.mrb[70].mxu1 }
 0x407   : > { %v3547_v29 = vpop.f32.mrb[71].mxu1  ;;  %v2716_v51 = vadd.f32 %v2710_v14, %v2667_v47 }
 0x40c   : > { %v2766_v53 = vpop.f32.mrb[72].mxu1 }
 0x40d   : > { %v2772_v55 = vadd.f32 %v2766_v53, %v2716_v51  ;;  %v3558_v57 = vpop.f32.mrb[73].mxu1 }
 0x40e   : > { %v2769_v35 = vpop.f32.mrb[74].mxu1 }
 0x40f   : > { %v2822_v58 = vadd.f32 %v2816_v60, %v2772_v55  ;;  %v3559_v59 = vpop.f32.mrb[75].mxu1 }
 0x411   : > { %v2823_v45 = vadd.f32 %v4027_v30, %v2822_v58 }
 0x413   : > { %3247 = vst.msk [vmem:[%s4034_s26 + $0x18] sm:$0xff] %vm932_vm7, %v2823_v45  ;;  %v2826_v61 = vpack.c.bf16 %v2823_v45, %v2823_v45 }
 0x415   : > { %3569 = vmatmul.mubr.msk.bf16.vlgmr.msra.gmra.mrb[76].mxu1 %vm932_vm7, %v2826_v61 }
 0x4e8   : > { %v2864_v62 = vpop.f32.mrb[76].mxu1 }
 0x4e9   : > { %v2865_v49 = vadd.f32 %v4161_v41, %v2864_v62  ;;  %v3570_v54 = vpop.f32.mrb[77].mxu1 }
 0x4ea   : > { %v2867_v63 = vpop.f32.mrb[78].mxu1 }
 0x4eb   : > { %3249 = vst.msk [vmem:[%s4168_s25 + $0x18] sm:$0xff] %vm1454_vm9, %v2865_v49  ;;  %v3571_v52 = vpop.f32.mrb[79].mxu1 }
 0x4ec PF: > { %s24_s29 = sadd.s32 1, %s3653_s29   ;;  %s4386_s26 = sld [smem:[#allocation2_spill]] }
 0x4ed   : > { %p21_p3 = scmp.ge.s32.totalorder %s24_s29, 6   ;;  %s4387_s21 = sld [smem:[#allocation3_spill]] }
 0x4ee   : > { %s4388_s28 = sld [smem:[#allocation4_spill]]  ;;  %s4389_s25 = smov %s3645_s27 }
 0x4ef   :  { %23 = sbr.rel (!%p21_p3) target bundleno = 3 (0x3), region = 139 }
 0x4f3   : > { %s4390_s27 = smov %s4387_s21 }

</bundles_post_ra>
